<compile_context>
chip_gen: v7x
topology: tpu7x:2x2x1
jax: 0.10.0
libtpu: 0.0.40
codegen_flags: <defaults>
</compile_context>

<pallas_src>
import functools

import jax
import jax.numpy as jnp
from jax.experimental import pallas as pl
from jax.experimental.pallas import tpu as pltpu


# Finite "minus infinity": exp(mask - rowmax) == 0.0 exactly, no inf-inf NaN.
_MASK_NEG = -1e30


# ----------------------------------------------------------------------------
# Pallas kernel: AttentionalPropagation (+ residual) for one block of rows
# ----------------------------------------------------------------------------
def _attn_prop_kernel(*refs, self_attn, dense, rows_per_block, seq_len,
                      approx_recip):
    f32 = jnp.float32

    # ---- unpack refs (layout depends on the static self/cross + dense flags)
    i = 0
    x_ref = refs[i]; i += 1
    if self_attn:
        s_ref = x_ref                      # self layer: source == x (one DMA)
    else:
        s_ref = refs[i]; i += 1            # cross layer: swapped-half block
    mask_ref = None
    if dense:
        mask_ref = refs[i]; i += 1         # (TBW, TBW) block-diagonal bias
    if self_attn:
        wqkv_ref, bqkv_ref = refs[i], refs[i + 1]; i += 2
    else:
        wq_ref, bq_ref, wkv_ref, bkv_ref = refs[i:i + 4]; i += 4
    (wm_ref, bm_ref, w1x_ref, w1m_ref, b1_ref, w2_ref, b2_ref) = refs[i:i + 7]
    out_ref = refs[i + 7]

    md = wm_ref.dtype                      # MXU input dtype (f32 or bf16)
    c = out_ref.shape[-1]

    x_raw = x_ref[...]
    x2 = x_raw.astype(f32)                 # f32 copy for the residual
    xm = x_raw.astype(md)

    # --- MultiHeadedAttention.proj: fused 1x1 convs (q|k|v or k|v) so the
    #     MXU N-dim is 256/384.  1/sqrt(d_model) is pre-folded into Wq/bq.
    if self_attn:
        qkv = (jnp.dot(xm, wqkv_ref[...], preferred_element_type=f32)
               + bqkv_ref[...])
        q, k, v = qkv[:, :c], qkv[:, c:2 * c], qkv[:, 2 * c:]   # 128-lane aligned
    else:
        sm = s_ref[...].astype(md)
        q = jnp.dot(xm, wq_ref[...], preferred_element_type=f32) + bq_ref[...]
        kv = (jnp.dot(sm, wkv_ref[...], preferred_element_type=f32)
              + bkv_ref[...])
        k, v = kv[:, :c], kv[:, c:]

    qm, km, vm = q.astype(md), k.astype(md), v.astype(md)

    if dense:
        # --- dense masked attention: one (TBW, TBW) scores matmul + one
        #     (TBW, C) PV matmul.  The block-diagonal bias keeps the
        #     per-(b, h)-row softmax semantics while filling the MXU and
        #     keeping softmax vregs lane-dense; exp(masked)=0 so PV is exact.
        scores = jnp.einsum("qc,kc->qk", qm, km, preferred_element_type=f32)
        scores = scores + mask_ref[...]
        scores = scores - jnp.max(scores, axis=-1, keepdims=True)
        e = jnp.exp(scores)
        denom = jnp.sum(e, axis=-1, keepdims=True)
        if approx_recip:
            prob = e * pl.reciprocal(denom, approx=True)   # EUP slot, ~free
        else:
            prob = e / denom                               # exact (f32 path)
        attn = jnp.dot(prob.astype(md), vm, preferred_element_type=f32)
    else:
        # --- batched fallback for seq_len >= 128 (already lane-dense).
        # TODO(synk): for real SuperGlue sizes (W ~ 1-2K keypoints) tile the
        # key axis flash-style (online max/sum) and size the blocks against
        # v7x's 64 MiB VMEM, not 128 MiB.
        tb, w = rows_per_block, seq_len
        q3 = qm.reshape(tb, w, c)
        k3 = km.reshape(tb, w, c)
        v3 = vm.reshape(tb, w, c)
        scores = jnp.einsum("bqc,bkc->bqk", q3, k3, preferred_element_type=f32)
        scores = scores - jnp.max(scores, axis=-1, keepdims=True)
        e = jnp.exp(scores)
        denom = jnp.sum(e, axis=-1, keepdims=True)
        if approx_recip:
            prob = e * pl.reciprocal(denom, approx=True)
        else:
            prob = e / denom
        attn = jnp.einsum("bqk,bkc->bqc", prob.astype(md), v3,
                          preferred_element_type=f32).reshape(tb * w, c)

    # --- MultiHeadedAttention.merge (1x1 conv) ---
    msg = (jnp.dot(attn.astype(md), wm_ref[...], preferred_element_type=f32)
           + bm_ref[...])

    # --- MLP on cat([x, message], channel dim): the concat is eliminated by
    #     splitting W1 host-side; eval-mode BN is folded into W1/b1.
    h = (jnp.dot(xm, w1x_ref[...], preferred_element_type=f32)
         + jnp.dot(msg.astype(md), w1m_ref[...], preferred_element_type=f32)
         + b1_ref[...])
    h = jnp.maximum(h, 0.0)                                     # ReLU
    delta = (jnp.dot(h.astype(md), w2_ref[...], preferred_element_type=f32)
             + b2_ref[...])

    # --- residual update (desc + delta); lane-dense store for C >= 128 ---
    out_ref[...] = (x2 + delta).astype(out_ref.dtype)


# ----------------------------------------------------------------------------
# pallas_call wrapper: one call handles the stacked desc0/desc1 rows
# ----------------------------------------------------------------------------
_CROSS_PROJ = ("wqT", "bq", "wkvT", "bkv")
_SELF_PROJ = ("wqkvT", "bqkv")
_SHARED_W = ("wmT", "bm", "w1xT", "w1mT", "b1", "w2T", "b2")

# One-time capability probe for pipeline_mode=pl.Buffered(1) on resident specs.
_WEIGHT_BUFFERING = {"supported": None}


def _resident_spec(shape, buffered):
    """Weight / mask spec: constant index_map -> resident across the grid.
    Buffered(1) (when supported) drops the pointless second buffer."""
    nd = len(shape)
    index_map = lambda i, _nd=nd: (0,) * _nd
    if buffered:
        return pl.BlockSpec(shape, index_map, pipeline_mode=pl.Buffered(1))
    return pl.BlockSpec(shape, index_map)


def _block_diag_mask(rows_per_block, seq_len):
    """Additive bias: 0 inside each (b, h) row-group's W x W block, -1e30
    elsewhere (large FINITE negative, applied before the row max)."""
    n = rows_per_block * seq_len
    g = jnp.arange(n, dtype=jnp.int32) // seq_len
    return jnp.where(g[:, None] == g[None, :], 0.0, _MASK_NEG).astype(jnp.float32)


def attentional_propagation_stacked(d_all, kp, *, cross, seq_len,
                                    rows_per_block, mask=None,
                                    approx_recip=False):
    """d_all: (N, C), N = 2 * (#row-groups per descriptor) * seq_len; each group
    of `seq_len` consecutive rows is one (b, h) attention row; desc0 rows sit
    in the first half, desc1 rows in the second.
    Returns x + mlp(cat(x, attn(x, source, source)))."""
    n_pos, c = d_all.shape
    block_rows = rows_per_block * seq_len
    assert n_pos % block_rows == 0
    nblocks = n_pos // block_rows
    assert nblocks % 2 == 0, "both descriptors must be covered by whole blocks"
    nb_half = nblocks // 2
    assert block_rows % 8 == 0 or block_rows == n_pos, "need sublane-aligned blocks"

    dense = seq_len < 128                  # batched path is lane-sparse -> dense
    if dense and mask is None:
        mask = _block_diag_mask(rows_per_block, seq_len)

    row_spec = pl.BlockSpec((block_rows, c), lambda i: (i, 0))
    inputs, in_specs = [d_all], [row_spec]
    if cross:
        # Source rows = matching (b, h) block of the OTHER descriptor, fetched
        # via an index_map half-swap instead of a per-layer HBM concatenate.
        inputs.append(d_all)
        in_specs.append(pl.BlockSpec(
            (block_rows, c),
            lambda i, _nh=nb_half, _nb=nblocks: ((i + _nh) % _nb, 0)))

    weights = (([mask] if dense else [])
               + [kp[n] for n in (_CROSS_PROJ if cross else _SELF_PROJ)]
               + [kp[n] for n in _SHARED_W])

    kernel = functools.partial(
        _attn_prop_kernel, self_attn=not cross, dense=dense,
        rows_per_block=rows_per_block, seq_len=seq_len,
        approx_recip=approx_recip)

    def run(buffered):
        return pl.pallas_call(
            kernel,
            out_shape=jax.ShapeDtypeStruct((n_pos, c), d_all.dtype),
            grid=(nblocks,),
            in_specs=in_specs + [_resident_spec(w.shape, buffered) for w in weights],
            out_specs=row_spec,
            compiler_params=pltpu.CompilerParams(
                dimension_semantics=("parallel",)),
        )(*inputs, *weights)

    if _WEIGHT_BUFFERING["supported"] is None:
        try:
            out = run(True)
            _WEIGHT_BUFFERING["supported"] = True
        except Exception:      # pl.Buffered(1) not accepted -> plain resident specs
            _WEIGHT_BUFFERING["supported"] = False
            out = run(False)
        return out
    return run(_WEIGHT_BUFFERING["supported"])


def _pick_rows_per_block(n_groups_per_desc, seq_len, target_m=256):
    """Largest divisor tb of the per-descriptor row-group count with
    tb*seq_len <= target_m (256 fills the v6e/v7x MXU M-dim; fine on v5e too).
    Restricting tb to divisors of the per-descriptor count keeps the grid even
    and >= 2 (both v7x TensorCores get work) and makes the cross-layer
    half-swap index_map exact."""
    best = 1
    for tb in range(1, n_groups_per_desc + 1):
        if n_groups_per_desc % tb == 0 and tb * seq_len <= target_m:
            best = tb
    return best


# ----------------------------------------------------------------------------
# AttentionalGNN wrapper (layout plumbing + layer loop)
# ----------------------------------------------------------------------------
def attentional_gnn_forward(desc0, desc1, kp, layer_names, *,
                            rows_per_block=None, target_m=256,
                            approx_recip=False, act_dtype=jnp.float32):
    B, C, H, W = desc0.shape
    half = B * H * W                       # positions per descriptor

    def to_flat(d):                        # NCHW -> (B*H*W, C), groups of W rows
        return jnp.transpose(d, (0, 2, 3, 1)).reshape(half, C)

    def from_flat(r):                      # (B*H*W, C) -> NCHW
        return jnp.transpose(r.reshape(B, H, W, C), (0, 3, 1, 2))

    if rows_per_block is None:
        rows_per_block = _pick_rows_per_block(B * H, W, target_m)

    mask = _block_diag_mask(rows_per_block, W) if W < 128 else None

    # Stack desc0/desc1 once so each GNN layer is a single pallas_call
    # (weights DMA'd once per layer, one launch per layer).  act_dtype=bf16
    # halves inter-layer activation HBM traffic (useful on v5e); the residual
    # is still accumulated in f32 inside the kernel.
    d_all = jnp.concatenate([to_flat(desc0), to_flat(desc1)],
                            axis=0).astype(act_dtype)
    for name in layer_names:
        d_all = attentional_propagation_stacked(
            d_all, kp, cross=(name == "cross"), seq_len=W,
            rows_per_block=rows_per_block, mask=mask,
            approx_recip=approx_recip)
    return from_flat(d_all[:half]), from_flat(d_all[half:])


# ----------------------------------------------------------------------------
# Deterministic parameter init (shapes from the module __init__)
# ----------------------------------------------------------------------------
def init_params(key, feature_dim, scale=0.05):
    C, C2 = feature_dim, 2 * feature_dim
    ks = jax.random.split(key, 16)

    def mat(k, shape):
        return (scale * jax.random.normal(k, shape)).astype(jnp.float32)

    return {
        # MultiHeadedAttention: proj (q, k, v) and merge, all Conv2d(C, C, 1)
        "Wq": mat(ks[0], (C, C)), "bq": mat(ks[1], (C,)),
        "Wk": mat(ks[2], (C, C)), "bk": mat(ks[3], (C,)),
        "Wv": mat(ks[4], (C, C)), "bv": mat(ks[5], (C,)),
        "Wm": mat(ks[6], (C, C)), "bm": mat(ks[7], (C,)),
        # MLP([2C, 2C, C]): Conv2d(2C,2C,1) -> BN(2C) -> ReLU -> Conv2d(2C,C,1)
        "W1": mat(ks[8], (C2, C2)), "b1": mat(ks[9], (C2,)),
        "bn_gamma": (1.0 + 0.05 * jax.random.normal(ks[10], (C2,))
                     ).astype(jnp.float32),
        "bn_beta": mat(ks[11], (C2,)),
        "bn_mean": mat(ks[12], (C2,)),
        "bn_var": (jnp.abs(mat(ks[13], (C2,))) + 1.0).astype(jnp.float32),
        # Conv2d(2C, C, 1): weight is (C_out=C, C_in=2C)
        "W2": mat(ks[14], (C, C2)),
        "b2": jnp.zeros((C,), jnp.float32),  # nn.init.constant_(mlp[-1].bias, 0)
    }


def params_for_kernel(p, eps=1e-5, matmul_dtype=jnp.float32):
    """Host-side prep: transpose for row-major matmuls, fold 1/sqrt(d_model)
    into Wq/bq, fold eval-mode BN into W1/b1, split W1 into x/message halves,
    fuse k|v (cross) and q|k|v (self) projections, cast to the MXU dtype."""
    C = p["Wq"].shape[0]
    sq = jnp.float32(C) ** -0.5
    bn_scale = p["bn_gamma"] / jnp.sqrt(p["bn_var"] + eps)
    bn_shift = p["bn_beta"] - p["bn_mean"] * bn_scale
    w1T = p["W1"].T * bn_scale[None, :]           # (2C_in, 2C_out), BN folded
    b1 = p["b1"] * bn_scale + bn_shift
    wqT, bq = p["Wq"].T * sq, p["bq"] * sq        # score scale folded
    wkT, wvT = p["Wk"].T, p["Wv"].T

    def w(x):   # MXU operand; bf16 halves weight DMA + VMEM on ALL generations
        return x.astype(matmul_dtype)

    def b(x):   # biases stay f32: added into the f32 accumulator
        return x.astype(jnp.float32)[None, :]

    return {
        # cross layers: q from x, fused k|v from the source
        "wqT": w(wqT), "bq": b(bq),
        "wkvT": w(jnp.concatenate([wkT, wvT], axis=1)),
        "bkv": b(jnp.concatenate([p["bk"], p["bv"]])),
        # self layers: fused q|k|v (x == source), one (C, 3C) matmul
        "wqkvT": w(jnp.concatenate([wqT, wkT, wvT], axis=1)),
        "bqkv": b(jnp.concatenate([bq, p["bk"], p["bv"]])),
        # merge + MLP
        "wmT": w(p["Wm"].T), "bm": b(p["bm"]),
        "w1xT": w(w1T[:C]), "w1mT": w(w1T[C:]), "b1": b(b1),
        "w2T": w(p["W2"].T), "b2": b(p["b2"]),
    }


# ----------------------------------------------------------------------------
# Pure-JAX reference (mirrors the PyTorch NCHW semantics, eval-mode BN)
# ----------------------------------------------------------------------------
def _conv1x1(x, w, b):  # x: (B, Cin, H, W), w: (Cout, Cin), b: (Cout,)
    return (jnp.einsum("oi,bihw->bohw", w, x,
                       precision=jax.lax.Precision.HIGHEST)
            + b[None, :, None, None])


def _ref_prop(x, s, p, eps=1e-5):
    q = _conv1x1(x, p["Wq"], p["bq"])
    k = _conv1x1(s, p["Wk"], p["bk"])
    v = _conv1x1(s, p["Wv"], p["bv"])
    dim = q.shape[1]
    scores = jnp.einsum("bdhn,bdhm->bhnm", q, k,
                        precision=jax.lax.Precision.HIGHEST) / dim ** 0.5
    prob = jax.nn.softmax(scores, axis=-1)
    att = jnp.einsum("bhnm,bdhm->bdhn", prob, v,
                     precision=jax.lax.Precision.HIGHEST)
    msg = _conv1x1(att, p["Wm"], p["bm"])
    cat = jnp.concatenate([x, msg], axis=1)
    h = _conv1x1(cat, p["W1"], p["b1"])
    scale = p["bn_gamma"] / jnp.sqrt(p["bn_var"] + eps)
    shift = p["bn_beta"] - p["bn_mean"] * scale
    h = h * scale[None, :, None, None] + shift[None, :, None, None]
    h = jnp.maximum(h, 0.0)
    return x + _conv1x1(h, p["W2"], p["b2"])


def _ref_gnn(d0, d1, p, names):
    for name in names:
        s0, s1 = (d1, d0) if name == "cross" else (d0, d1)
        n0, n1 = _ref_prop(d0, s0, p), _ref_prop(d1, s1, p)
        d0, d1 = n0, n1
    return d0, d1


# ----------------------------------------------------------------------------
if __name__ == "__main__":
    # feature_dim=128: divisible by num_heads=4 and >= 128 lanes so the row
    # loads/stores are lane-dense.  Auto block sizing picks TB=8 -> blocks of
    # 128 rows over an even grid of 2 (both v7x TCs busy, near-full MXU).
    B, C, H, W = 2, 128, 4, 16
    layer_names = ["self", "cross"]

    key = jax.random.PRNGKey(0)
    kp_key, k0, k1 = jax.random.split(key, 3)
    params = init_params(kp_key, C)

    desc0 = jax.random.normal(k0, (B, C, H, W), jnp.float32)
    desc1 = jax.random.normal(k1, (B, C, H, W), jnp.float32)

    ref0, ref1 = _ref_gnn(desc0, desc1, params, layer_names)

    # 1) f32 MXU path -- tight check.
    kp_f32 = params_for_kernel(params, matmul_dtype=jnp.float32)
    out0, out1 = attentional_gnn_forward(desc0, desc1, kp_f32, layer_names)
    out0 = jax.block_until_ready(out0)
    out1 = jax.block_until_ready(out1)
    assert jnp.allclose(out0, ref0, atol=1e-3, rtol=1e-3), "desc0 mismatch (f32)"
    assert jnp.allclose(out1, ref1, atol=1e-3, rtol=1e-3), "desc1 mismatch (f32)"

    # 2) bf16 weights, f32 activations, EUP approx reciprocal: full-rate MXU
    #    and half the weight DMA on every generation (v5e included).
    kp_bf16 = params_for_kernel(params, matmul_dtype=jnp.bfloat16)
    b0, b1 = attentional_gnn_forward(desc0, desc1, kp_bf16, layer_names,
                                     approx_recip=True)
    b0 = jax.block_until_ready(b0)
    b1 = jax.block_until_ready(b1)
    assert jnp.allclose(b0, ref0, atol=5e-2, rtol=5e-2), "desc0 mismatch (bf16)"
    assert jnp.allclose(b1, ref1, atol=5e-2, rtol=5e-2), "desc1 mismatch (bf16)"

    # 3) low-HBM config (best on v5e): bf16 weights AND bf16 inter-layer
    #    activation storage, f32 accumulation/residual in-kernel.
    c0, c1 = attentional_gnn_forward(desc0, desc1, kp_bf16, layer_names,
                                     approx_recip=True, act_dtype=jnp.bfloat16)
    c0 = jax.block_until_ready(c0)
    c1 = jax.block_until_ready(c1)
    assert jnp.allclose(c0.astype(jnp.float32), ref0, atol=1e-1, rtol=1e-1), \
        "desc0 mismatch (bf16 acts)"
    assert jnp.allclose(c1.astype(jnp.float32), ref1, atol=1e-1, rtol=1e-1), \
        "desc1 mismatch (bf16 acts)"

    print("KERNEL_OK")
</pallas_src>

<mosaic_0001>
module attributes {stable_mosaic.version = 11 : i64} {
  func.func @_attn_prop_kernel(%arg0: i32, %arg1: memref<128x128xf32, #tpu.memory_space<vmem>>, %arg2: memref<128x128xf32, #tpu.memory_space<vmem>>, %arg3: memref<128x384xf32, #tpu.memory_space<vmem>>, %arg4: memref<1x384xf32, #tpu.memory_space<vmem>>, %arg5: memref<128x128xf32, #tpu.memory_space<vmem>>, %arg6: memref<1x128xf32, #tpu.memory_space<vmem>>, %arg7: memref<128x256xf32, #tpu.memory_space<vmem>>, %arg8: memref<128x256xf32, #tpu.memory_space<vmem>>, %arg9: memref<1x256xf32, #tpu.memory_space<vmem>>, %arg10: memref<256x128xf32, #tpu.memory_space<vmem>>, %arg11: memref<1x128xf32, #tpu.memory_space<vmem>>, %arg12: memref<128x128xf32, #tpu.memory_space<vmem>>) attributes {dimension_semantics = [#tpu.dimension_semantics<parallel>], iteration_bounds = array<i64: 2>, scalar_prefetch = 0 : i64, scratch_operands = 0 : i64, tpu.core_type = #tpu.core_type<tc>, window_params = [{transform_indices = @transform_0, window_bounds = array<i64: 128, 128>}, {pipeline_mode = #tpu.pipeline_mode<synchronous>, transform_indices = @transform_1, window_bounds = array<i64: 128, 128>}, {pipeline_mode = #tpu.pipeline_mode<synchronous>, transform_indices = @transform_2, window_bounds = array<i64: 128, 384>}, {pipeline_mode = #tpu.pipeline_mode<synchronous>, transform_indices = @transform_3, window_bounds = array<i64: 1, 384>}, {pipeline_mode = #tpu.pipeline_mode<synchronous>, transform_indices = @transform_4, window_bounds = array<i64: 128, 128>}, {pipeline_mode = #tpu.pipeline_mode<synchronous>, transform_indices = @transform_5, window_bounds = array<i64: 1, 128>}, {pipeline_mode = #tpu.pipeline_mode<synchronous>, transform_indices = @transform_6, window_bounds = array<i64: 128, 256>}, {pipeline_mode = #tpu.pipeline_mode<synchronous>, transform_indices = @transform_7, window_bounds = array<i64: 128, 256>}, {pipeline_mode = #tpu.pipeline_mode<synchronous>, transform_indices = @transform_8, window_bounds = array<i64: 1, 256>}, {pipeline_mode = #tpu.pipeline_mode<synchronous>, transform_indices = @transform_9, window_bounds = array<i64: 256, 128>}, {pipeline_mode = #tpu.pipeline_mode<synchronous>, transform_indices = @transform_10, window_bounds = array<i64: 1, 128>}, {transform_indices = @transform_11, window_bounds = array<i64: 128, 128>}]} {
    %c0 = arith.constant 0 : index
    %c0_0 = arith.constant 0 : index
    %0 = vector.load %arg1[%c0, %c0_0] : memref<128x128xf32, #tpu.memory_space<vmem>>, vector<128x128xf32>
    %c0_1 = arith.constant 0 : index
    %c0_2 = arith.constant 0 : index
    %1 = vector.load %arg3[%c0_1, %c0_2] : memref<128x384xf32, #tpu.memory_space<vmem>>, vector<128x384xf32>
    %cst = arith.constant dense<0.000000e+00> : vector<128x384xf32>
    %2 = tpu.matmul %0, %1, %cst {dimension_numbers = #tpu.dot_dimension_numbers<[1], [0], [0], [1], [0, 0, 1, 1], [], []>} : vector<128x128xf32>, vector<128x384xf32>, vector<128x384xf32> -> vector<128x384xf32>
    %c0_3 = arith.constant 0 : index
    %c0_4 = arith.constant 0 : index
    %3 = vector.load %arg4[%c0_3, %c0_4] : memref<1x384xf32, #tpu.memory_space<vmem>>, vector<1x384xf32>
    %4 = vector.broadcast %3 : vector<1x384xf32> to vector<128x384xf32>
    %5 = arith.addf %2, %4 : vector<128x384xf32>
    %6 = vector.extract_strided_slice %5 {offsets = [0, 0], sizes = [128, 128], strides = [1, 1]} : vector<128x384xf32> to vector<128x128xf32>
    %7 = vector.extract_strided_slice %5 {offsets = [0, 128], sizes = [128, 128], strides = [1, 1]} : vector<128x384xf32> to vector<128x128xf32>
    %8 = vector.extract_strided_slice %5 {offsets = [0, 256], sizes = [128, 128], strides = [1, 1]} : vector<128x384xf32> to vector<128x128xf32>
    "tpu.trace_start"() <{level = 10 : i32, message = "qc,kc->qk"}> : () -> ()
    %cst_5 = arith.constant dense<0.000000e+00> : vector<128x128xf32>
    %9 = tpu.matmul %6, %7, %cst_5 {dimension_numbers = #tpu.dot_dimension_numbers<[1], [1], [0], [0], [0, 0, 1, 0], [], []>} : vector<128x128xf32>, vector<128x128xf32>, vector<128x128xf32> -> vector<128x128xf32>
    "tpu.trace_stop"() : () -> ()
    %c0_6 = arith.constant 0 : index
    %c0_7 = arith.constant 0 : index
    %10 = vector.load %arg2[%c0_6, %c0_7] : memref<128x128xf32, #tpu.memory_space<vmem>>, vector<128x128xf32>
    %11 = arith.addf %9, %10 : vector<128x128xf32>
    %cst_8 = arith.constant dense<0xFF800000> : vector<128xf32>
    %12 = vector.multi_reduction <maximumf>, %11, %cst_8 [1] : vector<128x128xf32> to vector<128xf32>
    %13 = vector.shape_cast %12 : vector<128xf32> to vector<128x1xf32>
    %14 = vector.broadcast %13 : vector<128x1xf32> to vector<128x128xf32>
    %15 = arith.subf %11, %14 : vector<128x128xf32>
    %16 = math.exp %15 : vector<128x128xf32>
    %cst_9 = arith.constant dense<0.000000e+00> : vector<128xf32>
    %17 = vector.multi_reduction <add>, %16, %cst_9 [1] : vector<128x128xf32> to vector<128xf32>
    %18 = vector.shape_cast %17 : vector<128xf32> to vector<128x1xf32>
    %19 = vector.broadcast %18 : vector<128x1xf32> to vector<128x128xf32>
    %20 = arith.divf %16, %19 : vector<128x128xf32>
    %cst_10 = arith.constant dense<0.000000e+00> : vector<128x128xf32>
    %21 = tpu.matmul %20, %8, %cst_10 {dimension_numbers = #tpu.dot_dimension_numbers<[1], [0], [0], [1], [0, 0, 1, 1], [], []>} : vector<128x128xf32>, vector<128x128xf32>, vector<128x128xf32> -> vector<128x128xf32>
    %c0_11 = arith.constant 0 : index
    %c0_12 = arith.constant 0 : index
    %22 = vector.load %arg5[%c0_11, %c0_12] : memref<128x128xf32, #tpu.memory_space<vmem>>, vector<128x128xf32>
    %cst_13 = arith.constant dense<0.000000e+00> : vector<128x128xf32>
    %23 = tpu.matmul %21, %22, %cst_13 {dimension_numbers = #tpu.dot_dimension_numbers<[1], [0], [0], [1], [0, 0, 1, 1], [], []>} : vector<128x128xf32>, vector<128x128xf32>, vector<128x128xf32> -> vector<128x128xf32>
    %c0_14 = arith.constant 0 : index
    %c0_15 = arith.constant 0 : index
    %24 = vector.load %arg6[%c0_14, %c0_15] : memref<1x128xf32, #tpu.memory_space<vmem>>, vector<1x128xf32>
    %25 = vector.broadcast %24 : vector<1x128xf32> to vector<128x128xf32>
    %26 = arith.addf %23, %25 : vector<128x128xf32>
    %c0_16 = arith.constant 0 : index
    %c0_17 = arith.constant 0 : index
    %27 = vector.load %arg7[%c0_16, %c0_17] : memref<128x256xf32, #tpu.memory_space<vmem>>, vector<128x256xf32>
    %cst_18 = arith.constant dense<0.000000e+00> : vector<128x256xf32>
    %28 = tpu.matmul %0, %27, %cst_18 {dimension_numbers = #tpu.dot_dimension_numbers<[1], [0], [0], [1], [0, 0, 1, 1], [], []>} : vector<128x128xf32>, vector<128x256xf32>, vector<128x256xf32> -> vector<128x256xf32>
    %c0_19 = arith.constant 0 : index
    %c0_20 = arith.constant 0 : index
    %29 = vector.load %arg8[%c0_19, %c0_20] : memref<128x256xf32, #tpu.memory_space<vmem>>, vector<128x256xf32>
    %cst_21 = arith.constant dense<0.000000e+00> : vector<128x256xf32>
    %30 = tpu.matmul %26, %29, %cst_21 {dimension_numbers = #tpu.dot_dimension_numbers<[1], [0], [0], [1], [0, 0, 1, 1], [], []>} : vector<128x128xf32>, vector<128x256xf32>, vector<128x256xf32> -> vector<128x256xf32>
    %31 = arith.addf %28, %30 : vector<128x256xf32>
    %c0_22 = arith.constant 0 : index
    %c0_23 = arith.constant 0 : index
    %32 = vector.load %arg9[%c0_22, %c0_23] : memref<1x256xf32, #tpu.memory_space<vmem>>, vector<1x256xf32>
    %33 = vector.broadcast %32 : vector<1x256xf32> to vector<128x256xf32>
    %34 = arith.addf %31, %33 : vector<128x256xf32>
    %cst_24 = arith.constant 0.000000e+00 : f32
    %35 = vector.broadcast %cst_24 : f32 to vector<128x256xf32>
    %36 = arith.maximumf %34, %35 : vector<128x256xf32>
    %c0_25 = arith.constant 0 : index
    %c0_26 = arith.constant 0 : index
    %37 = vector.load %arg10[%c0_25, %c0_26] : memref<256x128xf32, #tpu.memory_space<vmem>>, vector<256x128xf32>
    %cst_27 = arith.constant dense<0.000000e+00> : vector<128x128xf32>
    %38 = tpu.matmul %36, %37, %cst_27 {dimension_numbers = #tpu.dot_dimension_numbers<[1], [0], [0], [1], [0, 0, 1, 1], [], []>} : vector<128x256xf32>, vector<256x128xf32>, vector<128x128xf32> -> vector<128x128xf32>
    %c0_28 = arith.constant 0 : index
    %c0_29 = arith.constant 0 : index
    %39 = vector.load %arg11[%c0_28, %c0_29] : memref<1x128xf32, #tpu.memory_space<vmem>>, vector<1x128xf32>
    %40 = vector.broadcast %39 : vector<1x128xf32> to vector<128x128xf32>
    %41 = arith.addf %38, %40 : vector<128x128xf32>
    %42 = arith.addf %0, %41 : vector<128x128xf32>
    %c0_30 = arith.constant 0 : index
    %c0_31 = arith.constant 0 : index
    %43 = vector.load %arg12[%c0_30, %c0_31] : memref<128x128xf32, #tpu.memory_space<vmem>>, vector<128x128xf32>
    tpu.vector_store %arg12[%c0_30, %c0_31], %42 {strides = array<i32>} : memref<128x128xf32, #tpu.memory_space<vmem>>, vector<128x128xf32>,
    return
  }
  func.func @transform_0(%arg0: i32) -> (i32, i32) {
    %c0_i32 = arith.constant 0 : i32
    %c0_i32_0 = arith.constant 0 : i32
    return %arg0, %c0_i32 : i32, i32
  }
  func.func @transform_1(%arg0: i32) -> (i32, i32) {
    %c0_i32 = arith.constant 0 : i32
    %c0_i32_0 = arith.constant 0 : i32
    %c0_i32_1 = arith.constant 0 : i32
    return %c0_i32, %c0_i32_0 : i32, i32
  }
  func.func @transform_2(%arg0: i32) -> (i32, i32) {
    %c0_i32 = arith.constant 0 : i32
    %c0_i32_0 = arith.constant 0 : i32
    %c0_i32_1 = arith.constant 0 : i32
    return %c0_i32, %c0_i32_0 : i32, i32
  }
  func.func @transform_3(%arg0: i32) -> (i32, i32) {
    %c0_i32 = arith.constant 0 : i32
    %c0_i32_0 = arith.constant 0 : i32
    %c0_i32_1 = arith.constant 0 : i32
    return %c0_i32, %c0_i32_0 : i32, i32
  }
  func.func @transform_4(%arg0: i32) -> (i32, i32) {
    %c0_i32 = arith.constant 0 : i32
    %c0_i32_0 = arith.constant 0 : i32
    %c0_i32_1 = arith.constant 0 : i32
    return %c0_i32, %c0_i32_0 : i32, i32
  }
  func.func @transform_5(%arg0: i32) -> (i32, i32) {
    %c0_i32 = arith.constant 0 : i32
    %c0_i32_0 = arith.constant 0 : i32
    %c0_i32_1 = arith.constant 0 : i32
    return %c0_i32, %c0_i32_0 : i32, i32
  }
  func.func @transform_6(%arg0: i32) -> (i32, i32) {
    %c0_i32 = arith.constant 0 : i32
    %c0_i32_0 = arith.constant 0 : i32
    %c0_i32_1 = arith.constant 0 : i32
    return %c0_i32, %c0_i32_0 : i32, i32
  }
  func.func @transform_7(%arg0: i32) -> (i32, i32) {
    %c0_i32 = arith.constant 0 : i32
    %c0_i32_0 = arith.constant 0 : i32
    %c0_i32_1 = arith.constant 0 : i32
    return %c0_i32, %c0_i32_0 : i32, i32
  }
  func.func @transform_8(%arg0: i32) -> (i32, i32) {
    %c0_i32 = arith.constant 0 : i32
    %c0_i32_0 = arith.constant 0 : i32
    %c0_i32_1 = arith.constant 0 : i32
    return %c0_i32, %c0_i32_0 : i32, i32
  }
  func.func @transform_9(%arg0: i32) -> (i32, i32) {
    %c0_i32 = arith.constant 0 : i32
    %c0_i32_0 = arith.constant 0 : i32
    %c0_i32_1 = arith.constant 0 : i32
    return %c0_i32, %c0_i32_0 : i32, i32
  }
  func.func @transform_10(%arg0: i32) -> (i32, i32) {
    %c0_i32 = arith.constant 0 : i32
    %c0_i32_0 = arith.constant 0 : i32
    %c0_i32_1 = arith.constant 0 : i32
    return %c0_i32, %c0_i32_0 : i32, i32
  }
  func.func @transform_11(%arg0: i32) -> (i32, i32) {
    %c0_i32 = arith.constant 0 : i32
    %c0_i32_0 = arith.constant 0 : i32
    return %arg0, %c0_i32 : i32, i32
  }
}

module attributes {stable_mosaic.version = 11 : i64} {
  func.func @_attn_prop_kernel(%arg0: i32, %arg1: memref<128x128xf32, #tpu.memory_space<vmem>>, %arg2: memref<128x128xf32, #tpu.memory_space<vmem>>, %arg3: memref<128x384xf32, #tpu.memory_space<vmem>>, %arg4: memref<1x384xf32, #tpu.memory_space<vmem>>, %arg5: memref<128x128xf32, #tpu.memory_space<vmem>>, %arg6: memref<1x128xf32, #tpu.memory_space<vmem>>, %arg7: memref<128x256xf32, #tpu.memory_space<vmem>>, %arg8: memref<128x256xf32, #tpu.memory_space<vmem>>, %arg9: memref<1x256xf32, #tpu.memory_space<vmem>>, %arg10: memref<256x128xf32, #tpu.memory_space<vmem>>, %arg11: memref<1x128xf32, #tpu.memory_space<vmem>>, %arg12: memref<128x128xf32, #tpu.memory_space<vmem>>) attributes {dimension_semantics = [#tpu.dimension_semantics<parallel>], iteration_bounds = array<i64: 2>, scalar_prefetch = 0 : i64, scratch_operands = 0 : i64, tpu.core_type = #tpu.core_type<tc>, window_params = [{transform_indices = @transform_0, window_bounds = array<i64: 128, 128>}, {pipeline_mode = #tpu.pipeline_mode<synchronous>, transform_indices = @transform_1, window_bounds = array<i64: 128, 128>}, {pipeline_mode = #tpu.pipeline_mode<synchronous>, transform_indices = @transform_2, window_bounds = array<i64: 128, 384>}, {pipeline_mode = #tpu.pipeline_mode<synchronous>, transform_indices = @transform_3, window_bounds = array<i64: 1, 384>}, {pipeline_mode = #tpu.pipeline_mode<synchronous>, transform_indices = @transform_4, window_bounds = array<i64: 128, 128>}, {pipeline_mode = #tpu.pipeline_mode<synchronous>, transform_indices = @transform_5, window_bounds = array<i64: 1, 128>}, {pipeline_mode = #tpu.pipeline_mode<synchronous>, transform_indices = @transform_6, window_bounds = array<i64: 128, 256>}, {pipeline_mode = #tpu.pipeline_mode<synchronous>, transform_indices = @transform_7, window_bounds = array<i64: 128, 256>}, {pipeline_mode = #tpu.pipeline_mode<synchronous>, transform_indices = @transform_8, window_bounds = array<i64: 1, 256>}, {pipeline_mode = #tpu.pipeline_mode<synchronous>, transform_indices = @transform_9, window_bounds = array<i64: 256, 128>}, {pipeline_mode = #tpu.pipeline_mode<synchronous>, transform_indices = @transform_10, window_bounds = array<i64: 1, 128>}, {transform_indices = @transform_11, window_bounds = array<i64: 128, 128>}]} {
    %c0 = arith.constant 0 : index
    %c0_0 = arith.constant 0 : index
    %0 = vector.load %arg1[%c0, %c0_0] : memref<128x128xf32, #tpu.memory_space<vmem>>, vector<128x128xf32>
    %c0_1 = arith.constant 0 : index
    %c0_2 = arith.constant 0 : index
    %1 = vector.load %arg3[%c0_1, %c0_2] : memref<128x384xf32, #tpu.memory_space<vmem>>, vector<128x384xf32>
    %cst = arith.constant dense<0.000000e+00> : vector<128x384xf32>
    %2 = tpu.matmul %0, %1, %cst {dimension_numbers = #tpu.dot_dimension_numbers<[1], [0], [0], [1], [0, 0, 1, 1], [], []>} : vector<128x128xf32>, vector<128x384xf32>, vector<128x384xf32> -> vector<128x384xf32>
    %c0_3 = arith.constant 0 : index
    %c0_4 = arith.constant 0 : index
    %3 = vector.load %arg4[%c0_3, %c0_4] : memref<1x384xf32, #tpu.memory_space<vmem>>, vector<1x384xf32>
    %4 = vector.broadcast %3 : vector<1x384xf32> to vector<128x384xf32>
    %5 = arith.addf %2, %4 : vector<128x384xf32>
    %6 = vector.extract_strided_slice %5 {offsets = [0, 0], sizes = [128, 128], strides = [1, 1]} : vector<128x384xf32> to vector<128x128xf32>
    %7 = vector.extract_strided_slice %5 {offsets = [0, 128], sizes = [128, 128], strides = [1, 1]} : vector<128x384xf32> to vector<128x128xf32>
    %8 = vector.extract_strided_slice %5 {offsets = [0, 256], sizes = [128, 128], strides = [1, 1]} : vector<128x384xf32> to vector<128x128xf32>
    "tpu.trace_start"() <{level = 10 : i32, message = "qc,kc->qk"}> : () -> ()
    %cst_5 = arith.constant dense<0.000000e+00> : vector<128x128xf32>
    %9 = tpu.matmul %6, %7, %cst_5 {dimension_numbers = #tpu.dot_dimension_numbers<[1], [1], [0], [0], [0, 0, 1, 0], [], []>} : vector<128x128xf32>, vector<128x128xf32>, vector<128x128xf32> -> vector<128x128xf32>
    "tpu.trace_stop"() : () -> ()
    %c0_6 = arith.constant 0 : index
    %c0_7 = arith.constant 0 : index
    %10 = vector.load %arg2[%c0_6, %c0_7] : memref<128x128xf32, #tpu.memory_space<vmem>>, vector<128x128xf32>
    %11 = arith.addf %9, %10 : vector<128x128xf32>
    %cst_8 = arith.constant dense<0xFF800000> : vector<128xf32>
    %12 = vector.multi_reduction <maximumf>, %11, %cst_8 [1] : vector<128x128xf32> to vector<128xf32>
    %13 = vector.shape_cast %12 : vector<128xf32> to vector<128x1xf32>
    %14 = vector.broadcast %13 : vector<128x1xf32> to vector<128x128xf32>
    %15 = arith.subf %11, %14 : vector<128x128xf32>
    %16 = math.exp %15 : vector<128x128xf32>
    %cst_9 = arith.constant dense<0.000000e+00> : vector<128xf32>
    %17 = vector.multi_reduction <add>, %16, %cst_9 [1] : vector<128x128xf32> to vector<128xf32>
    %18 = vector.shape_cast %17 : vector<128xf32> to vector<128x1xf32>
    %19 = vector.broadcast %18 : vector<128x1xf32> to vector<128x128xf32>
    %20 = arith.divf %16, %19 : vector<128x128xf32>
    %cst_10 = arith.constant dense<0.000000e+00> : vector<128x128xf32>
    %21 = tpu.matmul %20, %8, %cst_10 {dimension_numbers = #tpu.dot_dimension_numbers<[1], [0], [0], [1], [0, 0, 1, 1], [], []>} : vector<128x128xf32>, vector<128x128xf32>, vector<128x128xf32> -> vector<128x128xf32>
    %c0_11 = arith.constant 0 : index
    %c0_12 = arith.constant 0 : index
    %22 = vector.load %arg5[%c0_11, %c0_12] : memref<128x128xf32, #tpu.memory_space<vmem>>, vector<128x128xf32>
    %cst_13 = arith.constant dense<0.000000e+00> : vector<128x128xf32>
    %23 = tpu.matmul %21, %22, %cst_13 {dimension_numbers = #tpu.dot_dimension_numbers<[1], [0], [0], [1], [0, 0, 1, 1], [], []>} : vector<128x128xf32>, vector<128x128xf32>, vector<128x128xf32> -> vector<128x128xf32>
    %c0_14 = arith.constant 0 : index
    %c0_15 = arith.constant 0 : index
    %24 = vector.load %arg6[%c0_14, %c0_15] : memref<1x128xf32, #tpu.memory_space<vmem>>, vector<1x128xf32>
    %25 = vector.broadcast %24 : vector<1x128xf32> to vector<128x128xf32>
    %26 = arith.addf %23, %25 : vector<128x128xf32>
    %c0_16 = arith.constant 0 : index
    %c0_17 = arith.constant 0 : index
    %27 = vector.load %arg7[%c0_16, %c0_17] : memref<128x256xf32, #tpu.memory_space<vmem>>, vector<128x256xf32>
    %cst_18 = arith.constant dense<0.000000e+00> : vector<128x256xf32>
    %28 = tpu.matmul %0, %27, %cst_18 {dimension_numbers = #tpu.dot_dimension_numbers<[1], [0], [0], [1], [0, 0, 1, 1], [], []>} : vector<128x128xf32>, vector<128x256xf32>, vector<128x256xf32> -> vector<128x256xf32>
    %c0_19 = arith.constant 0 : index
    %c0_20 = arith.constant 0 : index
    %29 = vector.load %arg8[%c0_19, %c0_20] : memref<128x256xf32, #tpu.memory_space<vmem>>, vector<128x256xf32>
    %cst_21 = arith.constant dense<0.000000e+00> : vector<128x256xf32>
    %30 = tpu.matmul %26, %29, %cst_21 {dimension_numbers = #tpu.dot_dimension_numbers<[1], [0], [0], [1], [0, 0, 1, 1], [], []>} : vector<128x128xf32>, vector<128x256xf32>, vector<128x256xf32> -> vector<128x256xf32>
    %31 = arith.addf %28, %30 : vector<128x256xf32>
    %c0_22 = arith.constant 0 : index
    %c0_23 = arith.constant 0 : index
    %32 = vector.load %arg9[%c0_22, %c0_23] : memref<1x256xf32, #tpu.memory_space<vmem>>, vector<1x256xf32>
    %33 = vector.broadcast %32 : vector<1x256xf32> to vector<128x256xf32>
    %34 = arith.addf %31, %33 : vector<128x256xf32>
    %cst_24 = arith.constant 0.000000e+00 : f32
    %35 = vector.broadcast %cst_24 : f32 to vector<128x256xf32>
    %36 = arith.maximumf %34, %35 : vector<128x256xf32>
    %c0_25 = arith.constant 0 : index
    %c0_26 = arith.constant 0 : index
    %37 = vector.load %arg10[%c0_25, %c0_26] : memref<256x128xf32, #tpu.memory_space<vmem>>, vector<256x128xf32>
    %cst_27 = arith.constant dense<0.000000e+00> : vector<128x128xf32>
    %38 = tpu.matmul %36, %37, %cst_27 {dimension_numbers = #tpu.dot_dimension_numbers<[1], [0], [0], [1], [0, 0, 1, 1], [], []>} : vector<128x256xf32>, vector<256x128xf32>, vector<128x128xf32> -> vector<128x128xf32>
    %c0_28 = arith.constant 0 : index
    %c0_29 = arith.constant 0 : index
    %39 = vector.load %arg11[%c0_28, %c0_29] : memref<1x128xf32, #tpu.memory_space<vmem>>, vector<1x128xf32>
    %40 = vector.broadcast %39 : vector<1x128xf32> to vector<128x128xf32>
    %41 = arith.addf %38, %40 : vector<128x128xf32>
    %42 = arith.addf %0, %41 : vector<128x128xf32>
    %c0_30 = arith.constant 0 : index
    %c0_31 = arith.constant 0 : index
    %43 = vector.load %arg12[%c0_30, %c0_31] : memref<128x128xf32, #tpu.memory_space<vmem>>, vector<128x128xf32>
    tpu.vector_store %arg12[%c0_30, %c0_31], %42 {strides = array<i32>} : memref<128x128xf32, #tpu.memory_space<vmem>>, vector<128x128xf32>,
    return
  }
  func.func @transform_0(%arg0: i32) -> (i32, i32) {
    %c0_i32 = arith.constant 0 : i32
    %c0_i32_0 = arith.constant 0 : i32
    return %arg0, %c0_i32 : i32, i32
  }
  func.func @transform_1(%arg0: i32) -> (i32, i32) {
    %c0_i32 = arith.constant 0 : i32
    %c0_i32_0 = arith.constant 0 : i32
    %c0_i32_1 = arith.constant 0 : i32
    return %c0_i32, %c0_i32_0 : i32, i32
  }
  func.func @transform_2(%arg0: i32) -> (i32, i32) {
    %c0_i32 = arith.constant 0 : i32
    %c0_i32_0 = arith.constant 0 : i32
    %c0_i32_1 = arith.constant 0 : i32
    return %c0_i32, %c0_i32_0 : i32, i32
  }
  func.func @transform_3(%arg0: i32) -> (i32, i32) {
    %c0_i32 = arith.constant 0 : i32
    %c0_i32_0 = arith.constant 0 : i32
    %c0_i32_1 = arith.constant 0 : i32
    return %c0_i32, %c0_i32_0 : i32, i32
  }
  func.func @transform_4(%arg0: i32) -> (i32, i32) {
    %c0_i32 = arith.constant 0 : i32
    %c0_i32_0 = arith.constant 0 : i32
    %c0_i32_1 = arith.constant 0 : i32
    return %c0_i32, %c0_i32_0 : i32, i32
  }
  func.func @transform_5(%arg0: i32) -> (i32, i32) {
    %c0_i32 = arith.constant 0 : i32
    %c0_i32_0 = arith.constant 0 : i32
    %c0_i32_1 = arith.constant 0 : i32
    return %c0_i32, %c0_i32_0 : i32, i32
  }
  func.func @transform_6(%arg0: i32) -> (i32, i32) {
    %c0_i32 = arith.constant 0 : i32
    %c0_i32_0 = arith.constant 0 : i32
    %c0_i32_1 = arith.constant 0 : i32
    return %c0_i32, %c0_i32_0 : i32, i32
  }
  func.func @transform_7(%arg0: i32) -> (i32, i32) {
    %c0_i32 = arith.constant 0 : i32
    %c0_i32_0 = arith.constant 0 : i32
    %c0_i32_1 = arith.constant 0 : i32
    return %c0_i32, %c0_i32_0 : i32, i32
  }
  func.func @transform_8(%arg0: i32) -> (i32, i32) {
    %c0_i32 = arith.constant 0 : i32
    %c0_i32_0 = arith.constant 0 : i32
    %c0_i32_1 = arith.constant 0 : i32
    return %c0_i32, %c0_i32_0 : i32, i32
  }
  func.func @transform_9(%arg0: i32) -> (i32, i32) {
    %c0_i32 = arith.constant 0 : i32
    %c0_i32_0 = arith.constant 0 : i32
    %c0_i32_1 = arith.constant 0 : i32
    return %c0_i32, %c0_i32_0 : i32, i32
  }
  func.func @transform_10(%arg0: i32) -> (i32, i32) {
    %c0_i32 = arith.constant 0 : i32
    %c0_i32_0 = arith.constant 0 : i32
    %c0_i32_1 = arith.constant 0 : i32
    return %c0_i32, %c0_i32_0 : i32, i32
  }
  func.func @transform_11(%arg0: i32) -> (i32, i32) {
    %c0_i32 = arith.constant 0 : i32
    %c0_i32_0 = arith.constant 0 : i32
    return %arg0, %c0_i32 : i32, i32
  }
}

</mosaic_0001>

<bundles_post_ra>
// kernel: tpu_custom_call.1
= control target key start
LH: loop header
LB: loop body
LE: loop exit
PB: predicated region body
PF: predicated region fallthrough
CT: control target
= control target key end

     0   :  { %s4563_s0 = inlined_call_operand.hbm [shape: f32[256,128], index: 0, kind: input, shape index: {}]   ;;  %s4564_s1 = inlined_call_operand.hbm [shape: f32[128,128], index: 1, kind: input, shape index: {}]   ;;  %s4565_s2 = inlined_call_operand.hbm [shape: f32[128,384], index: 2, kind: input, shape index: {}]   ;;  %s4566_s3 = inlined_call_operand.vmem [shape: f32[1,384], index: 3, kind: input, shape index: {}]   ;;  %s4567_s4 = inlined_call_operand.hbm [shape: f32[128,128], index: 4, kind: input, shape index: {}]   ;;  %s4568_s5 = inlined_call_operand.vmem [shape: f32[1,128], index: 5, kind: input, shape index: {}]   ;;  %s4569_s6 = inlined_call_operand.hbm [shape: f32[128,256], index: 6, kind: input, shape index: {}]   ;;  %s4570_s7 = inlined_call_operand.hbm [shape: f32[128,256], index: 7, kind: input, shape index: {}]   ;;  %s4571_s8 = inlined_call_operand.vmem [shape: f32[1,256], index: 8, kind: input, shape index: {}]   ;;  %s4572_s9 = inlined_call_operand.hbm [shape: f32[256,128], index: 9, kind: input, shape index: {}]   ;;  %s4573_s10 = inlined_call_operand.vmem [shape: f32[1,128], index: 10, kind: input, shape index: {}]   ;;  %s4574_s11 = inlined_call_operand.hbm [shape: f32[256,128], index: 11, kind: output, shape index: {}]  }
   0x1   :  { %4585 = sst [smem:[#allocation20_spill]] %s4564_s1 }
   0x2   :  { %4586 = sst [smem:[#allocation21_spill]] %s4565_s2 }
   0x3   :  { %4587 = sst [smem:[#allocation22_spill]] %s4571_s8 }
   0x4   :  { %4588 = sst [smem:[#allocation23_spill]] %s4573_s10 }
   0x5   :  { %4589 = sst [smem:[#allocation24_spill]] %s4574_s11 }
   0x6   :  { %16 = vsyncpa [#allocation3], 0 }
   0x7   :  { %18 = vsyncpa [#allocation3 + $0x1], 0 }
   0x8   :  { %19 = vsyncpa [#allocation6], 0 }
   0x9   :  { %20 = vsyncpa [#allocation9], 0 }
   0xa   :  { %21 = vsyncpa [#allocation12], 0 }
   0xb   :  { %22 = vsyncpa [#allocation4], 0 }
   0xc   :  { %24 = vsyncpa [#allocation4 + $0x1], 0  ;;  %s3638_s17 = smov 0   ;;  %s3640_s18 = smov 0  }
   0xd   :  { %s3642_s19 = smov 0   ;;  %s3644_s20 = smov 0  }
   0xe LB: > { %s3561_s21 = smov [#allocation5]   ;;  %s3659_s23 = sadd.s32 4294967295, %s3559_s20   ;;  %s3559_s20 = sphi %s3644_s20, %s4621_s20   ;;  %s3555_s19 = sphi %s3642_s19, %s4620_s19   ;;  %s3551_s18 = sphi %s3640_s18, %s4619_s18   ;;  %s3547_s17 = sphi %s3638_s17, %s4618_s17  }
   0xf   : > { %s309_s22 = sshll.u32 %s3561_s21, 4  ;;  %p2322_p0 = scmp.ge.s32.totalorder %s3559_s20, 1  ;;  %s3664_s22 = int_to_ptr.vmem [resolvable:$true] %s309_s22 }
  0x10   : > { %p4576_p1 = scmp.eq.s32.totalorder %s3659_s23, 0  ;;  %p297_p2 = scmp.lt.s32.totalorder %s3559_s20, 3 }
  0x11   : > { %s3562_s25 = smov [#allocation8]   ;;  %s3563_s28 = smov [#allocation11]  }
  0x12   : > { %p3666_p3 = pnand %p2322_p0, %p297_p2  ;;  %s338_s26 = sshll.u32 %s3562_s25, 4  ;;  %s3679_s26 = int_to_ptr.vmem [resolvable:$true] %s338_s26 }
  0x13   : > { %s3681_s29 = sshll.u32 %s3563_s28, 4  ;;  %s4592_s1 = sld [smem:[#allocation20_spill]]  ;;  %s368_s29 = int_to_ptr.vmem [resolvable:$true] %s3681_s29 }
  0x14   : > { %s4590_s24 = scalar_select %p3666_p3, 1, 0 }
  0x15   : > { %p3115_p5 = pneg %p3666_p3 }
  0x17   : > { %p3675_p6 = pnand %p3115_p5, %p4576_p1 }
  0x19   : > { %s3283_s13 = scalar_lea.hbm %s4592_s1, 2048  ;;  %p3691_p8 = pneg %p3675_p6 }
  0x1a   : > { %p3284_p7 = scmp.ne.s32.totalorder %s4592_s1, %s3283_s13  ;;  %p3290_p11 = scmp.lt.u32.totalorder %s3283_s13, %s4592_s1 }
  0x1c   : > { %p3286_p9 = pnand %p3691_p8, %p3284_p7 }
  0x1e   : > { %p3287_p10 = pneg %p3286_p9 }
  0x20   : > { %p3292_p12 = pnand %p3290_p11, %p3287_p10 }
  0x22   : > { %3295 = shalt.err (!%p3292_p12)
}
  0x23   : > { %s3296_s28 = scalar_lea.vmem %s3664_s22, 2048  ;;  %p3304_p5 = scmp.lt.s32.totalorder %s3664_s22, %s3664_s22 }
  0x24   : > { %p3297_p13 = scmp.ne.s32.totalorder %s3664_s22, %s3296_s28  ;;  %p3305_p4 = scmp.lt.s32.totalorder %s3296_s28, %s3296_s28 }
  0x26   : > { %p3299_p0 = pnand %p3297_p13, %p3691_p8  ;;  %p3306_p7 = por %p3305_p4, %p3304_p5 }
  0x28   : > { %p3300_p2 = pneg %p3299_p0 }
  0x2a   : > { %p3307_p9 = pnand %p3306_p7, %p3300_p2 }
  0x2c   : > { %3310 = shalt.err (!%p3307_p9)
}
  0x2d   : > { %s4578_s30 = smov 128   ;;  %s4580_s12 = smov 8  }
  0x2e   : > { %3118 = dma.hbm_to_vmem [thread:$0]  (!%p3675_p6), %s4592_s1, 2048, %s3664_s22, [#allocation6], %s4578_s30, %s4578_s30, %s4580_s12  }
  0x2f   : > { %s3311_s25 = scalar_lea.hbm %s4567_s4, 2048 }
  0x30   : > { %p3312_p4 = scmp.ne.s32.totalorder %s4567_s4, %s3311_s25  ;;  %p3318_p12 = scmp.lt.u32.totalorder %s3311_s25, %s4567_s4 }
  0x32   : > { %p3314_p10 = pnand %p3312_p4, %p3691_p8 }
  0x34   : > { %p3315_p11 = pneg %p3314_p10 }
  0x36   : > { %p3320_p13 = pnand %p3318_p12, %p3315_p11 }
  0x38   : > { %3323 = shalt.err (!%p3320_p13)
}
  0x39   : > { %s3324_s22 = scalar_lea.vmem %s3679_s26, 2048  ;;  %p3332_p7 = scmp.lt.s32.totalorder %s3679_s26, %s3679_s26 }
  0x3a   : > { %p3325_p0 = scmp.ne.s32.totalorder %s3679_s26, %s3324_s22  ;;  %p3333_p9 = scmp.lt.s32.totalorder %s3324_s22, %s3324_s22 }
  0x3c   : > { %p3327_p2 = pnand %p3325_p0, %p3691_p8  ;;  %p3334_p4 = por %p3333_p9, %p3332_p7 }
  0x3e   : > { %p3328_p5 = pneg %p3327_p2 }
  0x40   : > { %p3335_p10 = pnand %p3334_p4, %p3328_p5 }
  0x42   : > { %3338 = shalt.err (!%p3335_p10)
}
  0x43   : > { %3124 = dma.hbm_to_vmem [thread:$0]  (!%p3675_p6), %s4567_s4, 2048, %s3679_s26, [#allocation9], %s4578_s30, %s4578_s30, %s4580_s12  }
  0x44   : > { %s3339_s14 = scalar_lea.hbm %s4570_s7, 4096 }
  0x45   : > { %p3340_p11 = scmp.ne.s32.totalorder %s4570_s7, %s3339_s14  ;;  %p3346_p0 = scmp.lt.u32.totalorder %s3339_s14, %s4570_s7 }
  0x47   : > { %p3342_p12 = pnand %p3340_p11, %p3691_p8 }
  0x49   : > { %p3343_p13 = pneg %p3342_p12 }
  0x4b   : > { %p3348_p2 = pnand %p3346_p0, %p3343_p13 }
  0x4d   : > { %3351 = shalt.err (!%p3348_p2)
}
  0x4e   : > { %s3352_s22 = scalar_lea.vmem %s368_s29, 4096  ;;  %p3360_p4 = scmp.lt.s32.totalorder %s368_s29, %s368_s29 }
  0x4f   : > { %p3353_p5 = scmp.ne.s32.totalorder %s368_s29, %s3352_s22  ;;  %p3361_p10 = scmp.lt.s32.totalorder %s3352_s22, %s3352_s22 }
  0x51   : > { %p3355_p7 = pnand %p3353_p5, %p3691_p8  ;;  %p3362_p1 = por %p3361_p10, %p3360_p4 }
  0x53   : > { %p3356_p9 = pneg %p3355_p7 }
  0x55   : > { %p3363_p3 = pnand %p3362_p1, %p3356_p9 }
  0x57   : > { %3366 = shalt.err (!%p3363_p3)
}
  0x58   : > { %s4582_s26 = smov 256   ;;  %s4583_s8 = smov 16  }
  0x59   : > { %3130 = dma.hbm_to_vmem [thread:$0]  (!%p3675_p6), %s4570_s7, 4096, %s368_s29, [#allocation12], %s4582_s26, %s4582_s26, %s4583_s8  }
  0x5a   : > { %s3568_s13 = smov [#allocation7]   ;;  %s4594_s2 = sld [smem:[#allocation21_spill]] }
  0x5b   : > { %s322_s14 = sshll.u32 %s3568_s13, 4  ;;  %s323_s14 = int_to_ptr.vmem [resolvable:$true] %s322_s14 }
  0x60   : > { %s3367_s25 = scalar_lea.hbm %s4594_s2, 6144 }
  0x61   : > { %p3368_p1 = scmp.ne.s32.totalorder %s4594_s2, %s3367_s25  ;;  %p3374_p12 = scmp.lt.u32.totalorder %s3367_s25, %s4594_s2 }
  0x63   : > { %p3370_p3 = pnand %p3368_p1, %p3691_p8 }
  0x65   : > { %p3371_p11 = pneg %p3370_p3 }
  0x67   : > { %p3376_p13 = pnand %p3374_p12, %p3371_p11 }
  0x69   : > { %3379 = shalt.err (!%p3376_p13)
}
  0x6a   : > { %s3380_s29 = scalar_lea.vmem %s323_s14, 6144  ;;  %p3388_p7 = scmp.lt.s32.totalorder %s323_s14, %s323_s14 }
  0x6b   : > { %p3381_p0 = scmp.ne.s32.totalorder %s323_s14, %s3380_s29  ;;  %p3389_p9 = scmp.lt.s32.totalorder %s3380_s29, %s3380_s29 }
  0x6d   : > { %p3383_p2 = pnand %p3381_p0, %p3691_p8  ;;  %p3390_p4 = por %p3389_p9, %p3388_p7 }
  0x6f   : > { %p3384_p5 = pneg %p3383_p2 }
  0x71   : > { %p3391_p10 = pnand %p3390_p4, %p3384_p5 }
  0x73   : > { %3394 = shalt.err (!%p3391_p10)
}
  0x74   : > { %s3569_s10 = smov 384   ;;  %s3570_s11 = smov 24  }
  0x75   : > { %3121 = dma.hbm_to_vmem [thread:$0]  (!%p3675_p6), %s4594_s2, 6144, %s323_s14, [#allocation6], %s3569_s10, %s3569_s10, %s3570_s11  }
  0x76   : > { %s3571_s13 = smov [#allocation10]   ;;  %s3572_s21 = smov [#allocation13]  }
  0x77   : > { %s354_s15 = sshll.u32 %s3571_s13, 4  ;;  %s383_s25 = sshll.u32 %s3572_s21, 4  ;;  %s355_s15 = int_to_ptr.vmem [resolvable:$true] %s354_s15  ;;  %s3781_s25 = int_to_ptr.vmem [resolvable:$true] %s383_s25 }
  0x78   : > { %s3395_s29 = scalar_lea.hbm %s4569_s6, 4096 }
  0x79   : > { %p3396_p1 = scmp.ne.s32.totalorder %s4569_s6, %s3395_s29  ;;  %p3402_p12 = scmp.lt.u32.totalorder %s3395_s29, %s4569_s6 }
  0x7b   : > { %p3398_p3 = pnand %p3396_p1, %p3691_p8 }
  0x7d   : > { %p3399_p11 = pneg %p3398_p3 }
  0x7f   : > { %p3404_p13 = pnand %p3402_p12, %p3399_p11 }
  0x81   : > { %3407 = shalt.err (!%p3404_p13)
}
  0x82   : > { %s3408_s10 = scalar_lea.vmem %s355_s15, 4096  ;;  %p3416_p7 = scmp.lt.s32.totalorder %s355_s15, %s355_s15 }
  0x83   : > { %p3409_p0 = scmp.ne.s32.totalorder %s355_s15, %s3408_s10  ;;  %p3417_p9 = scmp.lt.s32.totalorder %s3408_s10, %s3408_s10 }
  0x85   : > { %p3411_p2 = pnand %p3409_p0, %p3691_p8  ;;  %p3418_p4 = por %p3417_p9, %p3416_p7 }
  0x87   : > { %p3412_p5 = pneg %p3411_p2 }
  0x89   : > { %p3419_p10 = pnand %p3418_p4, %p3412_p5 }
  0x8b   : > { %3422 = shalt.err (!%p3419_p10)
}
  0x8c   : > { %s4595_s26 = smov 16   ;;  %s4596_s8 = smov 256  }
  0x8d   : > { %3127 = dma.hbm_to_vmem [thread:$0]  (!%p3675_p6), %s4569_s6, 4096, %s355_s15, [#allocation9], %s4596_s8, %s4596_s8, %s4595_s26  }
  0x8e   : > { %s3423_s28 = scalar_lea.hbm %s4572_s9, 4096 }
  0x8f   : > { %p3424_p1 = scmp.ne.s32.totalorder %s4572_s9, %s3423_s28  ;;  %p3430_p12 = scmp.lt.u32.totalorder %s3423_s28, %s4572_s9 }
  0x91   : > { %p3426_p3 = pnand %p3424_p1, %p3691_p8 }
  0x93   : > { %p3427_p11 = pneg %p3426_p3 }
  0x95   : > { %p3432_p13 = pnand %p3430_p12, %p3427_p11 }
  0x97   : > { %3435 = shalt.err (!%p3432_p13)
}
  0x98   : > { %s3436_s15 = scalar_lea.vmem %s3781_s25, 4096  ;;  %p3444_p7 = scmp.lt.s32.totalorder %s3781_s25, %s3781_s25 }
  0x99   : > { %p3437_p0 = scmp.ne.s32.totalorder %s3781_s25, %s3436_s15  ;;  %p3445_p9 = scmp.lt.s32.totalorder %s3436_s15, %s3436_s15 }
  0x9b   : > { %p3439_p2 = pnand %p3437_p0, %p3691_p8  ;;  %p3446_p4 = por %p3445_p9, %p3444_p7 }
  0x9d   : > { %p3440_p5 = pneg %p3439_p2 }
  0x9f   : > { %p3447_p10 = pnand %p3446_p4, %p3440_p5 }
  0xa1   : > { %3450 = shalt.err (!%p3447_p10)
}
  0xa2   : > { %s4597_s10 = smov 8   ;;  %s4598_s26 = smov 128  }
  0xa3   : > { %3133 = dma.hbm_to_vmem [thread:$0]  (!%p3675_p6), %s4572_s9, 4096, %s3781_s25, [#allocation12], %s4598_s26, %s4598_s26, %s4597_s10  }
  0xa4   : > { %s2321_s27 = sadd.s32 4294967294, %s3559_s20   ;;  %s3832_s16 = sadd.s32 1, %s3559_s20  }
  0xa5   : > { %s34_s12 = ssub.s32 %s3559_s20, %s3832_s16  ;;  %s37_s13 = sadd.s32 1, %s3555_s19 }
  0xa6   : > { %p35_p8 = scmp.eq.s32.totalorder %s34_s12, 0  ;;  %p44_p1 = scmp.ne.s32.totalorder %s3555_s19, %s3551_s18 }
  0xa7   : > { %p45_p3 = scmp.eq.s32.totalorder %s3559_s20, 0  ;;  %p50_p11 = scmp.ne.s32.totalorder %s3551_s18, %s3547_s17 }
  0xa8   : > { %s3843_s21 = scalar_select %p35_p8, %s3555_s19, %s37_s13  }
  0xa9   : > { %p3845_p12 = por %p45_p3, %p44_p1  ;;  %p4600_p13 = scmp.eq.s32.totalorder %s3659_s23, 0 }
  0xaa   : > { %p284_p0 = scmp.eq.s32.totalorder %s3659_s23, 1  ;;  %p290_p2 = scmp.eq.s32.totalorder %s2321_s27, 1 }
  0xab   : > { %p3851_p6 = por %p4600_p13, %p50_p11  ;;  %p3148_p5 = scmp.lt.s32.totalorder %s3559_s20, 2 }
  0xac   : > { %s400_s22 = sand.u32 1, %s3555_s19   ;;  %p3858_p7 = por %p284_p0, %p44_p1 }
  0xad   : > { %p3862_p9 = por %p290_p2, %p50_p11  ;;  %s2330_s14 = sshll.u32 %s400_s22, 7 }
  0xae   : > { %s4602_s29 = scalar_select %p3858_p7, 1, 0 }
  0xaf   : > { %s4603_s30 = scalar_select %p3862_p9, 1, 0 }
  0xb0   : > { %s2349_s15 = sshll.u32 %s3559_s20, 11  ;;  %s404_s27 = scalar_lea.vmem [#allocation2], %s2330_s14 }
  0xb1   : > { %s3870_s12 = scalar_lea.hbm %s4563_s0, %s2349_s15  ;;  %s411_s13 = sshll.u32 %s404_s27, 4  ;;  %s3872_s13 = int_to_ptr.vmem [resolvable:$true] %s411_s13 }
  0xb2   : > { %p3876_p4 = pnand %p3148_p5, %p3845_p12  ;;  %s3880_s2 = scalar_lea.sflag [#allocation3], %s400_s22 }
  0xb3   : > { %s3451_s8 = scalar_lea.hbm %s3870_s12, 2048  ;;  %s3456_s28 = scalar_lea.hbm %s4563_s0, 4096 }
  0xb4   : > { %p3452_p10 = scmp.ne.s32.totalorder %s3870_s12, %s3451_s8  ;;  %p3453_p8 = pneg %p3876_p4 }
  0xb5   : > { %p3457_p11 = scmp.lt.u32.totalorder %s3870_s12, %s4563_s0  ;;  %p3458_p12 = scmp.lt.u32.totalorder %s3456_s28, %s3451_s8 }
  0xb6   : > { %p3454_p1 = pnand %p3453_p8, %p3452_p10  ;;  %p3460_p0 = scmp.lt.u32.totalorder %s3451_s8, %s3870_s12 }
  0xb7   : > { %p3459_p13 = por %p3458_p12, %p3457_p11 }
  0xb8   : > { %p3455_p3 = pneg %p3454_p1 }
  0xb9   : > { %p3461_p2 = por %p3460_p0, %p3459_p13 }
  0xbb   : > { %p3462_p5 = pnand %p3461_p2, %p3455_p3 }
  0xbd   : > { %3465 = shalt.err (!%p3462_p5)
}
  0xbe   : > { %s3466_s22 = scalar_lea.vmem %s3872_s13, 2048  ;;  %s3573_s14 = smov [#allocation2]  }
  0xbf   : > { %p3467_p10 = scmp.ne.s32.totalorder %s3872_s13, %s3466_s22  ;;  %s3471_s15 = sshll.u32 %s3573_s14, 4  ;;  %s3472_s15 = int_to_ptr.vmem [resolvable:$false] %s3471_s15 }
  0xc0   : > { %s3473_s11 = scalar_lea.vmem %s3472_s15, 4096  ;;  %p3474_p7 = scmp.lt.s32.totalorder %s3872_s13, %s3472_s15 }
  0xc1   : > { %p3469_p1 = pnand %p3467_p10, %p3453_p8  ;;  %p3475_p11 = scmp.lt.s32.totalorder %s3473_s11, %s3466_s22 }
  0xc3   : > { %p3470_p9 = pneg %p3469_p1  ;;  %p3476_p12 = por %p3475_p11, %p3474_p7 }
  0xc5   : > { %p3477_p13 = pnand %p3476_p12, %p3470_p9 }
  0xc7   : > { %3480 = shalt.err (!%p3477_p13)
}
  0xc8   : > { %3137 = dma.hbm_to_vmem [thread:$0]  (!%p3876_p4), %s3870_s12, 2048, %s3872_s13, %s3880_s2, %s4598_s26, %s4598_s26, %s4597_s10  }
  0xc9   : > { %p4605_p8 = scmp.ne.s32.totalorder %s4590_s24, 0 }
  0xca   : > { %s3914_s8 = sand.u32 (!%p4605_p8), 1, %s3551_s18  }
  0xcb   : > { %423 = sbr.rel (%p4605_p8) target bundleno = 2047 (0x7ff), region = 64  ;;  %s2334_s28 = sshll.u32 (!%p4605_p8), %s3914_s8, 7 }
  0xcc   : > { %s426_s27 = scalar_lea.sflag (!%p4605_p8), [#allocation3], %s3914_s8  ;;  %s3920_s1 = scalar_lea.vmem (!%p4605_p8), [#allocation2], %s2334_s28 }
  0xd2   : > { %3526 = dma.done.wait (%p3851_p6), %s426_s27, 2048  }
  0xd3   : > { %3528 = vsyncadd (%p3851_p6), %s426_s27, 4294965248  ;;  %p4606_p7 = scmp.eq.s32.totalorder %s3659_s23, 0 }
  0xd5   : > { %3530 = dma.done.wait (%p4606_p7), [#allocation6], 8192   ;;  %p4607_p9 = pmov %p4606_p7 }
  0xd6   : > { %p4608_p4 = pmov %p4606_p7 }
  0xd7   : > { %3532 = vsyncadd (%p4607_p9), [#allocation6], 4294959104 }
  0xd8   : > { %3534 = dma.done.wait (%p4608_p4), [#allocation9], 6144   ;;  %p4609_p3 = pmov %p4608_p4 }
  0xda   : > { %3536 = vsyncadd (%p4609_p3), [#allocation9], 4294961152  ;;  %p4610_p0 = pmov %p4609_p3 }
  0xdc   : > { %3538 = dma.done.wait (%p4610_p0), [#allocation12], 8192   ;;  %p4611_p2 = pmov %p4610_p0 }
  0xdd   : > { %v3574_v0 = vmov 0.0   ;;  %v511_v1 = vld [vmem:[#allocation7 + $0x8] sm:$0xff]  ;;  %v514_v2 = vld [vmem:[#allocation7 + $0x20] sm:$0xff]  ;;  %v513_v5 = vld [vmem:[#allocation7 + $0x18] sm:$0xff]  ;;  %s4612_s13 = sld [smem:[#allocation22_spill]]  ;;  %s4613_s15 = sld [smem:[#allocation23_spill]] }
  0xde   : > { %3540 = vsyncadd (%p4611_p2), [#allocation12], 4294959104  ;;  %639 = vmatprep.mubr.f32.mxu0 %v3574_v0  ;;  %v510_v3 = vld [vmem:[#allocation7] sm:$0xff]  ;;  %v2783_v4 = vpack.c.bf16 %v514_v2, %v511_v1  ;;  %v517_v6 = vld [vmem:[#allocation7 + $0x38] sm:$0xff]  ;;  %v560_v2 = vlaneseq  ;;  %s4464_s11 = scalar_lea.vmem [#allocation14], %s2334_s28  ;;  %s2350_s28 = sshll.u32 %s3659_s23, 11 }
  0xdf   : > { %v520_v7 = vld [vmem:[#allocation7 + $0x50] sm:$0xff]  ;;  %v2785_v8 = vpack.c.bf16 %v513_v5, %v510_v3  ;;  %v519_v11 = vld [vmem:[#allocation7 + $0x48] sm:$0xff]  ;;  %v526_v13 = vld [vmem:[#allocation7 + $0x80] sm:$0xff]  ;;  %s2191_s27 = sshll.u32 %s4464_s11, 4  ;;  %s4614_s24 = sld [smem:[#allocation24_spill]]  ;;  %s4517_s27 = int_to_ptr.vmem [resolvable:$true] %s2191_s27 }
  0xe0   : > { %v2787_v9 = vpack.c.bf16 %v520_v7, %v517_v6  ;;  %v516_v10 = vld [vmem:[#allocation7 + $0x30] sm:$0xff]  ;;  %v523_v12 = vld [vmem:[#allocation7 + $0x68] sm:$0xff]  ;;  %2784 = vmatprep.subr.bf16.mxu0 %v2783_v4  ;;  %v522_v16 = vld [vmem:[#allocation7 + $0x60] sm:$0xff]  ;;  %v4015_v3 = vshrl.u32 %v560_v2, 7  ;;  %s2178_s26 = scalar_lea.sflag [#allocation4], %s3914_s8  ;;  %s3481_s25 = scalar_lea.vmem %s4517_s27, 2048 }
  0xe1   : > { %2786 = vmatpush1.bf16.msra.mxu0 %v2785_v8  ;;  %v2789_v14 = vpack.c.bf16 %v519_v11, %v516_v10  ;;  %v2791_v15 = vpack.c.bf16 %v526_v13, %v523_v12  ;;  %v525_v17 = vld [vmem:[#allocation7 + $0x78] sm:$0xff]  ;;  %v532_v19 = vld [vmem:[#allocation7 + $0xb0] sm:$0xff]  ;;  %v531_v23 = vld [vmem:[#allocation7 + $0xa8] sm:$0xff]  ;;  %p3482_p6 = scmp.ne.s32.totalorder %s4517_s27, %s3481_s25  ;;  %p4615_p5 = scmp.ne.s32.totalorder %s4602_s29, 0 }
  0xe2   : > { %2788 = vmatprep.subr.bf16.mxu0 %v2787_v9  ;;  %v529_v18 = vld [vmem:[#allocation7 + $0x98] sm:$0xff]  ;;  %v2793_v20 = vpack.c.bf16 %v525_v17, %v522_v16  ;;  %v528_v22 = vld [vmem:[#allocation7 + $0x90] sm:$0xff]  ;;  %v535_v24 = vld [vmem:[#allocation7 + $0xc8] sm:$0xff]  ;;  %v562_v4 = vsub.s32 0, %v4015_v3  ;;  %v566_v7 = vsub.s32 1, %v4015_v3  ;;  %s3575_s23 = smov [#allocation14]  }
  0xe3   : > { %v2795_v21 = vpack.c.bf16 %v532_v19, %v529_v18  ;;  %v538_v25 = vld [vmem:[#allocation7 + $0xe0] sm:$0xff]  ;;  %v2797_v27 = vpack.c.bf16 %v531_v23, %v528_v22  ;;  %v537_v30 = vld [vmem:[#allocation7 + $0xd8] sm:$0xff]  ;;  %v544_v32 = vld [vmem:[#allocation7 + $0x110] sm:$0xff]  ;;  %p3483_p10 = pnand %p3482_p6, %p4615_p5  ;;  %s3485_s12 = sshll.u32 %s3575_s23, 4  ;;  %s3486_s12 = int_to_ptr.vmem [resolvable:$false] %s3485_s12 }
  0xe4   : > { %v494_v26 = vld [vmem:[%s3920_s1] sm:$0xff]  ;;  %v2799_v28 = vpack.c.bf16 %v538_v25, %v535_v24  ;;  %v541_v31 = vld [vmem:[#allocation7 + $0xf8] sm:$0xff]  ;;  %v540_v35 = vld [vmem:[#allocation7 + $0xf0] sm:$0xff]  ;;  %p3488_p11 = scmp.lt.s32.totalorder %s4517_s27, %s3486_s12 }
  0xe5   : > { %2790 = vmatpush1.bf16.msra.mxu0 %v2789_v14  ;;  %2591 = vmatprep.mubr.f32.mxu1 %v494_v26  ;;  %v534_v29 = vld [vmem:[#allocation7 + $0xc0] sm:$0xff]  ;;  %v2803_v34 = vpack.c.bf16 %v544_v32, %v541_v31  ;;  %v543_v36 = vld [vmem:[#allocation7 + $0x108] sm:$0xff]  ;;  %v549_v42 = vld [vmem:[#allocation7 + $0x138] sm:$0xff]  ;;  %s4515_s10 = scalar_lea.hbm %s4614_s24, %s2350_s28  ;;  %p3484_p1 = pneg %p3483_p10 }
  0xe6   : > { %2792 = vmatprep.subr.bf16.mxu0 %v2791_v15  ;;  %v2801_v33 = vpack.c.bf16 %v537_v30, %v534_v29  ;;  %v547_v37 = vld [vmem:[#allocation7 + $0x128] sm:$0xff]  ;;  %v550_v38 = vld [vmem:[#allocation7 + $0x140] sm:$0xff]  ;;  %v2805_v39 = vpack.c.bf16 %v543_v36, %v540_v35  ;;  %v553_v43 = vld [vmem:[#allocation7 + $0x158] sm:$0xff] }
  0xe7   : > { %v2807_v40 = vpack.c.bf16 %v550_v38, %v547_v37  ;;  %v546_v41 = vld [vmem:[#allocation7 + $0x120] sm:$0xff]  ;;  %v556_v44 = vld [vmem:[#allocation7 + $0x170] sm:$0xff]  ;;  %v555_v48 = vld [vmem:[#allocation7 + $0x168] sm:$0xff] }
  0xe8   : > { %v2809_v45 = vpack.c.bf16 %v549_v42, %v546_v41  ;;  %v2811_v46 = vpack.c.bf16 %v556_v44, %v553_v43  ;;  %v552_v47 = vld [vmem:[#allocation7 + $0x150] sm:$0xff]  ;;  %v3942_v50 = vld [vmem:[%s3920_s1 + $0x8] sm:$0xff]  ;;  %v3952_v52 = vld [vmem:[%s3920_s1 + $0x18] sm:$0xff] }
  0xe9   : > { %2794 = vmatpush1.bf16.msra.mxu0 %v2793_v20  ;;  %v2813_v49 = vpack.c.bf16 %v555_v48, %v552_v47  ;;  %v3947_v51 = vld [vmem:[%s3920_s1 + $0x10] sm:$0xff]  ;;  %v3957_v53 = vld [vmem:[%s3920_s1 + $0x20] sm:$0xff]  ;;  %v3962_v54 = vld [vmem:[%s3920_s1 + $0x28] sm:$0xff] }
  0xea   : > { %2796 = vmatprep.subr.bf16.mxu0 %v2795_v21  ;;  %v3967_v55 = vld [vmem:[%s3920_s1 + $0x30] sm:$0xff]  ;;  %v3972_v56 = vld [vmem:[%s3920_s1 + $0x38] sm:$0xff]  ;;  %v3977_v57 = vld [vmem:[%s3920_s1 + $0x40] sm:$0xff] }
  0xeb   : > { %v3982_v58 = vld [vmem:[%s3920_s1 + $0x48] sm:$0xff]  ;;  %v3987_v59 = vld [vmem:[%s3920_s1 + $0x50] sm:$0xff]  ;;  %v3992_v60 = vld [vmem:[%s3920_s1 + $0x58] sm:$0xff] }
  0xec   : > { %v3997_v61 = vld [vmem:[%s3920_s1 + $0x60] sm:$0xff]  ;;  %v4002_v62 = vld [vmem:[%s3920_s1 + $0x68] sm:$0xff]  ;;  %v4007_v63 = vld [vmem:[%s3920_s1 + $0x70] sm:$0xff] }
  0xed   : > { %2798 = vmatpush1.bf16.msra.mxu0 %v2797_v27  ;;  %v4012_v1 = vld [vmem:[%s3920_s1 + $0x78] sm:$0xff]  ;;  %v4021_v5 = vld [vmem:[%s4566_s3] sm:$0x7] }
  0xee   : > { %2800 = vmatprep.subr.bf16.mxu0 %v2799_v28  ;;  %v4026_v6 = vrot.slane %v4021_v5, %v562_v4  ;;  %v4033_v11 = vrot.slane %v4021_v5, %v566_v7 }
  0xf1   : > { %2802 = vmatpush1.bf16.msra.mxu0 %v2801_v33 }
  0xf2   : > { %2804 = vmatprep.subr.bf16.mxu0 %v2803_v34 }
  0xf5   : > { %2806 = vmatpush1.bf16.msra.mxu0 %v2805_v39 }
  0xf6   : > { %2808 = vmatprep.subr.bf16.mxu0 %v2807_v40 }
  0xf9   : > { %2810 = vmatpush1.bf16.msra.mxu0 %v2809_v45 }
  0xfa   : > { %2812 = vmatprep.subr.bf16.mxu0 %v2811_v46 }
  0xfd   : > { %2814 = vmatpush1.bf16.msra.mxu0 %v2813_v49 }
 0x100   : > { %640 = vmatmul.mubr.f32.vlgmr.msra.gmra.mrb[0].mxu0 %v494_v26 }
 0x101   : > { %645 = vmatprep.mubr.f32.mxu0 %v3574_v0 }
 0x104   : > { %646 = vmatmul.mubr.f32.gmra.mrb[2].mxu0 %v3942_v50 }
 0x105   : > { %651 = vmatprep.mubr.f32.mxu0 %v3574_v0 }
 0x108   : > { %652 = vmatmul.mubr.f32.gmra.mrb[4].mxu0 %v3947_v51 }
 0x109   : > { %657 = vmatprep.mubr.f32.mxu0 %v3574_v0 }
 0x10c   : > { %658 = vmatmul.mubr.f32.gmra.mrb[6].mxu0 %v3952_v52 }
 0x10d   : > { %663 = vmatprep.mubr.f32.mxu0 %v3574_v0 }
 0x110   : > { %664 = vmatmul.mubr.f32.gmra.mrb[8].mxu0 %v3957_v53 }
 0x111   : > { %669 = vmatprep.mubr.f32.mxu0 %v3574_v0 }
 0x114   : > { %670 = vmatmul.mubr.f32.gmra.mrb[10].mxu0 %v3962_v54 }
 0x115   : > { %675 = vmatprep.mubr.f32.mxu0 %v3574_v0 }
 0x118   : > { %676 = vmatmul.mubr.f32.gmra.mrb[12].mxu0 %v3967_v55 }
 0x119   : > { %681 = vmatprep.mubr.f32.mxu0 %v3574_v0 }
 0x11c   : > { %682 = vmatmul.mubr.f32.gmra.mrb[14].mxu0 %v3972_v56 }
 0x11d   : > { %687 = vmatprep.mubr.f32.mxu0 %v3574_v0 }
 0x120   : > { %688 = vmatmul.mubr.f32.gmra.mrb[16].mxu0 %v3977_v57 }
 0x121   : > { %693 = vmatprep.mubr.f32.mxu0 %v3574_v0 }
 0x124   : > { %694 = vmatmul.mubr.f32.gmra.mrb[18].mxu0 %v3982_v58 }
 0x125   : > { %699 = vmatprep.mubr.f32.mxu0 %v3574_v0 }
 0x128   : > { %700 = vmatmul.mubr.f32.gmra.mrb[20].mxu0 %v3987_v59 }
 0x129   : > { %705 = vmatprep.mubr.f32.mxu0 %v3574_v0 }
 0x12c   : > { %706 = vmatmul.mubr.f32.gmra.mrb[22].mxu0 %v3992_v60 }
 0x12d   : > { %711 = vmatprep.mubr.f32.mxu0 %v3574_v0 }
 0x130   : > { %712 = vmatmul.mubr.f32.gmra.mrb[24].mxu0 %v3997_v61 }
 0x131   : > { %717 = vmatprep.mubr.f32.mxu0 %v3574_v0 }
 0x134   : > { %718 = vmatmul.mubr.f32.gmra.mrb[26].mxu0 %v4002_v62 }
 0x135   : > { %723 = vmatprep.mubr.f32.mxu0 %v3574_v0 }
 0x138   : > { %724 = vmatmul.mubr.f32.gmra.mrb[28].mxu0 %v4007_v63 }
 0x139   : > { %729 = vmatprep.mubr.f32.mxu0 %v3574_v0 }
 0x13c   : > { %730 = vmatmul.mubr.f32.gmra.mrb[30].mxu0 %v4012_v1 }
 0x1d3   : > { %v641_v8 = vpop.f32.mrb[0].mxu0 }
 0x1d4   : > { %v642_v9 = vadd.f32 %v641_v8, %v4026_v6  ;;  %v643_v10 = vpop.f32.mrb[1].mxu0 }
 0x1d5   : > { %v644_v15 = vadd.f32 %v643_v10, %v4033_v11 }
 0x1d6   : > { %2647 = vmatprep.mubr.f32.mxu0 %v642_v9 }
 0x1d7   : > { %v647_v12 = vpop.f32.mrb[2].mxu0 }
 0x1d8   : > { %v4036_v13 = vadd.f32 %v647_v12, %v4026_v6  ;;  %v649_v14 = vpop.f32.mrb[3].mxu0 }
 0x1d9   : > { %v650_v16 = vadd.f32 %v649_v14, %v4033_v11 }
 0x1db   : > { %v2847_v17 = vpack.c.bf16 %v650_v16, %v644_v15  ;;  %v653_v18 = vpop.f32.mrb[4].mxu0 }
 0x1dc   : > { %v4041_v19 = vadd.f32 %v653_v18, %v4026_v6  ;;  %v655_v20 = vpop.f32.mrb[5].mxu0 }
 0x1dd   : > { %2848 = vmatprep.subr.bf16.mxu0 %v2847_v17  ;;  %v656_v24 = vadd.f32 %v655_v20, %v4033_v11 }
 0x1de   : > { %2850 = vmatpush3.bf16.xpose.msra.mxu0 %v2847_v17 }
 0x1df   : > { %v659_v21 = vpop.f32.mrb[6].mxu0 }
 0x1e0   : > { %v4044_v22 = vadd.f32 %v659_v21, %v4026_v6  ;;  %v661_v23 = vpop.f32.mrb[7].mxu0 }
 0x1e1   : > { %v662_v25 = vadd.f32 %v661_v23, %v4033_v11 }
 0x1e3   : > { %v2851_v26 = vpack.c.bf16 %v662_v25, %v656_v24  ;;  %v665_v27 = vpop.f32.mrb[8].mxu0 }
 0x1e4   : > { %v4049_v28 = vadd.f32 %v665_v27, %v4026_v6  ;;  %v667_v29 = vpop.f32.mrb[9].mxu0 }
 0x1e5   : > { %2852 = vmatprep.subr.bf16.mxu0 %v2851_v26  ;;  %v668_v33 = vadd.f32 %v667_v29, %v4033_v11 }
 0x1e6   : > { %2854 = vmatpush3.bf16.xpose.msra.mxu0 %v2851_v26 }
 0x1e7   : > { %v671_v30 = vpop.f32.mrb[10].mxu0 }
 0x1e8   : > { %v4052_v31 = vadd.f32 %v671_v30, %v4026_v6  ;;  %v673_v32 = vpop.f32.mrb[11].mxu0 }
 0x1e9   : > { %v674_v34 = vadd.f32 %v673_v32, %v4033_v11 }
 0x1eb   : > { %v2855_v35 = vpack.c.bf16 %v674_v34, %v668_v33  ;;  %v677_v36 = vpop.f32.mrb[12].mxu0 }
 0x1ec   : > { %v678_v37 = vadd.f32 %v677_v36, %v4026_v6  ;;  %v679_v38 = vpop.f32.mrb[13].mxu0 }
 0x1ed   : > { %2856 = vmatprep.subr.bf16.mxu0 %v2855_v35  ;;  %v680_v42 = vadd.f32 %v679_v38, %v4033_v11 }
 0x1ee   : > { %2858 = vmatpush3.bf16.xpose.msra.mxu0 %v2855_v35 }
 0x1ef   : > { %v683_v39 = vpop.f32.mrb[14].mxu0 }
 0x1f0   : > { %v684_v40 = vadd.f32 %v683_v39, %v4026_v6  ;;  %v685_v41 = vpop.f32.mrb[15].mxu0 }
 0x1f1   : > { %v686_v43 = vadd.f32 %v685_v41, %v4033_v11 }
 0x1f3   : > { %v2859_v44 = vpack.c.bf16 %v686_v43, %v680_v42  ;;  %v689_v45 = vpop.f32.mrb[16].mxu0 }
 0x1f4   : > { %v690_v46 = vadd.f32 %v689_v45, %v4026_v6  ;;  %v691_v47 = vpop.f32.mrb[17].mxu0 }
 0x1f5   : > { %2860 = vmatprep.subr.bf16.mxu0 %v2859_v44  ;;  %v692_v8 = vadd.f32 %v691_v47, %v4033_v11  ;;  %v533_v47 = vld [vmem:[#allocation7 + $0xb8] sm:$0xff] }
 0x1f6   : > { %2862 = vmatpush3.bf16.xpose.msra.mxu0 %v2859_v44 }
 0x1f7   : > { %v695_v48 = vpop.f32.mrb[18].mxu0 }
 0x1f8   : > { %v696_v49 = vadd.f32 %v695_v48, %v4026_v6  ;;  %v697_v2 = vpop.f32.mrb[19].mxu0 }
 0x1f9   : > { %v698_v9 = vadd.f32 %v697_v2, %v4033_v11  ;;  %v539_v2 = vld [vmem:[#allocation7 + $0xe8] sm:$0xff] }
 0x1fb   : > { %v2863_v10 = vpack.c.bf16 %v698_v9, %v692_v8  ;;  %v701_v12 = vpop.f32.mrb[20].mxu0  ;;  %v542_v9 = vld [vmem:[#allocation7 + $0x100] sm:$0xff] }
 0x1fc   : > { %v702_v14 = vadd.f32 %v701_v12, %v4026_v6  ;;  %v703_v15 = vpop.f32.mrb[21].mxu0 }
 0x1fd   : > { %2864 = vmatprep.subr.bf16.mxu0 %v2863_v10  ;;  %v704_v20 = vadd.f32 %v703_v15, %v4033_v11  ;;  %v551_v15 = vld [vmem:[#allocation7 + $0x148] sm:$0xff] }
 0x1fe   : > { %2866 = vmatpush3.bf16.xpose.msra.mxu0 %v2863_v10  ;;  %v545_v10 = vld [vmem:[#allocation7 + $0x118] sm:$0xff] }
 0x1ff   : > { %v707_v16 = vpop.f32.mrb[22].mxu0  ;;  %v2835_v12 = vpack.c.bf16 %v545_v10, %v542_v9 }
 0x200   : > { %v708_v17 = vadd.f32 %v707_v16, %v4026_v6  ;;  %v709_v18 = vpop.f32.mrb[23].mxu0 }
 0x201   : > { %v710_v21 = vadd.f32 %v709_v18, %v4033_v11  ;;  %v557_v18 = vld [vmem:[#allocation7 + $0x178] sm:$0xff] }
 0x203   : > { %v2867_v23 = vpack.c.bf16 %v710_v21, %v704_v20  ;;  %v713_v24 = vpop.f32.mrb[24].mxu0 }
 0x204   : > { %v714_v25 = vadd.f32 %v713_v24, %v4026_v6  ;;  %v715_v26 = vpop.f32.mrb[25].mxu0  ;;  %v887_v24 = vld [vmem:[#allocation5 + $0x30] sm:$0xff] }
 0x205   : > { %2868 = vmatprep.subr.bf16.mxu0 %v2867_v23  ;;  %v716_v32 = vadd.f32 %v715_v26, %v4033_v11 }
 0x206   : > { %2870 = vmatpush3.bf16.xpose.msra.mxu0 %v2867_v23  ;;  %v886_v23 = vld [vmem:[#allocation5 + $0x28] sm:$0xff] }
 0x207   : > { %v719_v27 = vpop.f32.mrb[26].mxu0 }
 0x208   : > { %v720_v29 = vadd.f32 %v719_v27, %v4026_v6  ;;  %v721_v30 = vpop.f32.mrb[27].mxu0 }
 0x209   : > { %v722_v33 = vadd.f32 %v721_v30, %v4033_v11  ;;  %v888_v30 = vld [vmem:[#allocation5 + $0x38] sm:$0xff] }
 0x20b   : > { %v2871_v34 = vpack.c.bf16 %v722_v33, %v716_v32  ;;  %v725_v35 = vpop.f32.mrb[28].mxu0  ;;  %v889_v32 = vld [vmem:[#allocation5 + $0x40] sm:$0xff] }
 0x20c   : > { %v726_v36 = vadd.f32 %v725_v35, %v4026_v6  ;;  %v727_v38 = vpop.f32.mrb[29].mxu0 }
 0x20d   : > { %2872 = vmatprep.subr.bf16.mxu0 %v2871_v34  ;;  %v728_v43 = vadd.f32 %v727_v38, %v4033_v11  ;;  %v890_v38 = vld [vmem:[#allocation5 + $0x48] sm:$0xff] }
 0x20e   : > { %2874 = vmatpush3.bf16.xpose.msra.mxu0 %v2871_v34 }
 0x20f   : > { %v731_v39 = vpop.f32.mrb[30].mxu0 }
 0x210   : > { %v732_v41 = vadd.f32 %v731_v39, %v4026_v6  ;;  %v733_v42 = vpop.f32.mrb[31].mxu0  ;;  %v512_v6 = vld [vmem:[#allocation7 + $0x10] sm:$0xff] }
 0x211   : > { %v734_v44 = vadd.f32 %v733_v42, %v4033_v11  ;;  %v515_v11 = vld [vmem:[#allocation7 + $0x28] sm:$0xff]  ;;  %v891_v39 = vld [vmem:[#allocation5 + $0x50] sm:$0xff] }
 0x213   : > { %v2875_v45 = vpack.c.bf16 %v734_v44, %v728_v43 }
 0x215   : > { %2876 = vmatprep.subr.bf16.mxu0 %v2875_v45 }
 0x216   : > { %2878 = vmatpush3.bf16.xpose.msra.mxu0 %v2875_v45  ;;  %v892_v45 = vld [vmem:[#allocation5 + $0x58] sm:$0xff] }
 0x21d   : > { %2648 = vmatmul.mubr.f32.vlgmr.msra.gmra.mrb[32].mxu0 %v4036_v13  ;;  %v2815_v13 = vpack.c.bf16 %v515_v11, %v512_v6  ;;  %v893_v6 = vld [vmem:[#allocation5 + $0x60] sm:$0xff] }
 0x21e   : > { %2650 = vmatprep.mubr.f32.mxu0 %v4041_v19  ;;  %v518_v19 = vld [vmem:[#allocation7 + $0x40] sm:$0xff] }
 0x21f   : > { %2816 = vmatprep.subr.bf16.mxu1 %v2815_v13 }
 0x220   : > { %2818 = vmatpush3.bf16.msra.mxu1 %v2815_v13 }
 0x221   : > { %2651 = vmatmul.mubr.f32.gmra.mrb[34].mxu0 %v4044_v22  ;;  %v521_v22 = vld [vmem:[#allocation7 + $0x58] sm:$0xff] }
 0x222   : > { %2653 = vmatprep.mubr.f32.mxu0 %v4049_v28  ;;  %v2819_v28 = vpack.c.bf16 %v521_v22, %v518_v19 }
 0x224   : > { %2820 = vmatprep.subr.bf16.mxu1 %v2819_v28 }
 0x225   : > { %2654 = vmatmul.mubr.f32.gmra.mrb[36].mxu0 %v4052_v31  ;;  %v524_v31 = vld [vmem:[#allocation7 + $0x70] sm:$0xff]  ;;  %2822 = vmatpush3.bf16.msra.mxu1 %v2819_v28  ;;  %v894_v28 = vld [vmem:[#allocation5 + $0x68] sm:$0xff] }
 0x226   : > { %2656 = vmatprep.mubr.f32.mxu0 %v678_v37  ;;  %v527_v37 = vld [vmem:[#allocation7 + $0x88] sm:$0xff] }
 0x229   : > { %2657 = vmatmul.mubr.f32.gmra.mrb[38].mxu0 %v684_v40  ;;  %v530_v40 = vld [vmem:[#allocation7 + $0xa0] sm:$0xff] }
 0x22a   : > { %2659 = vmatprep.mubr.f32.mxu0 %v690_v46  ;;  %v2823_v46 = vpack.c.bf16 %v527_v37, %v524_v31  ;;  %v2827_v48 = vpack.c.bf16 %v533_v47, %v530_v40 }
 0x22c   : > { %2824 = vmatprep.subr.bf16.mxu1 %v2823_v46 }
 0x22d   : > { %2660 = vmatmul.mubr.f32.gmra.mrb[40].mxu0 %v696_v49  ;;  %v536_v49 = vld [vmem:[#allocation7 + $0xd0] sm:$0xff]  ;;  %2826 = vmatpush3.bf16.msra.mxu1 %v2823_v46 }
 0x22e   : > { %2662 = vmatprep.mubr.f32.mxu0 %v702_v14  ;;  %2828 = vmatprep.subr.bf16.mxu1 %v2827_v48  ;;  %v2831_v8 = vpack.c.bf16 %v539_v2, %v536_v49  ;;  %v548_v14 = vld [vmem:[#allocation7 + $0x130] sm:$0xff] }
 0x22f   : > { %v2839_v16 = vpack.c.bf16 %v551_v15, %v548_v14  ;;  %v895_v46 = vld [vmem:[#allocation5 + $0x70] sm:$0xff] }
 0x231   : > { %2663 = vmatmul.mubr.f32.gmra.mrb[42].mxu0 %v708_v17  ;;  %2830 = vmatpush3.bf16.msra.mxu1 %v2827_v48  ;;  %v554_v17 = vld [vmem:[#allocation7 + $0x160] sm:$0xff]  ;;  %v896_v48 = vld [vmem:[#allocation5 + $0x78] sm:$0xff] }
 0x232   : > { %2665 = vmatprep.mubr.f32.mxu0 %v714_v25  ;;  %2832 = vmatprep.subr.bf16.mxu1 %v2831_v8  ;;  %v2843_v20 = vpack.c.bf16 %v557_v18, %v554_v17 }
 0x235   : > { %2666 = vmatmul.mubr.f32.gmra.mrb[44].mxu0 %v720_v29  ;;  %2834 = vmatpush3.bf16.msra.mxu1 %v2831_v8  ;;  %v570_v8 = vsub.s32 2, %v4015_v3 }
 0x236   : > { %2668 = vmatprep.mubr.f32.mxu0 %v726_v36  ;;  %2836 = vmatprep.subr.bf16.mxu1 %v2835_v12 }
 0x237   : > { %v4148_v15 = vrot.slane %v4021_v5, %v570_v8 }
 0x239   : > { %2669 = vmatmul.mubr.f32.gmra.mrb[46].mxu0 %v732_v41  ;;  %2838 = vmatpush3.bf16.msra.mxu1 %v2835_v12 }
 0x23a   : > { %1627 = vmatprep.mubr.f32.mxu0 %v3574_v0  ;;  %2840 = vmatprep.subr.bf16.mxu1 %v2839_v16 }
 0x23d   : > { %2842 = vmatpush3.bf16.msra.mxu1 %v2839_v16 }
 0x23e   : > { %2844 = vmatprep.subr.bf16.mxu1 %v2843_v20 }
 0x241   : > { %2846 = vmatpush3.bf16.msra.mxu1 %v2843_v20 }
 0x244   : > { %2592 = vmatmul.mubr.f32.vlgmr.msra.gmra.mrb[0].mxu1 %v3942_v50  ;;  %v881_v50 = vld [vmem:[#allocation5] sm:$0xff] }
 0x245   : > { %2594 = vmatprep.mubr.f32.mxu1 %v3947_v51 }
 0x248   : > { %2595 = vmatmul.mubr.f32.gmra.mrb[2].mxu1 %v3952_v52 }
 0x249   : > { %2597 = vmatprep.mubr.f32.mxu1 %v3957_v53 }
 0x24c   : > { %2598 = vmatmul.mubr.f32.gmra.mrb[4].mxu1 %v3962_v54  ;;  %v882_v54 = vld [vmem:[#allocation5 + $0x8] sm:$0xff] }
 0x24d   : > { %2600 = vmatprep.mubr.f32.mxu1 %v3967_v55  ;;  %v883_v55 = vld [vmem:[#allocation5 + $0x10] sm:$0xff] }
 0x250   : > { %2601 = vmatmul.mubr.f32.gmra.mrb[6].mxu1 %v3972_v56 }
 0x251   : > { %2603 = vmatprep.mubr.f32.mxu1 %v3977_v57 }
 0x254   : > { %2604 = vmatmul.mubr.f32.gmra.mrb[8].mxu1 %v3982_v58 }
 0x255   : > { %2606 = vmatprep.mubr.f32.mxu1 %v3987_v59 }
 0x258   : > { %2607 = vmatmul.mubr.f32.gmra.mrb[10].mxu1 %v3992_v60  ;;  %v884_v60 = vld [vmem:[#allocation5 + $0x18] sm:$0xff] }
 0x259   : > { %2609 = vmatprep.mubr.f32.mxu1 %v3997_v61  ;;  %v885_v61 = vld [vmem:[#allocation5 + $0x20] sm:$0xff] }
 0x25c   : > { %2610 = vmatmul.mubr.f32.gmra.mrb[12].mxu1 %v4002_v62 }
 0x25d   : > { %2612 = vmatprep.mubr.f32.mxu1 %v4007_v63 }
 0x260   : > { %2613 = vmatmul.mubr.f32.gmra.mrb[14].mxu1 %v4012_v1 }
 0x2f0   : > { %v2649_v51 = vpop.f32.mrb[32].mxu0 }
 0x2f1   : > { %v963_v52 = vpop.f32.mrb[33].mxu0  ;;  %v4100_v58 = vadd.f32 %v2649_v51, %v882_v54 }
 0x2f2   : > { %v4097_v53 = vadd.f32 %v963_v52, %v881_v50 }
 0x2f4   : > { %v2652_v56 = vpop.f32.mrb[34].mxu0  ;;  %1042 = vmax.xlane.f32.xlu0 %v4097_v53 }
 0x2f5   : > { %v973_v57 = vpop.f32.mrb[35].mxu0  ;;  %v4106_v1 = vadd.f32 %v2652_v56, %v884_v60 }
 0x2f6   : > { %v4102_v59 = vadd.f32 %v973_v57, %v883_v55 }
 0x2f8   : > { %v2655_v62 = vpop.f32.mrb[36].mxu0  ;;  %1046 = vmax.xlane.f32.xlu1 %v4102_v59  ;;  %1044 = vmax.xlane.f32.xlu0 %v4100_v58 }
 0x2f9   : > { %v983_v63 = vpop.f32.mrb[37].mxu0  ;;  %v4112_v27 = vadd.f32 %v2655_v62, %v886_v23 }
 0x2fa   : > { %v4108_v21 = vadd.f32 %v983_v63, %v885_v61 }
 0x2fc   : > { %v2658_v25 = vpop.f32.mrb[38].mxu0  ;;  %1048 = vmax.xlane.f32.xlu1 %v4106_v1  ;;  %1050 = vmax.xlane.f32.xlu0 %v4108_v21 }
 0x2fd   : > { %v993_v26 = vpop.f32.mrb[39].mxu0  ;;  %v4118_v35 = vadd.f32 %v2658_v25, %v888_v30 }
 0x2fe   : > { %v4114_v29 = vadd.f32 %v993_v26, %v887_v24 }
 0x300   : > { %v2661_v33 = vpop.f32.mrb[40].mxu0  ;;  %1052 = vmax.xlane.f32.xlu1 %v4112_v27  ;;  %1054 = vmax.xlane.f32.xlu0 %v4114_v29 }
 0x301   : > { %v1003_v34 = vpop.f32.mrb[41].mxu0  ;;  %v4124_v43 = vadd.f32 %v2661_v33, %v890_v38 }
 0x302   : > { %v4120_v36 = vadd.f32 %v1003_v34, %v889_v32 }
 0x304   : > { %v2664_v41 = vpop.f32.mrb[42].mxu0  ;;  %1056 = vmax.xlane.f32.xlu1 %v4118_v35  ;;  %1058 = vmax.xlane.f32.xlu0 %v4120_v36 }
 0x305   : > { %v1013_v42 = vpop.f32.mrb[43].mxu0  ;;  %v4130_v19 = vadd.f32 %v2664_v41, %v892_v45 }
 0x306   : > { %v4126_v44 = vadd.f32 %v1013_v42, %v891_v39 }
 0x308   : > { %v2667_v11 = vpop.f32.mrb[44].mxu0  ;;  %1060 = vmax.xlane.f32.xlu1 %v4124_v43  ;;  %1062 = vmax.xlane.f32.xlu0 %v4126_v44 }
 0x309   : > { %v1023_v13 = vpop.f32.mrb[45].mxu0  ;;  %v4136_v40 = vadd.f32 %v2667_v11, %v894_v28 }
 0x30a   : > { %v4132_v22 = vadd.f32 %v1023_v13, %v893_v6 }
 0x30c   : > { %v2670_v31 = vpop.f32.mrb[46].mxu0  ;;  %1064 = vmax.xlane.f32.xlu1 %v4130_v19  ;;  %1066 = vmax.xlane.f32.xlu0 %v4132_v22 }
 0x30d   : > { %v1033_v37 = vpop.f32.mrb[47].mxu0  ;;  %v4142_v49 = vadd.f32 %v2670_v31, %v896_v48 }
 0x30e   : > { %v4139_v47 = vadd.f32 %v1033_v37, %v895_v46 }
 0x310   : > { %1068 = vmax.xlane.f32.xlu1 %v4136_v40 }
 0x314   : > { %1070 = vmax.xlane.f32.xlu1 %v4139_v47 }
 0x317   : > { %v2593_v20 = vpop.f32.mrb[0].mxu1 }
 0x318   : > { %1072 = vmax.xlane.f32.xlu1 %v4142_v49  ;;  %v808_v52 = vadd.f32 %v2593_v20, %v4148_v15 }
 0x381   : > { %v1043_v2 = vpop.xlane.xlu0 %1042 }
 0x382   : > { %v1074_v9 = vsub.f32 %v4097_v53, %v1043_v2  ;;  %v802_v53 = vpop.f32.mrb[1].mxu1 }
 0x383   : > { %v803_v5 = vadd.f32 %v802_v53, %v4148_v15  ;;  %v2596_v60 = vpop.f32.mrb[2].mxu1 }
 0x384   : > { %v1090_v10 = vmul.f32 1.442695, %v1074_v9  ;;  %v818_v62 = vadd.f32 %v2596_v60, %v4148_v15  ;;  %v812_v23 = vpop.f32.mrb[3].mxu1 }
 0x385   : > { %v1047_v12 = vpop.xlane.xlu1 %1046  ;;  %v1045_v14 = vpop.xlane.xlu0 %1044  ;;  %v813_v25 = vadd.f32 %v812_v23, %v4148_v15 }
 0x386   : > { %3203 = vpow2.f32 %v1090_v10  ;;  %v1075_v16 = vsub.f32 %v4100_v58, %v1045_v14  ;;  %v1076_v17 = vsub.f32 %v4102_v59, %v1047_v12  ;;  %v2879_v59 = vpack.c.bf16 %v808_v52, %v803_v5  ;;  %v2599_v30 = vpop.f32.mrb[4].mxu1 }
 0x387   : > { %v2883_v34 = vpack.c.bf16 %v818_v62, %v813_v25  ;;  %v822_v39 = vpop.f32.mrb[5].mxu1 }
 0x388   : > { %v1092_v18 = vmul.f32 1.442695, %v1075_v16  ;;  %v1094_v55 = vmul.f32 1.442695, %v1076_v17  ;;  %2880 = vmatprep.subr.bf16.mxu1 %v2879_v59  ;;  %v823_v42 = vadd.f32 %v822_v39, %v4148_v15  ;;  %v2602_v6 = vpop.f32.mrb[6].mxu1 }
 0x389   : > { %v1049_v50 = vpop.xlane.xlu1 %1048  ;;  %v1051_v51 = vpop.xlane.xlu0 %1050  ;;  %2882 = vmatpush3.bf16.msra.mxu1 %v2879_v59  ;;  %v838_v37 = vadd.f32 %v2602_v6, %v4148_v15 }
 0x38a   : > { %v1077_v54 = vsub.f32 %v4106_v1, %v1049_v50  ;;  %3205 = vpow2.f32 %v1092_v18  ;;  %v1078_v56 = vsub.f32 %v4108_v21, %v1051_v51  ;;  %2884 = vmatprep.subr.bf16.mxu1 %v2883_v34  ;;  %v832_v46 = vpop.f32.mrb[7].mxu1 }
 0x38b   : > { %v833_v2 = vadd.f32 %v832_v46, %v4148_v15  ;;  %v2605_v10 = vpop.f32.mrb[8].mxu1 }
 0x38c   : > { %v1096_v57 = vmul.f32 1.442695, %v1077_v54  ;;  %v1098_v1 = vmul.f32 1.442695, %v1078_v56  ;;  %v848_v17 = vadd.f32 %v2605_v10, %v4148_v15  ;;  %v842_v18 = vpop.f32.mrb[9].mxu1 }
 0x38d   : > { %v1053_v58 = vpop.xlane.xlu1 %1052  ;;  %v1055_v61 = vpop.xlane.xlu0 %1054  ;;  %2886 = vmatpush3.bf16.msra.mxu1 %v2883_v34  ;;  %v2891_v16 = vpack.c.bf16 %v838_v37, %v833_v2  ;;  %v843_v51 = vadd.f32 %v842_v18, %v4148_v15  ;;  %v1331_v37 = vld [vmem:[#allocation8] sm:$0xff] }
 0x38e   : > { %3207 = vpow2.f32 %v1096_v57  ;;  %v1079_v63 = vsub.f32 %v4112_v27, %v1053_v58  ;;  %v1080_v24 = vsub.f32 %v4114_v29, %v1055_v61  ;;  %v828_v27 = vadd.f32 %v2599_v30, %v4148_v15  ;;  %v2608_v53 = vpop.f32.mrb[10].mxu1 }
 0x38f   : > { %3209 = vpow2.f32 %v1094_v55  ;;  %v2895_v56 = vpack.c.bf16 %v848_v17, %v843_v51  ;;  %v858_v5 = vadd.f32 %v2608_v53, %v4148_v15  ;;  %v852_v57 = vpop.f32.mrb[11].mxu1  ;;  %v1333_v17 = vld [vmem:[#allocation8 + $0x10] sm:$0xff] }
 0x390   : > { %v4160_v21 = vpop.eup %3203  ;;  %v1100_v26 = vmul.f32 1.442695, %v1079_v63  ;;  %v1102_v29 = vmul.f32 1.442695, %v1080_v24  ;;  %v2887_v31 = vpack.c.bf16 %v828_v27, %v823_v42  ;;  %v853_v60 = vadd.f32 %v852_v57, %v4148_v15  ;;  %v2611_v63 = vpop.f32.mrb[12].mxu1 }
 0x391   : > { %v1057_v32 = vpop.xlane.xlu1 %1056  ;;  %1122 = vadd.xlane.f32.xlu0 %v4160_v21  ;;  %v1059_v33 = vpop.xlane.xlu0 %1058 }
 0x392   : > { %3211 = vpow2.f32 %v1100_v26  ;;  %v1081_v38 = vsub.f32 %v4118_v35, %v1057_v32  ;;  %v1082_v41 = vsub.f32 %v4120_v36, %v1059_v33  ;;  %2888 = vmatprep.subr.bf16.mxu1 %v2887_v31  ;;  %v2899_v62 = vpack.c.bf16 %v858_v5, %v853_v60  ;;  %v862_v24 = vpop.f32.mrb[13].mxu1 }
 0x393   : > { %3213 = vpow2.f32 %v1098_v1  ;;  %2890 = vmatpush3.bf16.msra.mxu1 %v2887_v31  ;;  %v863_v26 = vadd.f32 %v862_v24, %v4148_v15 }
 0x394   : > { %v1104_v45 = vmul.f32 1.442695, %v1081_v38  ;;  %v4167_v11 = vpop.eup %3205  ;;  %v1106_v36 = vmul.f32 1.442695, %v1082_v41  ;;  %2892 = vmatprep.subr.bf16.mxu1 %v2891_v16  ;;  %v2614_v38 = vpop.f32.mrb[14].mxu1 }
 0x395   : > { %v1061_v13 = vpop.xlane.xlu1 %1060  ;;  %v1063_v28 = vpop.xlane.xlu0 %1062  ;;  %1124 = vadd.xlane.f32.xlu0 %v4167_v11 }
 0x396   : > { %3215 = vpow2.f32 %v1104_v45  ;;  %v1083_v35 = vsub.f32 %v4124_v43, %v1061_v13  ;;  %v1084_v48 = vsub.f32 %v4126_v44, %v1063_v28  ;;  %v872_v39 = vpop.f32.mrb[15].mxu1 }
 0x397   : > { %3217 = vpow2.f32 %v1102_v29  ;;  %2894 = vmatpush3.bf16.msra.mxu1 %v2891_v16  ;;  %v878_v29 = vadd.f32 %v2614_v38, %v4148_v15  ;;  %v873_v41 = vadd.f32 %v872_v39, %v4148_v15 }
 0x398   : > { %v4174_v8 = vpop.eup %3207  ;;  %v1108_v9 = vmul.f32 1.442695, %v1083_v35  ;;  %v1110_v20 = vmul.f32 1.442695, %v1084_v48  ;;  %2896 = vmatprep.subr.bf16.mxu1 %v2895_v56  ;;  %v1332_v35 = vld [vmem:[#allocation8 + $0x8] sm:$0xff] }
 0x399   : > { %v4176_v12 = vpop.eup %3209  ;;  %1128 = vadd.xlane.f32.xlu1 %v4174_v8  ;;  %v1065_v43 = vpop.xlane.xlu1 %1064  ;;  %v2907_v13 = vpack.c.bf16 %v878_v29, %v873_v41  ;;  %v2911_v46 = vpack.c.bf16 %v1332_v35, %v1331_v37  ;;  %v1341_v29 = vld [vmem:[#allocation8 + $0x50] sm:$0xff]  ;;  %v1342_v41 = vld [vmem:[#allocation8 + $0x58] sm:$0xff] }
 0x39a   : > { %v1067_v14 = vpop.xlane.xlu0 %1066  ;;  %3219 = vpow2.f32 %v1108_v9  ;;  %v1085_v44 = vsub.f32 %v4130_v19, %v1065_v43  ;;  %1126 = vadd.xlane.f32.xlu0 %v4176_v12 }
 0x39b   : > { %3221 = vpow2.f32 %v1106_v36  ;;  %v1086_v50 = vsub.f32 %v4132_v22, %v1067_v14  ;;  %2898 = vmatpush3.bf16.msra.mxu1 %v2895_v56  ;;  %v1336_v56 = vld [vmem:[#allocation8 + $0x28] sm:$0xff] }
 0x39c   : > { %v4184_v52 = vpop.eup %3211  ;;  %v1112_v54 = vmul.f32 1.442695, %v1085_v44  ;;  %2900 = vmatprep.subr.bf16.mxu1 %v2899_v62  ;;  %v1334_v44 = vld [vmem:[#allocation8 + $0x18] sm:$0xff] }
 0x39d   : > { %v4186_v55 = vpop.eup %3213  ;;  %1132 = vadd.xlane.f32.xlu1 %v4184_v52  ;;  %v1069_v19 = vpop.xlane.xlu1 %1068  ;;  %v1114_v58 = vmul.f32 1.442695, %v1086_v50 }
 0x39e   : > { %3223 = vpow2.f32 %v1112_v54  ;;  %v1087_v22 = vsub.f32 %v4136_v40, %v1069_v19  ;;  %1130 = vadd.xlane.f32.xlu0 %v4186_v55  ;;  %v868_v40 = vadd.f32 %v2611_v63, %v4148_v15  ;;  %v2915_v54 = vpack.c.bf16 %v1334_v44, %v1333_v17  ;;  %v1335_v19 = vld [vmem:[#allocation8 + $0x20] sm:$0xff] }
 0x39f   : > { %3225 = vpow2.f32 %v1110_v20  ;;  %2902 = vmatpush3.bf16.msra.mxu1 %v2899_v62  ;;  %v1338_v62 = vld [vmem:[#allocation8 + $0x38] sm:$0xff] }
 0x3a0   : > { %v4193_v61 = vpop.eup %3215  ;;  %v1116_v59 = vmul.f32 1.442695, %v1087_v22  ;;  %v2903_v33 = vpack.c.bf16 %v868_v40, %v863_v26  ;;  %v1339_v26 = vld [vmem:[#allocation8 + $0x40] sm:$0xff] }
 0x3a1   : > { %v4195_v23 = vpop.eup %3217  ;;  %1136 = vadd.xlane.f32.xlu1 %v4193_v61  ;;  %v1071_v1 = vpop.xlane.xlu1 %1070 }
 0x3a2   : > { %3227 = vpow2.f32 %v1116_v59  ;;  %v1088_v25 = vsub.f32 %v4139_v47, %v1071_v1  ;;  %1134 = vadd.xlane.f32.xlu0 %v4195_v23  ;;  %2904 = vmatprep.subr.bf16.mxu1 %v2903_v33  ;;  %v1337_v59 = vld [vmem:[#allocation8 + $0x30] sm:$0xff] }
 0x3a3   : > { %3229 = vpow2.f32 %v1114_v58  ;;  %2906 = vmatpush3.bf16.msra.mxu1 %v2903_v33 }
 0x3a4   : > { %v4202_v30 = vpop.eup %3219  ;;  %v1118_v32 = vmul.f32 1.442695, %v1088_v25  ;;  %2908 = vmatprep.subr.bf16.mxu1 %v2907_v13 }
 0x3a5   : > { %v4204_v34 = vpop.eup %3221  ;;  %1140 = vadd.xlane.f32.xlu1 %v4202_v30  ;;  %v1073_v27 = vpop.xlane.xlu1 %1072 }
 0x3a6   : > { %3231 = vpow2.f32 %v1118_v32  ;;  %v1089_v47 = vsub.f32 %v4142_v49, %v1073_v27  ;;  %1138 = vadd.xlane.f32.xlu0 %v4204_v34  ;;  %v1340_v32 = vld [vmem:[#allocation8 + $0x48] sm:$0xff] }
 0x3a7   : > { %2910 = vmatpush3.bf16.msra.mxu1 %v2907_v13 }
 0x3a8   : > { %v4211_v42 = vpop.eup %3223  ;;  %v1120_v45 = vmul.f32 1.442695, %v1089_v47  ;;  %2912 = vmatprep.subr.bf16.mxu1 %v2911_v46 }
 0x3a9   : > { %v4213_v6 = vpop.eup %3225  ;;  %1144 = vadd.xlane.f32.xlu1 %v4211_v42 }
 0x3aa   : > { %3233 = vpow2.f32 %v1120_v45  ;;  %1142 = vadd.xlane.f32.xlu0 %v4213_v6 }
 0x3ac   : > { %v4217_v49 = vpop.eup %3227 }
 0x3ad   : > { %v4219_v28 = vpop.eup %3229  ;;  %1148 = vadd.xlane.f32.xlu1 %v4217_v49 }
 0x3ae   : > { %1146 = vadd.xlane.f32.xlu0 %v4219_v28 }
 0x3b0   : > { %v4223_v15 = vpop.eup %3231 }
 0x3b2   : > { %1150 = vadd.xlane.f32.xlu0 %v4223_v15 }
 0x3b4   : > { %v4226_v31 = vpop.eup %3233 }
 0x3b5   : > { %1152 = vadd.xlane.f32.xlu1 %v4226_v31 }
 0x41e   : > { %v1123_v36 = vpop.xlane.xlu0 %1122 }
 0x41f   : > { %3235 = vrcp.f32 %v1123_v36  ;;  %v1344_v36 = vld [vmem:[#allocation8 + $0x68] sm:$0xff] }
 0x422   : > { %v1125_v48 = vpop.xlane.xlu0 %1124 }
 0x423   : > { %3237 = vrcp.f32 %v1125_v48 }
 0x426   : > { %v1129_v2 = vpop.xlane.xlu1 %1128 }
 0x427   : > { %3239 = vrcp.f32 %v1129_v2  ;;  %v1127_v9 = vpop.xlane.xlu0 %1126 }
 0x428   : > { %3241 = vrcp.f32 %v1127_v9 }
 0x429   : > { %v3236_v10 = vpop.eup %3235 }
 0x42a   : > { %v1133_v43 = vpop.xlane.xlu1 %1132  ;;  %v1155_v14 = vmul.f32 %v3236_v10, %v4160_v21 }
 0x42b   : > { %3243 = vrcp.f32 %v1133_v43  ;;  %v1131_v16 = vpop.xlane.xlu0 %1130  ;;  %v1345_v43 = vld [vmem:[#allocation8 + $0x70] sm:$0xff] }
 0x42c   : > { %3245 = vrcp.f32 %v1131_v16  ;;  %2703 = vmatprep.mubr.f32.mxu1 %v1155_v14  ;;  %v1346_v14 = vld [vmem:[#allocation8 + $0x78] sm:$0xff] }
 0x42d   : > { %v3238_v18 = vpop.eup %3237 }
 0x42e   : > { %v1137_v20 = vpop.xlane.xlu1 %1136  ;;  %v1157_v50 = vmul.f32 %v3238_v18, %v4167_v11  ;;  %v2919_v11 = vpack.c.bf16 %v1336_v56, %v1335_v19  ;;  %v2939_v18 = vpack.c.bf16 %v1346_v14, %v1345_v43  ;;  %v1536_v19 = vld [vmem:[#allocation11 + $0x28] sm:$0xff]  ;;  %v1538_v56 = vld [vmem:[#allocation11 + $0x38] sm:$0xff] }
 0x42f   : > { %3247 = vrcp.f32 %v1137_v20  ;;  %v1135_v51 = vpop.xlane.xlu0 %1134 }
 0x430   : > { %3249 = vrcp.f32 %v1135_v51  ;;  %2704 = vmatmul.mubr.f32.vlgmr.msra.gmra.mrb[16].mxu1 %v1157_v50  ;;  %v1532_v51 = vld [vmem:[#allocation11 + $0x8] sm:$0xff] }
 0x431   : > { %v3240_v53 = vpop.eup %3239  ;;  %2914 = vmatpush3.bf16.msra.mxu1 %v2911_v46  ;;  %v1343_v46 = vld [vmem:[#allocation8 + $0x60] sm:$0xff] }
 0x432   : > { %v3242_v5 = vpop.eup %3241  ;;  %v1141_v21 = vpop.xlane.xlu1 %1140  ;;  %v1161_v57 = vmul.f32 %v3240_v53, %v4174_v8  ;;  %2916 = vmatprep.subr.bf16.mxu1 %v2915_v54  ;;  %v1533_v53 = vld [vmem:[#allocation11 + $0x10] sm:$0xff] }
 0x433   : > { %3251 = vrcp.f32 %v1141_v21  ;;  %v1139_v22 = vpop.xlane.xlu0 %1138  ;;  %v1159_v60 = vmul.f32 %v3242_v5, %v4176_v12  ;;  %v2923_v12 = vpack.c.bf16 %v1338_v62, %v1337_v59  ;;  %v2947_v21 = vpack.c.bf16 %v1538_v56, %v1536_v19  ;;  %v1541_v59 = vld [vmem:[#allocation11 + $0x50] sm:$0xff]  ;;  %v1544_v62 = vld [vmem:[#allocation11 + $0x68] sm:$0xff]  ;;  %v1502_v19 = vld [vmem:[#allocation10 + $0x18] sm:$0xff] }
 0x434   : > { %3253 = vrcp.f32 %v1139_v22  ;;  %v1537_v22 = vld [vmem:[#allocation11 + $0x30] sm:$0xff] }
 0x435   : > { %v3244_v58 = vpop.eup %3243  ;;  %2706 = vmatprep.mubr.f32.mxu1 %v1159_v60  ;;  %2918 = vmatpush3.bf16.msra.mxu1 %v2915_v54  ;;  %v1531_v54 = vld [vmem:[#allocation11] sm:$0xff]  ;;  %v1542_v60 = vld [vmem:[#allocation11 + $0x58] sm:$0xff] }
 0x436   : > { %v3246_v63 = vpop.eup %3245  ;;  %2707 = vmatmul.mubr.f32.gmra.mrb[18].mxu1 %v1161_v57  ;;  %v1145_v1 = vpop.xlane.xlu1 %1144  ;;  %v1165_v40 = vmul.f32 %v3244_v58, %v4184_v52  ;;  %2920 = vmatprep.subr.bf16.mxu1 %v2919_v11  ;;  %v2945_v5 = vpack.c.bf16 %v1533_v53, %v1531_v54  ;;  %v1535_v57 = vld [vmem:[#allocation11 + $0x20] sm:$0xff]  ;;  %v1561_v54 = vld [vmem:[#allocation11 + $0xf0] sm:$0xff]  ;;  %v1500_v53 = vld [vmem:[#allocation10 + $0x8] sm:$0xff] }
 0x437   : > { %3255 = vrcp.f32 %v1145_v1  ;;  %v1143_v24 = vpop.xlane.xlu0 %1142  ;;  %v1163_v8 = vmul.f32 %v3246_v63, %v4186_v55  ;;  %v2927_v55 = vpack.c.bf16 %v1340_v32, %v1339_v26  ;;  %v1539_v58 = vld [vmem:[#allocation11 + $0x40] sm:$0xff]  ;;  %v1546_v63 = vld [vmem:[#allocation11 + $0x78] sm:$0xff]  ;;  %v2975_v56 = vpack.c.bf16 %v1502_v19, %v1500_v53 }
 0x438   : > { %3257 = vrcp.f32 %v1143_v24  ;;  %v2953_v1 = vpack.c.bf16 %v1541_v59, %v1539_v58  ;;  %v1543_v24 = vld [vmem:[#allocation11 + $0x60] sm:$0xff]  ;;  %v1526_v19 = vld [vmem:[#allocation10 + $0xd8] sm:$0xff] }
 0x439   : > { %v3248_v25 = vpop.eup %3247  ;;  %2709 = vmatprep.mubr.f32.mxu1 %v1163_v8  ;;  %2922 = vmatpush3.bf16.msra.mxu1 %v2919_v11  ;;  %v2949_v11 = vpack.c.bf16 %v1537_v22, %v1535_v57  ;;  %v1545_v8 = vld [vmem:[#allocation11 + $0x70] sm:$0xff]  ;;  %v1499_v22 = vld [vmem:[#allocation10] sm:$0xff] }
 0x43a   : > { %v3250_v33 = vpop.eup %3249  ;;  %2710 = vmatmul.mubr.f32.gmra.mrb[20].mxu1 %v1165_v40  ;;  %v1149_v27 = vpop.xlane.xlu1 %1148  ;;  %v1169_v38 = vmul.f32 %v3248_v25, %v4193_v61  ;;  %2924 = vmatprep.subr.bf16.mxu1 %v2923_v12  ;;  %v2931_v61 = vpack.c.bf16 %v1342_v41, %v1341_v29  ;;  %v2955_v40 = vpack.c.bf16 %v1546_v63, %v1544_v62  ;;  %v1550_v25 = vld [vmem:[#allocation11 + $0x98] sm:$0xff]  ;;  %v1553_v29 = vld [vmem:[#allocation11 + $0xb0] sm:$0xff]  ;;  %v1556_v41 = vld [vmem:[#allocation11 + $0xc8] sm:$0xff] }
 0x43b   : > { %3259 = vrcp.f32 %v1149_v27  ;;  %v1147_v47 = vpop.xlane.xlu0 %1146  ;;  %v1167_v52 = vmul.f32 %v3250_v33, %v4195_v23  ;;  %v2957_v26 = vpack.c.bf16 %v1545_v8, %v1543_v24  ;;  %v1547_v33 = vld [vmem:[#allocation11 + $0x80] sm:$0xff]  ;;  %v1549_v27 = vld [vmem:[#allocation11 + $0x90] sm:$0xff]  ;;  %v1508_v8 = vld [vmem:[#allocation10 + $0x48] sm:$0xff] }
 0x43c   : > { %3261 = vrcp.f32 %v1147_v47  ;;  %v1554_v47 = vld [vmem:[#allocation11 + $0xb8] sm:$0xff]  ;;  %v1505_v24 = vld [vmem:[#allocation10 + $0x30] sm:$0xff] }
 0x43d   : > { %v3252_v39 = vpop.eup %3251  ;;  %2712 = vmatprep.mubr.f32.mxu1 %v1167_v52  ;;  %2926 = vmatpush3.bf16.msra.mxu1 %v2923_v12  ;;  %v1548_v12 = vld [vmem:[#allocation11 + $0x88] sm:$0xff]  ;;  %v2961_v52 = vpack.c.bf16 %v1549_v27, %v1547_v33 }
 0x43e   : > { %v3254_v45 = vpop.eup %3253  ;;  %2713 = vmatmul.mubr.f32.gmra.mrb[22].mxu1 %v1169_v38  ;;  %v1173_v13 = vmul.f32 %v3252_v39, %v4202_v30  ;;  %2928 = vmatprep.subr.bf16.mxu1 %v2927_v55  ;;  %v2935_v30 = vpack.c.bf16 %v1344_v36, %v1343_v46  ;;  %v2959_v32 = vpack.c.bf16 %v1550_v25, %v1548_v12  ;;  %v1552_v38 = vld [vmem:[#allocation11 + $0xa8] sm:$0xff]  ;;  %v1551_v39 = vld [vmem:[#allocation11 + $0xa0] sm:$0xff]  ;;  %v1510_v12 = vld [vmem:[#allocation10 + $0x58] sm:$0xff] }
 0x43f   : > { %v1151_v37 = vpop.xlane.xlu0 %1150  ;;  %v1171_v35 = vmul.f32 %v3254_v45, %v4204_v34  ;;  %v1558_v45 = vld [vmem:[#allocation11 + $0xd8] sm:$0xff]  ;;  %v2983_v27 = vpack.c.bf16 %v1510_v12, %v1508_v8 }
 0x440   : > { %3263 = vrcp.f32 %v1151_v37  ;;  %v2967_v37 = vpack.c.bf16 %v1558_v45, %v1556_v41  ;;  %v1530_v8 = vld [vmem:[#allocation10 + $0xf8] sm:$0xff] }
 0x441   : > { %v3256_v23 = vpop.eup %3255  ;;  %2715 = vmatprep.mubr.f32.mxu1 %v1171_v35  ;;  %2930 = vmatpush3.bf16.msra.mxu1 %v2927_v55  ;;  %v2963_v55 = vpack.c.bf16 %v1554_v47, %v1552_v38  ;;  %v1555_v35 = vld [vmem:[#allocation11 + $0xc0] sm:$0xff]  ;;  %v1509_v47 = vld [vmem:[#allocation10 + $0x50] sm:$0xff] }
 0x442   : > { %v3258_v48 = vpop.eup %3257  ;;  %2716 = vmatmul.mubr.f32.gmra.mrb[24].mxu1 %v1173_v13  ;;  %v1153_v2 = vpop.xlane.xlu1 %1152  ;;  %v1177_v9 = vmul.f32 %v3256_v23, %v4211_v42  ;;  %2932 = vmatprep.subr.bf16.mxu1 %v2931_v61  ;;  %v2965_v13 = vpack.c.bf16 %v1553_v29, %v1551_v39  ;;  %v1507_v38 = vld [vmem:[#allocation10 + $0x40] sm:$0xff] }
 0x443   : > { %3265 = vrcp.f32 %v1153_v2  ;;  %v1175_v10 = vmul.f32 %v3258_v48, %v4213_v6  ;;  %v2985_v29 = vpack.c.bf16 %v1509_v47, %v1507_v38  ;;  %v1527_v47 = vld [vmem:[#allocation10 + $0xe0] sm:$0xff] }
 0x445   : > { %v3260_v34 = vpop.eup %3259  ;;  %2718 = vmatprep.mubr.f32.mxu1 %v1175_v10  ;;  %2934 = vmatpush3.bf16.msra.mxu1 %v2931_v61  ;;  %v1557_v61 = vld [vmem:[#allocation11 + $0xd0] sm:$0xff] }
 0x446   : > { %v3262_v16 = vpop.eup %3261  ;;  %2719 = vmatmul.mubr.f32.gmra.mrb[26].mxu1 %v1177_v9  ;;  %v1181_v17 = vmul.f32 %v3260_v34, %v4217_v49  ;;  %2936 = vmatprep.subr.bf16.mxu1 %v2935_v30  ;;  %v1534_v49 = vld [vmem:[#allocation11 + $0x18] sm:$0xff]  ;;  %v2969_v23 = vpack.c.bf16 %v1557_v61, %v1555_v35  ;;  %v1513_v35 = vld [vmem:[#allocation10 + $0x70] sm:$0xff]  ;;  %v1516_v61 = vld [vmem:[#allocation10 + $0x88] sm:$0xff] }
 0x447   : > { %v1179_v44 = vmul.f32 %v3262_v16, %v4219_v28  ;;  %v2943_v28 = vpack.c.bf16 %v1534_v49, %v1532_v51  ;;  %v1559_v49 = vld [vmem:[#allocation11 + $0xe0] sm:$0xff] }
 0x449   : > { %2721 = vmatprep.mubr.f32.mxu1 %v1179_v44  ;;  %2938 = vmatpush3.bf16.msra.mxu1 %v2935_v30 }
 0x44a   : > { %v3264_v42 = vpop.eup %3263  ;;  %2722 = vmatmul.mubr.f32.gmra.mrb[28].mxu1 %v1181_v17  ;;  %2940 = vmatprep.subr.bf16.mxu1 %v2939_v18 }
 0x44b   : > { %v1183_v6 = vmul.f32 %v3264_v42, %v4223_v15  ;;  %v1540_v15 = vld [vmem:[#allocation11 + $0x48] sm:$0xff]  ;;  %2944 = vmatprep.subr.bf16.mxu0 %v2943_v28 }
 0x44c   : > { %2946 = vmatpush1.bf16.msra.mxu0 %v2945_v5 }
 0x44d   : > { %v3266_v20 = vpop.eup %3265  ;;  %2724 = vmatprep.mubr.f32.mxu1 %v1183_v6  ;;  %2942 = vmatpush3.bf16.msra.mxu1 %v2939_v18 }
 0x44e   : > { %v1185_v50 = vmul.f32 %v3266_v20, %v4226_v31  ;;  %3039 = vmatprep.subr.bf16.mxu1 %v2943_v28  ;;  %2948 = vmatprep.subr.bf16.mxu0 %v2947_v21  ;;  %v2951_v31 = vpack.c.bf16 %v1542_v60, %v1540_v15  ;;  %v1560_v20 = vld [vmem:[#allocation11 + $0xe8] sm:$0xff]  ;;  %v2973_v28 = vpack.c.bf16 %v1561_v54, %v1559_v49  ;;  %v1501_v15 = vld [vmem:[#allocation10 + $0x10] sm:$0xff]  ;;  %v4249_v60 = vld [vmem:[%s4568_s5] ss:$0 sm:$0xff] }
 0x44f   : > { %v2977_v62 = vpack.c.bf16 %v1501_v15, %v1499_v22  ;;  %v1981_v15 = vld [vmem:[#allocation13 + $0xa0] sm:$0xff] }
 0x450   : > { %2725 = vmatmul.mubr.f32.gmra.mrb[30].mxu1 %v1185_v50  ;;  %2950 = vmatpush1.bf16.msra.mxu0 %v2949_v11  ;;  %v1562_v50 = vld [vmem:[#allocation11 + $0xf8] sm:$0xff] }
 0x451   : > { %2952 = vmatprep.subr.bf16.mxu0 %v2951_v31  ;;  %v2971_v51 = vpack.c.bf16 %v1562_v50, %v1560_v20  ;;  %v1519_v50 = vld [vmem:[#allocation10 + $0xa0] sm:$0xff] }
 0x454   : > { %2954 = vmatpush1.bf16.msra.mxu0 %v2953_v1 }
 0x455   : > { %2956 = vmatprep.subr.bf16.mxu0 %v2955_v40 }
 0x458   : > { %2958 = vmatpush1.bf16.msra.mxu0 %v2957_v26 }
 0x459   : > { %2960 = vmatprep.subr.bf16.mxu0 %v2959_v32 }
 0x45c   : > { %2962 = vmatpush1.bf16.msra.mxu0 %v2961_v52 }
 0x45d   : > { %2964 = vmatprep.subr.bf16.mxu0 %v2963_v55 }
 0x460   : > { %2966 = vmatpush1.bf16.msra.mxu0 %v2965_v13 }
 0x461   : > { %2968 = vmatprep.subr.bf16.mxu0 %v2967_v37 }
 0x464   : > { %2970 = vmatpush1.bf16.msra.mxu0 %v2969_v23 }
 0x465   : > { %2972 = vmatprep.subr.bf16.mxu0 %v2971_v51 }
 0x468   : > { %2974 = vmatpush1.bf16.msra.mxu0 %v2973_v28 }
 0x469   : > { %2976 = vmatprep.subr.bf16.mxu0 %v2975_v56 }
 0x503   : > { %v2705_v46 = vpop.f32.mrb[16].mxu1 }
 0x504   : > { %v1252_v36 = vpop.f32.mrb[17].mxu1 }
 0x505   : > { %2759 = vmatprep.mubr.f32.mxu1 %v1252_v36 }
 0x506   : > { %2760 = vmatmul.mubr.f32.vlgmr.msra.gmra.mrb[32].mxu1 %v2705_v46 }
 0x507   : > { %3047 = vmatpush1.bf16.msra.mxu1 %v2945_v5  ;;  %v1977_v5 = vld [vmem:[#allocation13 + $0x80] sm:$0xff] }
 0x508   : > { %3040 = vmatprep.subr.bf16.mxu1 %v2947_v21  ;;  %v1978_v21 = vld [vmem:[#allocation13 + $0x88] sm:$0xff] }
 0x509   : > { %v2708_v48 = vpop.f32.mrb[18].mxu1  ;;  %v3007_v57 = vpack.c.bf16 %v1978_v21, %v1977_v5  ;;  %v1963_v5 = vld [vmem:[#allocation13 + $0x10] sm:$0xff]  ;;  %v1964_v21 = vld [vmem:[#allocation13 + $0x18] sm:$0xff] }
 0x50a   : > { %v1262_v2 = vpop.f32.mrb[19].mxu1 }
 0x50b   : > { %2762 = vmatprep.mubr.f32.mxu1 %v1262_v2  ;;  %3048 = vmatpush1.bf16.msra.mxu1 %v2949_v11  ;;  %v1504_v11 = vld [vmem:[#allocation10 + $0x28] sm:$0xff] }
 0x50c   : > { %2763 = vmatmul.mubr.f32.gmra.mrb[34].mxu1 %v2708_v48  ;;  %3041 = vmatprep.subr.bf16.mxu1 %v2951_v31  ;;  %v1506_v31 = vld [vmem:[#allocation10 + $0x38] sm:$0xff] }
 0x50d   : > { %v2711_v9 = vpop.f32.mrb[20].mxu1 }
 0x50e   : > { %v1272_v10 = vpop.f32.mrb[21].mxu1 }
 0x50f   : > { %2765 = vmatprep.mubr.f32.mxu1 %v1272_v10  ;;  %3049 = vmatpush1.bf16.msra.mxu1 %v2953_v1  ;;  %v2979_v1 = vpack.c.bf16 %v1506_v31, %v1504_v11  ;;  %v1515_v10 = vld [vmem:[#allocation10 + $0x80] sm:$0xff]  ;;  %v1982_v11 = vld [vmem:[#allocation13 + $0xa8] sm:$0xff] }
 0x510   : > { %2766 = vmatmul.mubr.f32.gmra.mrb[36].mxu1 %v2711_v9  ;;  %3042 = vmatprep.subr.bf16.mxu1 %v2955_v40  ;;  %v1503_v40 = vld [vmem:[#allocation10 + $0x20] sm:$0xff]  ;;  %v3015_v12 = vpack.c.bf16 %v1982_v11, %v1981_v15  ;;  %v1988_v15 = vld [vmem:[#allocation13 + $0xd8] sm:$0xff] }
 0x511   : > { %v2714_v30 = vpop.f32.mrb[22].mxu1 }
 0x512   : > { %v1282_v34 = vpop.f32.mrb[23].mxu1 }
 0x513   : > { %2768 = vmatprep.mubr.f32.mxu1 %v1282_v34  ;;  %3050 = vmatpush1.bf16.msra.mxu1 %v2957_v26  ;;  %v2981_v26 = vpack.c.bf16 %v1505_v24, %v1503_v40  ;;  %v1520_v34 = vld [vmem:[#allocation10 + $0xa8] sm:$0xff]  ;;  %v3013_v24 = vpack.c.bf16 %v1964_v21, %v1963_v5  ;;  %v1969_v21 = vld [vmem:[#allocation13 + $0x40] sm:$0xff] }
 0x514   : > { %2769 = vmatmul.mubr.f32.gmra.mrb[38].mxu1 %v2714_v30  ;;  %3043 = vmatprep.subr.bf16.mxu1 %v2959_v32  ;;  %v1517_v30 = vld [vmem:[#allocation10 + $0x90] sm:$0xff]  ;;  %v1528_v40 = vld [vmem:[#allocation10 + $0xe8] sm:$0xff] }
 0x515   : > { %v2717_v43 = vpop.f32.mrb[24].mxu1 }
 0x516   : > { %v1292_v14 = vpop.f32.mrb[25].mxu1 }
 0x517   : > { %2771 = vmatprep.mubr.f32.mxu1 %v1292_v14  ;;  %3051 = vmatpush1.bf16.msra.mxu1 %v2961_v52  ;;  %v1512_v52 = vld [vmem:[#allocation10 + $0x68] sm:$0xff]  ;;  %v1961_v14 = vld [vmem:[#allocation13] sm:$0xff] }
 0x518   : > { %2772 = vmatmul.mubr.f32.gmra.mrb[40].mxu1 %v2717_v43  ;;  %3044 = vmatprep.subr.bf16.mxu1 %v2963_v55  ;;  %v1514_v55 = vld [vmem:[#allocation10 + $0x78] sm:$0xff] }
 0x519   : > { %v2720_v16 = vpop.f32.mrb[26].mxu1  ;;  %v1522_v43 = vld [vmem:[#allocation10 + $0xb8] sm:$0xff] }
 0x51a   : > { %v1302_v17 = vpop.f32.mrb[27].mxu1  ;;  %v2995_v54 = vpack.c.bf16 %v1522_v43, %v1520_v34  ;;  %v4311_v34 = vld [vmem:[%s3920_s1 + $0x28] sm:$0xff]  ;;  %v4321_v43 = vld [vmem:[%s3920_s1 + $0x38] sm:$0xff] }
 0x51b   : > { %2774 = vmatprep.mubr.f32.mxu1 %v1302_v17  ;;  %3052 = vmatpush1.bf16.msra.mxu1 %v2965_v13  ;;  %v2987_v13 = vpack.c.bf16 %v1514_v55, %v1512_v52  ;;  %v1529_v52 = vld [vmem:[#allocation10 + $0xf0] sm:$0xff] }
 0x51c   : > { %2775 = vmatmul.mubr.f32.gmra.mrb[42].mxu1 %v2720_v16  ;;  %3045 = vmatprep.subr.bf16.mxu1 %v2967_v37  ;;  %v1511_v37 = vld [vmem:[#allocation10 + $0x60] sm:$0xff]  ;;  %v1962_v16 = vld [vmem:[#allocation13 + $0x8] sm:$0xff] }
 0x51d   : > { %v2723_v44 = vpop.f32.mrb[28].mxu1  ;;  %v2989_v36 = vpack.c.bf16 %v1513_v35, %v1511_v37  ;;  %v3009_v53 = vpack.c.bf16 %v1962_v16, %v1961_v14  ;;  %v4326_v14 = vld [vmem:[%s3920_s1 + $0x40] sm:$0xff]  ;;  %v4331_v16 = vld [vmem:[%s3920_s1 + $0x48] sm:$0xff] }
 0x51e   : > { %v1312_v18 = vpop.f32.mrb[29].mxu1 }
 0x51f   : > { %2777 = vmatprep.mubr.f32.mxu1 %v1312_v18  ;;  %3053 = vmatpush1.bf16.msra.mxu1 %v2969_v23  ;;  %v1518_v23 = vld [vmem:[#allocation10 + $0x98] sm:$0xff]  ;;  %v1979_v18 = vld [vmem:[#allocation13 + $0x90] sm:$0xff] }
 0x520   : > { %2778 = vmatmul.mubr.f32.gmra.mrb[44].mxu1 %v2723_v44  ;;  %3046 = vmatprep.subr.bf16.mxu1 %v2971_v51  ;;  %v2991_v9 = vpack.c.bf16 %v1518_v23, %v1516_v61  ;;  %v2993_v44 = vpack.c.bf16 %v1517_v30, %v1515_v10  ;;  %v1521_v51 = vld [vmem:[#allocation10 + $0xb0] sm:$0xff]  ;;  %v4280_v23 = vld [vmem:[%s3920_s1] sm:$0xff]  ;;  %v4301_v10 = vld [vmem:[%s3920_s1 + $0x18] sm:$0xff] }
 0x521   : > { %v2997_v22 = vpack.c.bf16 %v1521_v51, %v1519_v50  ;;  %v4306_v30 = vld [vmem:[%s3920_s1 + $0x20] sm:$0xff]  ;;  %v1983_v50 = vld [vmem:[#allocation13 + $0xb0] sm:$0xff]  ;;  %v1984_v51 = vld [vmem:[#allocation13 + $0xb8] sm:$0xff] }
 0x523   : > { %v2726_v42 = vpop.f32.mrb[30].mxu1  ;;  %3054 = vmatpush1.bf16.msra.mxu1 %v2973_v28  ;;  %v1524_v28 = vld [vmem:[#allocation10 + $0xc8] sm:$0xff] }
 0x524   : > { %v1322_v6 = vpop.f32.mrb[31].mxu1  ;;  %3008 = vmatprep.subr.bf16.mxu1 %v3007_v57 }
 0x525   : > { %2780 = vmatprep.mubr.f32.mxu1 %v1322_v6 }
 0x526   : > { %2781 = vmatmul.mubr.f32.gmra.mrb[46].mxu1 %v2726_v42  ;;  %v1980_v42 = vld [vmem:[#allocation13 + $0x98] sm:$0xff] }
 0x527   : > { %1675 = vmatprep.mubr.f32.mxu1 %v3574_v0  ;;  %v3011_v56 = vpack.c.bf16 %v1980_v42, %v1979_v18  ;;  %v4346_v18 = vld [vmem:[%s3920_s1 + $0x60] sm:$0xff]  ;;  %v4351_v42 = vld [vmem:[%s3920_s1 + $0x68] sm:$0xff] }
 0x5d9   : > { %v2761_v58 = vpop.f32.mrb[32].mxu1 }
 0x5da   : > { %v1420_v59 = vpop.f32.mrb[33].mxu1  ;;  %v1426_v32 = vadd.f32 %v2761_v58, %v4249_v60 }
 0x5db   : > { %v1421_v63 = vadd.f32 %v4249_v60, %v1420_v59  ;;  %v1523_v59 = vld [vmem:[#allocation10 + $0xc0] sm:$0xff] }
 0x5dd   : > { %1628 = vmatmul.mubr.f32.vlgmr.msra.gmra.mrb[48].mxu0 %v1421_v63 }
 0x5de   : > { %2978 = vmatpush1.bf16.msra.mxu0 %v2977_v62  ;;  %1633 = vmatprep.mubr.f32.mxu0 %v3574_v0  ;;  %v1525_v62 = vld [vmem:[#allocation10 + $0xd0] sm:$0xff] }
 0x5df   : > { %v2764_v25 = vpop.f32.mrb[34].mxu1  ;;  %2980 = vmatprep.subr.bf16.mxu0 %v2979_v1  ;;  %v2999_v1 = vpack.c.bf16 %v1526_v19, %v1524_v28  ;;  %v1968_v28 = vld [vmem:[#allocation13 + $0x38] sm:$0xff]  ;;  %v1985_v19 = vld [vmem:[#allocation13 + $0xc0] sm:$0xff] }
 0x5e0   : > { %v1430_v33 = vpop.f32.mrb[35].mxu1  ;;  %v1436_v48 = vadd.f32 %v2764_v25, %v4249_v60  ;;  %v1965_v25 = vld [vmem:[#allocation13 + $0x20] sm:$0xff] }
 0x5e1   : > { %1634 = vmatmul.mubr.f32.gmra.mrb[50].mxu0 %v1426_v32  ;;  %v1431_v41 = vadd.f32 %v4249_v60, %v1430_v33  ;;  %v3001_v33 = vpack.c.bf16 %v1525_v62, %v1523_v59  ;;  %v1989_v62 = vld [vmem:[#allocation13 + $0xe0] sm:$0xff] }
 0x5e2   : > { %2982 = vmatpush1.bf16.msra.mxu0 %v2981_v26  ;;  %1639 = vmatprep.mubr.f32.mxu0 %v3574_v0  ;;  %v1966_v26 = vld [vmem:[#allocation13 + $0x28] sm:$0xff] }
 0x5e3   : > { %v2767_v39 = vpop.f32.mrb[36].mxu1  ;;  %2984 = vmatprep.subr.bf16.mxu0 %v2983_v27 }
 0x5e4   : > { %v1440_v45 = vpop.f32.mrb[37].mxu1  ;;  %v1446_v31 = vadd.f32 %v2767_v39, %v4249_v60  ;;  %v3003_v39 = vpack.c.bf16 %v1530_v8, %v1528_v40  ;;  %v1973_v40 = vld [vmem:[#allocation13 + $0x60] sm:$0xff] }
 0x5e5   : > { %1640 = vmatmul.mubr.f32.gmra.mrb[52].mxu0 %v1431_v41  ;;  %v1441_v6 = vadd.f32 %v4249_v60, %v1440_v45  ;;  %v3005_v41 = vpack.c.bf16 %v1529_v52, %v1527_v47 }
 0x5e6   : > { %2986 = vmatpush1.bf16.msra.mxu0 %v2985_v29  ;;  %1645 = vmatprep.mubr.f32.mxu0 %v3574_v0  ;;  %v3017_v29 = vpack.c.bf16 %v1966_v26, %v1965_v25  ;;  %v1992_v25 = vld [vmem:[#allocation13 + $0xf8] sm:$0xff] }
 0x5e7   : > { %v4256_v46 = vpop.f32.mrb[38].mxu1  ;;  %2988 = vmatprep.subr.bf16.mxu0 %v2987_v13 }
 0x5e8   : > { %v1450_v2 = vpop.f32.mrb[39].mxu1  ;;  %v1456_v45 = vadd.f32 %v4256_v46, %v4249_v60 }
 0x5e9   : > { %1646 = vmatmul.mubr.f32.gmra.mrb[54].mxu0 %v1436_v48  ;;  %v1451_v27 = vadd.f32 %v4249_v60, %v1450_v2  ;;  %v4294_v2 = vld [vmem:[%s3920_s1 + $0x10] sm:$0xff] }
 0x5ea   : > { %2990 = vmatpush1.bf16.msra.mxu0 %v2989_v36  ;;  %1651 = vmatprep.mubr.f32.mxu0 %v3574_v0  ;;  %v4287_v36 = vld [vmem:[%s3920_s1 + $0x8] sm:$0xff] }
 0x5eb   : > { %v2773_v17 = vpop.f32.mrb[40].mxu1  ;;  %2992 = vmatprep.subr.bf16.mxu0 %v2991_v9 }
 0x5ec   : > { %v1460_v20 = vpop.f32.mrb[41].mxu1  ;;  %v1466_v63 = vadd.f32 %v2773_v17, %v4249_v60  ;;  %v4336_v17 = vld [vmem:[%s3920_s1 + $0x50] sm:$0xff] }
 0x5ed   : > { %v1461_v49 = vadd.f32 %v4249_v60, %v1460_v20  ;;  %1652 = vmatmul.mubr.f32.gmra.mrb[56].mxu0 %v1441_v6  ;;  %v4356_v6 = vld [vmem:[%s3920_s1 + $0x70] sm:$0xff]  ;;  %v4361_v20 = vld [vmem:[%s3920_s1 + $0x78] sm:$0xff] }
 0x5ee   : > { %2994 = vmatpush1.bf16.msra.mxu0 %v2993_v44  ;;  %1657 = vmatprep.mubr.f32.mxu0 %v3574_v0  ;;  %v4341_v44 = vld [vmem:[%s3920_s1 + $0x58] sm:$0xff] }
 0x5ef   : > { %v2776_v57 = vpop.f32.mrb[42].mxu1  ;;  %1676 = vmatmul.mubr.f32.vlgmr.msra.gmra.mrb[48].mxu1 %v1461_v49  ;;  %2996 = vmatprep.subr.bf16.mxu0 %v2995_v54  ;;  %v3019_v49 = vpack.c.bf16 %v1984_v51, %v1983_v50  ;;  %v1967_v54 = vld [vmem:[#allocation13 + $0x30] sm:$0xff] }
 0x5f0   : > { %v1470_v58 = vpop.f32.mrb[43].mxu1  ;;  %1681 = vmatprep.mubr.f32.mxu1 %v3574_v0  ;;  %3010 = vmatpush3.bf16.msra.mxu1 %v3009_v53  ;;  %v1476_v13 = vadd.f32 %v2776_v57, %v4249_v60  ;;  %v3021_v53 = vpack.c.bf16 %v1968_v28, %v1967_v54  ;;  %v1970_v57 = vld [vmem:[#allocation13 + $0x48] sm:$0xff] }
 0x5f1   : > { %1658 = vmatmul.mubr.f32.gmra.mrb[58].mxu0 %v1446_v31  ;;  %3012 = vmatprep.subr.bf16.mxu1 %v3011_v56  ;;  %v1471_v55 = vadd.f32 %v4249_v60, %v1470_v58  ;;  %v1986_v56 = vld [vmem:[#allocation13 + $0xc8] sm:$0xff]  ;;  %v1971_v31 = vld [vmem:[#allocation13 + $0x50] sm:$0xff]  ;;  %v1972_v58 = vld [vmem:[#allocation13 + $0x58] sm:$0xff] }
 0x5f2   : > { %2998 = vmatpush1.bf16.msra.mxu0 %v2997_v22  ;;  %1663 = vmatprep.mubr.f32.mxu0 %v3574_v0  ;;  %v3023_v5 = vpack.c.bf16 %v1986_v56, %v1985_v19  ;;  %v3025_v22 = vpack.c.bf16 %v1970_v57, %v1969_v21  ;;  %v3029_v59 = vpack.c.bf16 %v1972_v58, %v1971_v31 }
 0x5f3   : > { %v2779_v32 = vpop.f32.mrb[44].mxu1  ;;  %1682 = vmatmul.mubr.f32.gmra.mrb[50].mxu1 %v1466_v63  ;;  %3000 = vmatprep.subr.bf16.mxu0 %v2999_v1  ;;  %v1990_v63 = vld [vmem:[#allocation13 + $0xe8] sm:$0xff] }
 0x5f4   : > { %v1480_v38 = vpop.f32.mrb[45].mxu1  ;;  %1687 = vmatprep.mubr.f32.mxu1 %v3574_v0  ;;  %3014 = vmatpush3.bf16.msra.mxu1 %v3013_v24  ;;  %v1486_v46 = vadd.f32 %v2779_v32, %v4249_v60  ;;  %v3031_v1 = vpack.c.bf16 %v1990_v63, %v1989_v62  ;;  %v1974_v24 = vld [vmem:[#allocation13 + $0x68] sm:$0xff]  ;;  %v1975_v32 = vld [vmem:[#allocation13 + $0x70] sm:$0xff] }
 0x5f5   : > { %1664 = vmatmul.mubr.f32.gmra.mrb[60].mxu0 %v1451_v27  ;;  %3016 = vmatprep.subr.bf16.mxu1 %v3015_v12  ;;  %v1481_v61 = vadd.f32 %v4249_v60, %v1480_v38  ;;  %v3033_v8 = vpack.c.bf16 %v1974_v24, %v1973_v40  ;;  %v1991_v12 = vld [vmem:[#allocation13 + $0xf0] sm:$0xff] }
 0x5f6   : > { %3002 = vmatpush1.bf16.msra.mxu0 %v3001_v33  ;;  %1669 = vmatprep.mubr.f32.mxu0 %v3574_v0  ;;  %v3035_v26 = vpack.c.bf16 %v1992_v25, %v1991_v12  ;;  %v1976_v33 = vld [vmem:[#allocation13 + $0x78] sm:$0xff] }
 0x5f7   : > { %1688 = vmatmul.mubr.f32.gmra.mrb[52].mxu1 %v1471_v55  ;;  %3004 = vmatprep.subr.bf16.mxu0 %v3003_v39  ;;  %v3037_v27 = vpack.c.bf16 %v1976_v33, %v1975_v32 }
 0x5f8   : > { %1693 = vmatprep.mubr.f32.mxu1 %v3574_v0  ;;  %3018 = vmatpush3.bf16.msra.mxu1 %v3017_v29 }
 0x5f9   : > { %v2782_v37 = vpop.f32.mrb[46].mxu1  ;;  %1670 = vmatmul.mubr.f32.gmra.mrb[62].mxu0 %v1456_v45  ;;  %3020 = vmatprep.subr.bf16.mxu1 %v3019_v49 }
 0x5fa   : > { %v1490_v35 = vpop.f32.mrb[47].mxu1  ;;  %3006 = vmatpush1.bf16.msra.mxu0 %v3005_v41  ;;  %1788 = vmatprep.mubr.f32.mxu0 %v3574_v0  ;;  %v1496_v9 = vadd.f32 %v2782_v37, %v4249_v60  ;;  %v1885_v41 = vld [vmem:[%s4612_s13] sm:$0x3]  ;;  %s3487_s13 = scalar_lea.vmem %s3486_s12, 4096 }
 0x5fb   : > { %1694 = vmatmul.mubr.f32.gmra.mrb[54].mxu1 %v1476_v13  ;;  %v1491_v48 = vadd.f32 %v4249_v60, %v1490_v35  ;;  %v4316_v60 = vld [vmem:[%s3920_s1 + $0x30] sm:$0xff]  ;;  %v4383_v13 = vrot.slane %v1885_v41, %v562_v4  ;;  %v4389_v35 = vrot.slane %v1885_v41, %v566_v7  ;;  %p3489_p12 = scmp.lt.s32.totalorder %s3487_s13, %s3481_s25 }
 0x5fc   : > { %1699 = vmatprep.mubr.f32.mxu1 %v3574_v0  ;;  %3022 = vmatpush3.bf16.msra.mxu1 %v3021_v53 }
 0x5fd   : > { %1789 = vmatmul.mubr.f32.vlgmr.msra.gmra.mrb[48].mxu0 %v4280_v23  ;;  %3024 = vmatprep.subr.bf16.mxu1 %v3023_v5  ;;  %p3490_p13 = por %p3489_p12, %p3488_p11 }
 0x5fe   : > { %1794 = vmatprep.mubr.f32.mxu0 %v3574_v0 }
 0x5ff   : > { %1700 = vmatmul.mubr.f32.gmra.mrb[56].mxu1 %v1481_v61  ;;  %p3491_p8 = pnand %p3490_p13, %p3484_p1 }
 0x600   : > { %1705 = vmatprep.mubr.f32.mxu1 %v3574_v0  ;;  %3026 = vmatpush3.bf16.msra.mxu1 %v3025_v22 }
 0x601   : > { %1795 = vmatmul.mubr.f32.gmra.mrb[50].mxu0 %v4287_v36 }
 0x602   : > { %1800 = vmatprep.mubr.f32.mxu0 %v3574_v0 }
 0x603   : > { %1706 = vmatmul.mubr.f32.gmra.mrb[58].mxu1 %v1486_v46 }
 0x604   : > { %1711 = vmatprep.mubr.f32.mxu1 %v3574_v0 }
 0x605   : > { %1801 = vmatmul.mubr.f32.gmra.mrb[52].mxu0 %v4294_v2 }
 0x606   : > { %1806 = vmatprep.mubr.f32.mxu0 %v3574_v0 }
 0x607   : > { %1712 = vmatmul.mubr.f32.gmra.mrb[60].mxu1 %v1491_v48 }
 0x608   : > { %1717 = vmatprep.mubr.f32.mxu1 %v3574_v0 }
 0x609   : > { %1807 = vmatmul.mubr.f32.gmra.mrb[54].mxu0 %v4301_v10 }
 0x60a   : > { %1812 = vmatprep.mubr.f32.mxu0 %v3574_v0 }
 0x60b   : > { %1718 = vmatmul.mubr.f32.gmra.mrb[62].mxu1 %v1496_v9 }
 0x60d   : > { %1813 = vmatmul.mubr.f32.gmra.mrb[56].mxu0 %v4306_v30 }
 0x60e   : > { %1818 = vmatprep.mubr.f32.mxu0 %v3574_v0 }
 0x611   : > { %1819 = vmatmul.mubr.f32.gmra.mrb[58].mxu0 %v4311_v34 }
 0x612   : > { %1824 = vmatprep.mubr.f32.mxu0 %v3574_v0 }
 0x615   : > { %1825 = vmatmul.mubr.f32.gmra.mrb[60].mxu0 %v4316_v60 }
 0x616   : > { %1830 = vmatprep.mubr.f32.mxu0 %v3574_v0 }
 0x619   : > { %1831 = vmatmul.mubr.f32.gmra.mrb[62].mxu0 %v4321_v43 }
 0x61a   : > { %1836 = vmatprep.mubr.f32.mxu0 %v3574_v0 }
 0x61d   : > { %1837 = vmatmul.mubr.f32.gmra.mrb[64].mxu0 %v4326_v14 }
 0x61e   : > { %1842 = vmatprep.mubr.f32.mxu0 %v3574_v0 }
 0x621   : > { %1843 = vmatmul.mubr.f32.gmra.mrb[66].mxu0 %v4331_v16 }
 0x622   : > { %1848 = vmatprep.mubr.f32.mxu0 %v3574_v0 }
 0x625   : > { %1849 = vmatmul.mubr.f32.gmra.mrb[68].mxu0 %v4336_v17 }
 0x626   : > { %1854 = vmatprep.mubr.f32.mxu0 %v3574_v0 }
 0x629   : > { %1855 = vmatmul.mubr.f32.gmra.mrb[70].mxu0 %v4341_v44 }
 0x62a   : > { %1860 = vmatprep.mubr.f32.mxu0 %v3574_v0 }
 0x62d   : > { %1861 = vmatmul.mubr.f32.gmra.mrb[72].mxu0 %v4346_v18 }
 0x62e   : > { %1866 = vmatprep.mubr.f32.mxu0 %v3574_v0 }
 0x631   : > { %1867 = vmatmul.mubr.f32.gmra.mrb[74].mxu0 %v4351_v42 }
 0x632   : > { %1872 = vmatprep.mubr.f32.mxu0 %v3574_v0 }
 0x635   : > { %1873 = vmatmul.mubr.f32.gmra.mrb[76].mxu0 %v4356_v6 }
 0x636   : > { %1878 = vmatprep.mubr.f32.mxu0 %v3574_v0  ;;  %v1987_v0 = vld [vmem:[#allocation13 + $0xd0] sm:$0xff] }
 0x637   : > { %v3027_v11 = vpack.c.bf16 %v1988_v15, %v1987_v0 }
 0x639   : > { %1879 = vmatmul.mubr.f32.gmra.mrb[78].mxu0 %v4361_v20  ;;  %3028 = vmatprep.subr.bf16.mxu1 %v3027_v11 }
 0x63a   : > { %3030 = vmatpush3.bf16.msra.mxu1 %v3029_v59 }
 0x63b   : > { %3032 = vmatprep.subr.bf16.mxu1 %v3031_v1 }
 0x63e   : > { %3034 = vmatpush3.bf16.msra.mxu1 %v3033_v8 }
 0x63f   : > { %3036 = vmatprep.subr.bf16.mxu1 %v3035_v26 }
 0x642   : > { %3038 = vmatpush3.bf16.msra.mxu1 %v3037_v27 }
 0x6c2   : > { %v4364_v38 = vpop.f32.mrb[48].mxu1 }
 0x6c3   : > { %v4366_v47 = vpop.f32.mrb[49].mxu1 }
 0x6c6   : > { %v4368_v52 = vpop.f32.mrb[50].mxu1 }
 0x6c7   : > { %v4370_v55 = vpop.f32.mrb[51].mxu1 }
 0x6ca   : > { %v4372_v39 = vpop.f32.mrb[52].mxu1 }
 0x6cb   : > { %v4374_v29 = vpop.f32.mrb[53].mxu1 }
 0x6ce   : > { %v4379_v45 = vpop.f32.mrb[54].mxu1 }
 0x6cf   : > { %v4385_v37 = vpop.f32.mrb[55].mxu1 }
 0x6d0   : > { %v1790_v61 = vpop.f32.mrb[48].mxu0 }
 0x6d1   : > { %v1897_v46 = vadd.f32 %v4383_v13, %v1790_v61  ;;  %v1792_v9 = vpop.f32.mrb[49].mxu0 }
 0x6d2   : > { %v4392_v48 = vpop.f32.mrb[56].mxu1  ;;  %v1898_v50 = vadd.f32 %v4389_v35, %v1792_v9 }
 0x6d3   : > { %v4395_v51 = vpop.f32.mrb[57].mxu1  ;;  %v1929_v4 = vmax.f32 %v1897_v46, 0.0 }
 0x6d4   : > { %v1930_v49 = vmax.f32 %v1898_v50, 0.0  ;;  %v1796_v54 = vpop.f32.mrb[50].mxu0 }
 0x6d5   : > { %v1899_v28 = vadd.f32 %v4383_v13, %v1796_v54  ;;  %v1798_v3 = vpop.f32.mrb[51].mxu0 }
 0x6d6   : > { %v4398_v53 = vpop.f32.mrb[58].mxu1  ;;  %v1900_v7 = vadd.f32 %v4389_v35, %v1798_v3  ;;  %2064 = vmatprep.mubr.f32.mxu1 %v1930_v49 }
 0x6d7   : > { %v4401_v19 = vpop.f32.mrb[59].mxu1  ;;  %2065 = vmatmul.mubr.f32.vlgmr.msra.gmra.mrb[64].mxu1 %v1929_v4  ;;  %v1931_v21 = vmax.f32 %v1899_v28, 0.0 }
 0x6d8   : > { %v1932_v56 = vmax.f32 %v1900_v7, 0.0  ;;  %v1802_v5 = vpop.f32.mrb[52].mxu0 }
 0x6d9   : > { %v1901_v57 = vadd.f32 %v4383_v13, %v1802_v5  ;;  %v1804_v0 = vpop.f32.mrb[53].mxu0 }
 0x6da   : > { %v4404_v22 = vpop.f32.mrb[60].mxu1  ;;  %v1902_v15 = vadd.f32 %v4389_v35, %v1804_v0  ;;  %2069 = vmatprep.mubr.f32.mxu1 %v1932_v56 }
 0x6db   : > { %v4407_v11 = vpop.f32.mrb[61].mxu1  ;;  %2070 = vmatmul.mubr.f32.gmra.mrb[66].mxu1 %v1931_v21  ;;  %v1933_v59 = vmax.f32 %v1901_v57, 0.0 }
 0x6dc   : > { %v1934_v31 = vmax.f32 %v1902_v15, 0.0  ;;  %v1808_v58 = vpop.f32.mrb[54].mxu0 }
 0x6dd   : > { %v1903_v62 = vadd.f32 %v4383_v13, %v1808_v58  ;;  %v1810_v1 = vpop.f32.mrb[55].mxu0 }
 0x6de   : > { %v4410_v63 = vpop.f32.mrb[62].mxu1  ;;  %v1904_v40 = vadd.f32 %v4389_v35, %v1810_v1  ;;  %2074 = vmatprep.mubr.f32.mxu1 %v1934_v31 }
 0x6df   : > { %v4413_v24 = vpop.f32.mrb[63].mxu1  ;;  %2075 = vmatmul.mubr.f32.gmra.mrb[68].mxu1 %v1933_v59  ;;  %v1935_v25 = vmax.f32 %v1903_v62, 0.0 }
 0x6e0   : > { %v1936_v8 = vmax.f32 %v1904_v40, 0.0  ;;  %v1814_v12 = vpop.f32.mrb[56].mxu0 }
 0x6e1   : > { %v1905_v26 = vadd.f32 %v4383_v13, %v1814_v12  ;;  %v1816_v32 = vpop.f32.mrb[57].mxu0 }
 0x6e2   : > { %v1906_v33 = vadd.f32 %v4389_v35, %v1816_v32  ;;  %2079 = vmatprep.mubr.f32.mxu1 %v1936_v8 }
 0x6e3   : > { %2080 = vmatmul.mubr.f32.gmra.mrb[70].mxu1 %v1935_v25  ;;  %v1937_v61 = vmax.f32 %v1905_v26, 0.0 }
 0x6e4   : > { %v1938_v27 = vmax.f32 %v1906_v33, 0.0  ;;  %v1820_v41 = vpop.f32.mrb[58].mxu0 }
 0x6e5   : > { %v1907_v46 = vadd.f32 %v4383_v13, %v1820_v41  ;;  %v1822_v9 = vpop.f32.mrb[59].mxu0 }
 0x6e6   : > { %v1908_v50 = vadd.f32 %v4389_v35, %v1822_v9  ;;  %2084 = vmatprep.mubr.f32.mxu1 %v1938_v27 }
 0x6e7   : > { %2085 = vmatmul.mubr.f32.gmra.mrb[72].mxu1 %v1937_v61  ;;  %v1939_v4 = vmax.f32 %v1907_v46, 0.0 }
 0x6e8   : > { %v1940_v49 = vmax.f32 %v1908_v50, 0.0  ;;  %v1826_v54 = vpop.f32.mrb[60].mxu0 }
 0x6e9   : > { %v1909_v28 = vadd.f32 %v4383_v13, %v1826_v54  ;;  %v1828_v3 = vpop.f32.mrb[61].mxu0 }
 0x6ea   : > { %v1910_v7 = vadd.f32 %v4389_v35, %v1828_v3  ;;  %2089 = vmatprep.mubr.f32.mxu1 %v1940_v49 }
 0x6eb   : > { %2090 = vmatmul.mubr.f32.gmra.mrb[74].mxu1 %v1939_v4  ;;  %v1941_v21 = vmax.f32 %v1909_v28, 0.0 }
 0x6ec   : > { %v1942_v56 = vmax.f32 %v1910_v7, 0.0  ;;  %v1832_v5 = vpop.f32.mrb[62].mxu0 }
 0x6ed   : > { %v1911_v57 = vadd.f32 %v4383_v13, %v1832_v5  ;;  %v1834_v0 = vpop.f32.mrb[63].mxu0 }
 0x6ee   : > { %v1912_v15 = vadd.f32 %v4389_v35, %v1834_v0  ;;  %2094 = vmatprep.mubr.f32.mxu1 %v1942_v56 }
 0x6ef   : > { %2095 = vmatmul.mubr.f32.gmra.mrb[76].mxu1 %v1941_v21  ;;  %v1943_v59 = vmax.f32 %v1911_v57, 0.0 }
 0x6f0   : > { %v1944_v31 = vmax.f32 %v1912_v15, 0.0  ;;  %v1838_v58 = vpop.f32.mrb[64].mxu0 }
 0x6f1   : > { %v1839_v62 = vadd.f32 %v1838_v58, %v4364_v38  ;;  %v1840_v1 = vpop.f32.mrb[65].mxu0 }
 0x6f2   : > { %v1841_v40 = vadd.f32 %v1840_v1, %v4366_v47  ;;  %2099 = vmatprep.mubr.f32.mxu1 %v1944_v31 }
 0x6f3   : > { %v1913_v8 = vadd.f32 %v4383_v13, %v1839_v62  ;;  %2100 = vmatmul.mubr.f32.gmra.mrb[78].mxu1 %v1943_v59 }
 0x6f4   : > { %v1914_v12 = vadd.f32 %v4389_v35, %v1841_v40  ;;  %v1844_v25 = vpop.f32.mrb[66].mxu0 }
 0x6f5   : > { %v1845_v26 = vadd.f32 %v1844_v25, %v4368_v52  ;;  %v1846_v32 = vpop.f32.mrb[67].mxu0  ;;  %v1945_v41 = vmax.f32 %v1913_v8, 0.0 }
 0x6f6   : > { %v1946_v33 = vmax.f32 %v1914_v12, 0.0  ;;  %v1847_v27 = vadd.f32 %v1846_v32, %v4370_v55 }
 0x6f7   : > { %v1915_v61 = vadd.f32 %v4383_v13, %v1845_v26 }
 0x6f8   : > { %v1916_v38 = vadd.f32 %v4389_v35, %v1847_v27  ;;  %v1850_v46 = vpop.f32.mrb[68].mxu0  ;;  %2104 = vmatprep.mubr.f32.mxu1 %v1946_v33 }
 0x6f9   : > { %v1851_v47 = vadd.f32 %v1850_v46, %v4372_v39  ;;  %v1852_v9 = vpop.f32.mrb[69].mxu0  ;;  %2105 = vmatmul.mubr.f32.gmra.mrb[80].mxu1 %v1945_v41  ;;  %v1947_v54 = vmax.f32 %v1915_v61, 0.0 }
 0x6fa   : > { %v1948_v50 = vmax.f32 %v1916_v38, 0.0  ;;  %v1853_v49 = vadd.f32 %v1852_v9, %v4374_v29 }
 0x6fb   : > { %v1917_v52 = vadd.f32 %v4383_v13, %v1851_v47 }
 0x6fc   : > { %v1918_v4 = vadd.f32 %v4389_v35, %v1853_v49  ;;  %v1856_v55 = vpop.f32.mrb[70].mxu0  ;;  %2109 = vmatprep.mubr.f32.mxu1 %v1948_v50 }
 0x6fd   : > { %v1857_v28 = vadd.f32 %v1856_v55, %v4379_v45  ;;  %v1858_v3 = vpop.f32.mrb[71].mxu0  ;;  %2110 = vmatmul.mubr.f32.gmra.mrb[82].mxu1 %v1947_v54  ;;  %v1949_v39 = vmax.f32 %v1917_v52, 0.0 }
 0x6fe   : > { %v1950_v7 = vmax.f32 %v1918_v4, 0.0  ;;  %v1859_v56 = vadd.f32 %v1858_v3, %v4385_v37 }
 0x6ff   : > { %v1919_v5 = vadd.f32 %v4383_v13, %v1857_v28 }
 0x700   : > { %v1920_v21 = vadd.f32 %v4389_v35, %v1859_v56  ;;  %v1862_v29 = vpop.f32.mrb[72].mxu0  ;;  %2114 = vmatprep.mubr.f32.mxu1 %v1950_v7 }
 0x701   : > { %v1863_v57 = vadd.f32 %v1862_v29, %v4392_v48  ;;  %v1864_v0 = vpop.f32.mrb[73].mxu0  ;;  %2115 = vmatmul.mubr.f32.gmra.mrb[84].mxu1 %v1949_v39  ;;  %v1951_v45 = vmax.f32 %v1919_v5, 0.0 }
 0x702   : > { %v1952_v15 = vmax.f32 %v1920_v21, 0.0  ;;  %v1865_v31 = vadd.f32 %v1864_v0, %v4395_v51 }
 0x703   : > { %v1921_v58 = vadd.f32 %v4383_v13, %v1863_v57 }
 0x704   : > { %v1922_v59 = vadd.f32 %v4389_v35, %v1865_v31  ;;  %v1868_v37 = vpop.f32.mrb[74].mxu0  ;;  %2119 = vmatprep.mubr.f32.mxu1 %v1952_v15 }
 0x705   : > { %v1869_v62 = vadd.f32 %v1868_v37, %v4398_v53  ;;  %v1870_v1 = vpop.f32.mrb[75].mxu0  ;;  %2120 = vmatmul.mubr.f32.gmra.mrb[86].mxu1 %v1951_v45  ;;  %v1953_v48 = vmax.f32 %v1921_v58, 0.0 }
 0x706   : > { %v1954_v40 = vmax.f32 %v1922_v59, 0.0  ;;  %v1871_v8 = vadd.f32 %v1870_v1, %v4401_v19 }
 0x707   : > { %v1923_v12 = vadd.f32 %v4383_v13, %v1869_v62 }
 0x708   : > { %v1924_v25 = vadd.f32 %v4389_v35, %v1871_v8  ;;  %v1874_v51 = vpop.f32.mrb[76].mxu0  ;;  %2124 = vmatprep.mubr.f32.mxu1 %v1954_v40 }
 0x709   : > { %v1875_v26 = vadd.f32 %v1874_v51, %v4404_v22  ;;  %v1876_v32 = vpop.f32.mrb[77].mxu0  ;;  %2125 = vmatmul.mubr.f32.gmra.mrb[88].mxu1 %v1953_v48  ;;  %v1955_v53 = vmax.f32 %v1923_v12, 0.0 }
 0x70a   : > { %v1956_v33 = vmax.f32 %v1924_v25, 0.0  ;;  %v1877_v27 = vadd.f32 %v1876_v32, %v4407_v11 }
 0x70b   : > { %v1925_v41 = vadd.f32 %v4383_v13, %v1875_v26 }
 0x70c   : > { %v1926_v61 = vadd.f32 %v4389_v35, %v1877_v27  ;;  %v1880_v19 = vpop.f32.mrb[78].mxu0  ;;  %2129 = vmatprep.mubr.f32.mxu1 %v1956_v33 }
 0x70d   : > { %v1881_v38 = vadd.f32 %v1880_v19, %v4410_v63  ;;  %v1882_v46 = vpop.f32.mrb[79].mxu0  ;;  %2130 = vmatmul.mubr.f32.gmra.mrb[90].mxu1 %v1955_v53  ;;  %v1957_v22 = vmax.f32 %v1925_v41, 0.0  ;;  %v4458_v63 = vld [vmem:[%s4613_s15] ss:$0 sm:$0xff] }
 0x70e   : > { %v1958_v47 = vmax.f32 %v1926_v61, 0.0  ;;  %v1883_v9 = vadd.f32 %v1882_v46, %v4413_v24 }
 0x70f   : > { %v1927_v50 = vadd.f32 %v4383_v13, %v1881_v38 }
 0x710   : > { %v1928_v49 = vadd.f32 %v4389_v35, %v1883_v9  ;;  %2134 = vmatprep.mubr.f32.mxu1 %v1958_v47 }
 0x711   : > { %2135 = vmatmul.mubr.f32.gmra.mrb[92].mxu1 %v1957_v22  ;;  %v1959_v54 = vmax.f32 %v1927_v50, 0.0 }
 0x712   : > { %v1960_v11 = vmax.f32 %v1928_v49, 0.0 }
 0x714   : > { %2139 = vmatprep.mubr.f32.mxu1 %v1960_v11 }
 0x715   : > { %2140 = vmatmul.mubr.f32.gmra.mrb[94].mxu1 %v1959_v54 }
 0x7aa   : > { %v2511_v52 = vpop.f32.mrb[64].mxu1 }
 0x7ab   : > { %v2512_v4 = vpop.f32.mrb[65].mxu1 }
 0x7ac   : > { %v2513_v24 = vadd.f32 %v2512_v4, %v2511_v52 }
 0x7ae   : > { %v2067_v55 = vadd.f32 %v2513_v24, %v4458_v63  ;;  %v2514_v13 = vpop.f32.mrb[66].mxu1 }
 0x7af   : > { %v2515_v28 = vpop.f32.mrb[67].mxu1 }
 0x7b0   : > { %v2145_v35 = vadd.f32 %v4280_v23, %v2067_v55  ;;  %v2516_v3 = vadd.f32 %v2515_v28, %v2514_v13 }
 0x7b2   : > { %2161 = vst [vmem:[%s4464_s11] sm:$0xff] %v2145_v35  ;;  %v2072_v7 = vadd.f32 %v2516_v3, %v4458_v63  ;;  %v2517_v56 = vpop.f32.mrb[68].mxu1 }
 0x7b3   : > { %v2518_v39 = vpop.f32.mrb[69].mxu1 }
 0x7b4   : > { %v2146_v5 = vadd.f32 %v4287_v36, %v2072_v7  ;;  %v2519_v21 = vadd.f32 %v2518_v39, %v2517_v56 }
 0x7b6   : > { %2162 = vst [vmem:[%s4464_s11 + $0x8] sm:$0xff] %v2146_v5  ;;  %v2077_v29 = vadd.f32 %v2519_v21, %v4458_v63  ;;  %v2520_v23 = vpop.f32.mrb[70].mxu1 }
 0x7b7   : > { %v2521_v57 = vpop.f32.mrb[71].mxu1 }
 0x7b8   : > { %v2147_v0 = vadd.f32 %v4294_v2, %v2077_v29  ;;  %v2522_v15 = vadd.f32 %v2521_v57, %v2520_v23 }
 0x7ba   : > { %2163 = vst [vmem:[%s4464_s11 + $0x10] sm:$0xff] %v2147_v0  ;;  %v2082_v31 = vadd.f32 %v2522_v15, %v4458_v63  ;;  %v2523_v45 = vpop.f32.mrb[72].mxu1 }
 0x7bb   : > { %v2524_v58 = vpop.f32.mrb[73].mxu1 }
 0x7bc   : > { %v2148_v59 = vadd.f32 %v4301_v10, %v2082_v31  ;;  %v2525_v37 = vadd.f32 %v2524_v58, %v2523_v45 }
 0x7be   : > { %2164 = vst [vmem:[%s4464_s11 + $0x18] sm:$0xff] %v2148_v59  ;;  %v2087_v36 = vadd.f32 %v2525_v37, %v4458_v63  ;;  %v2526_v62 = vpop.f32.mrb[74].mxu1 }
 0x7bf   : > { %v2527_v1 = vpop.f32.mrb[75].mxu1 }
 0x7c0   : > { %v2149_v40 = vadd.f32 %v4306_v30, %v2087_v36  ;;  %v2528_v8 = vadd.f32 %v2527_v1, %v2526_v62 }
 0x7c2   : > { %2165 = vst [vmem:[%s4464_s11 + $0x20] sm:$0xff] %v2149_v40  ;;  %v2092_v2 = vadd.f32 %v2528_v8, %v4458_v63  ;;  %v2529_v48 = vpop.f32.mrb[76].mxu1 }
 0x7c3   : > { %v2530_v12 = vpop.f32.mrb[77].mxu1 }
 0x7c4   : > { %v2150_v25 = vadd.f32 %v4311_v34, %v2092_v2  ;;  %v2531_v51 = vadd.f32 %v2530_v12, %v2529_v48 }
 0x7c6   : > { %2166 = vst [vmem:[%s4464_s11 + $0x28] sm:$0xff] %v2150_v25  ;;  %v2097_v10 = vadd.f32 %v2531_v51, %v4458_v63  ;;  %v2532_v26 = vpop.f32.mrb[78].mxu1 }
 0x7c7   : > { %v2533_v32 = vpop.f32.mrb[79].mxu1 }
 0x7c8   : > { %v2151_v33 = vadd.f32 %v4316_v60, %v2097_v10  ;;  %v2534_v27 = vadd.f32 %v2533_v32, %v2532_v26 }
 0x7ca   : > { %2167 = vst [vmem:[%s4464_s11 + $0x30] sm:$0xff] %v2151_v33  ;;  %v2102_v30 = vadd.f32 %v2534_v27, %v4458_v63 }
 0x7cc   : > { %v2152_v53 = vadd.f32 %v4321_v43, %v2102_v30  ;;  %v2535_v41 = vpop.f32.mrb[80].mxu1 }
 0x7cd   : > { %v2536_v61 = vpop.f32.mrb[81].mxu1 }
 0x7ce   : > { %2168 = vst [vmem:[%s4464_s11 + $0x38] sm:$0xff] %v2152_v53  ;;  %v2537_v34 = vadd.f32 %v2536_v61, %v2535_v41 }
 0x7d0   : > { %v2107_v19 = vadd.f32 %v2537_v34, %v4458_v63  ;;  %v2538_v38 = vpop.f32.mrb[82].mxu1 }
 0x7d1   : > { %v2539_v46 = vpop.f32.mrb[83].mxu1 }
 0x7d2   : > { %v2153_v47 = vadd.f32 %v4326_v14, %v2107_v19  ;;  %v2540_v9 = vadd.f32 %v2539_v46, %v2538_v38 }
 0x7d4   : > { %2169 = vst [vmem:[%s4464_s11 + $0x40] sm:$0xff] %v2153_v47  ;;  %v2112_v60 = vadd.f32 %v2540_v9, %v4458_v63  ;;  %v2541_v22 = vpop.f32.mrb[84].mxu1 }
 0x7d5   : > { %v2542_v50 = vpop.f32.mrb[85].mxu1 }
 0x7d6   : > { %v2154_v43 = vadd.f32 %v4331_v16, %v2112_v60  ;;  %v2543_v49 = vadd.f32 %v2542_v50, %v2541_v22 }
 0x7d8   : > { %2170 = vst [vmem:[%s4464_s11 + $0x48] sm:$0xff] %v2154_v43  ;;  %v2117_v11 = vadd.f32 %v2543_v49, %v4458_v63  ;;  %v2544_v54 = vpop.f32.mrb[86].mxu1 }
 0x7d9   : > { %v2545_v52 = vpop.f32.mrb[87].mxu1 }
 0x7da   : > { %v2155_v4 = vadd.f32 %v4336_v17, %v2117_v11  ;;  %v2546_v24 = vadd.f32 %v2545_v52, %v2544_v54 }
 0x7dc   : > { %2171 = vst [vmem:[%s4464_s11 + $0x50] sm:$0xff] %v2155_v4  ;;  %v2122_v14 = vadd.f32 %v2546_v24, %v4458_v63  ;;  %v2547_v55 = vpop.f32.mrb[88].mxu1 }
 0x7dd   : > { %v2548_v13 = vpop.f32.mrb[89].mxu1 }
 0x7de   : > { %v2156_v28 = vadd.f32 %v4341_v44, %v2122_v14  ;;  %v2549_v35 = vadd.f32 %v2548_v13, %v2547_v55 }
 0x7e0   : > { %2172 = vst [vmem:[%s4464_s11 + $0x58] sm:$0xff] %v2156_v28  ;;  %v2127_v16 = vadd.f32 %v2549_v35, %v4458_v63  ;;  %v2550_v3 = vpop.f32.mrb[90].mxu1 }
 0x7e1   : > { %v2551_v7 = vpop.f32.mrb[91].mxu1 }
 0x7e2   : > { %v2157_v56 = vadd.f32 %v4346_v18, %v2127_v16  ;;  %v2552_v17 = vadd.f32 %v2551_v7, %v2550_v3 }
 0x7e4   : > { %2173 = vst [vmem:[%s4464_s11 + $0x60] sm:$0xff] %v2157_v56  ;;  %v2132_v39 = vadd.f32 %v2552_v17, %v4458_v63  ;;  %v2553_v5 = vpop.f32.mrb[92].mxu1 }
 0x7e5   : > { %v2554_v21 = vpop.f32.mrb[93].mxu1 }
 0x7e6   : > { %v2158_v44 = vadd.f32 %v4351_v42, %v2132_v39  ;;  %v2555_v29 = vadd.f32 %v2554_v21, %v2553_v5 }
 0x7e8   : > { %2174 = vst [vmem:[%s4464_s11 + $0x68] sm:$0xff] %v2158_v44  ;;  %v2137_v23 = vadd.f32 %v2555_v29, %v4458_v63  ;;  %v2556_v57 = vpop.f32.mrb[94].mxu1 }
 0x7e9   : > { %v2557_v0 = vpop.f32.mrb[95].mxu1 }
 0x7ea   : > { %v2159_v18 = vadd.f32 %v4356_v6, %v2137_v23  ;;  %v2558_v15 = vadd.f32 %v2557_v0, %v2556_v57 }
 0x7ec   : > { %2175 = vst [vmem:[%s4464_s11 + $0x70] sm:$0xff] %v2159_v18  ;;  %v2142_v31 = vadd.f32 %v2558_v15, %v4458_v63 }
 0x7ee   : > { %v2160_v42 = vadd.f32 %v4361_v20, %v2142_v31 }
 0x7f0   : > { %2176 = vst [vmem:[%s4464_s11 + $0x78] sm:$0xff] %v2160_v42 }
 0x7f1   : > { %3494 = shalt.err (!%p3491_p8)
}
 0x7f2   : > { %s3495_s22 = scalar_lea.hbm %s4515_s10, 2048  ;;  %s3499_s11 = scalar_lea.hbm %s4614_s24, 4096 }
 0x7f3   : > { %p3496_p7 = scmp.ne.s32.totalorder %s4515_s10, %s3495_s22  ;;  %p3500_p3 = scmp.lt.u32.totalorder %s4515_s10, %s4614_s24 }
 0x7f4   : > { %p3501_p0 = scmp.lt.u32.totalorder %s3499_s11, %s3495_s22  ;;  %p3503_p6 = scmp.lt.u32.totalorder %s3495_s22, %s4515_s10 }
 0x7f5   : > { %p3497_p9 = pnand %p3496_p7, %p4615_p5 }
 0x7f6   : > { %p3502_p2 = por %p3501_p0, %p3500_p3 }
 0x7f7   : > { %p3498_p4 = pneg %p3497_p9 }
 0x7f8   : > { %p3504_p10 = por %p3503_p6, %p3502_p2 }
 0x7fa   : > { %p3505_p1 = pnand %p3504_p10, %p3498_p4 }
 0x7fc   : > { %3508 = shalt.err (!%p3505_p1)
}
 0x7fd   : > { %s3576_s2 = smov 128   ;;  %s3577_s25 = smov 8  }
 0x7fe   : > { %3113 = dma.vmem_to_hbm [thread:$0]  (%p4615_p5), %s4517_s27, 2048, %s4515_s10, %s2178_s26, %s3576_s2, %s3576_s2, %s3577_s25  }
 0x7ff PF: > { %s2206_s23 = sand.u32 1, %s3547_s17   ;;  %p4616_p11 = scmp.ne.s32.totalorder %s4603_s30, 0 }
 0x800   : > { %p4617_p12 = scmp.ge.s32.totalorder %s3559_s20, 2  ;;  %s2207_s12 = scalar_lea.sflag [#allocation4], %s2206_s23 }
 0x802   : > { %p3139_p13 = pnand %p4617_p12, %p4616_p11 }
 0x804   : > { %3542 = dma.done.wait (!%p3139_p13), %s2207_s12, 2048  }
 0x805   : > { %3544 = vsyncadd (!%p3139_p13), %s2207_s12, 4294965248  ;;  %p27_p8 = scmp.ge.s32.totalorder %s3832_s16, 4   ;;  %s4618_s17 = smov %s3551_s18 }
 0x806   : > { %s4619_s18 = smov %s3555_s19  ;;  %s4620_s19 = smov %s3843_s21 }
 0x807   : > { %s4621_s20 = smov %s3832_s16  ;;  %29 = sbr.rel (!%p27_p8) target bundleno = 14 (0xe), region = 133 }
 0x80e   :  { %2212 = vsyncpa [#allocation3], 1 }
 0x80f   :  { %2214 = vsyncpa [#allocation3 + $0x1], 1 }
 0x810   :  { %2215 = vsyncpa [#allocation6], 1 }
 0x811   :  { %2216 = vsyncpa [#allocation9], 1 }
 0x812   :  { %2217 = vsyncpa [#allocation12], 1 }
 0x813   :  { %2218 = vsyncpa [#allocation4], 1 }
 0x814   :  { %2220 = vsyncpa [#allocation4 + $0x1], 1 }

// kernel: tpu_custom_call.1
= control target key start
LH: loop header
LB: loop body
LE: loop exit
PB: predicated region body
PF: predicated region fallthrough
CT: control target
= control target key end

     0   :  { %s4563_s0 = inlined_call_operand.hbm [shape: f32[256,128], index: 0, kind: input, shape index: {}]   ;;  %s4564_s1 = inlined_call_operand.hbm [shape: f32[128,128], index: 1, kind: input, shape index: {}]   ;;  %s4565_s2 = inlined_call_operand.hbm [shape: f32[128,384], index: 2, kind: input, shape index: {}]   ;;  %s4566_s3 = inlined_call_operand.vmem [shape: f32[1,384], index: 3, kind: input, shape index: {}]   ;;  %s4567_s4 = inlined_call_operand.hbm [shape: f32[128,128], index: 4, kind: input, shape index: {}]   ;;  %s4568_s5 = inlined_call_operand.vmem [shape: f32[1,128], index: 5, kind: input, shape index: {}]   ;;  %s4569_s6 = inlined_call_operand.hbm [shape: f32[128,256], index: 6, kind: input, shape index: {}]   ;;  %s4570_s7 = inlined_call_operand.hbm [shape: f32[128,256], index: 7, kind: input, shape index: {}]   ;;  %s4571_s8 = inlined_call_operand.vmem [shape: f32[1,256], index: 8, kind: input, shape index: {}]   ;;  %s4572_s9 = inlined_call_operand.hbm [shape: f32[256,128], index: 9, kind: input, shape index: {}]   ;;  %s4573_s10 = inlined_call_operand.vmem [shape: f32[1,128], index: 10, kind: input, shape index: {}]   ;;  %s4574_s11 = inlined_call_operand.hbm [shape: f32[256,128], index: 11, kind: output, shape index: {}]  }
   0x1   :  { %4585 = sst [smem:[#allocation20_spill]] %s4564_s1 }
   0x2   :  { %4586 = sst [smem:[#allocation21_spill]] %s4565_s2 }
   0x3   :  { %4587 = sst [smem:[#allocation22_spill]] %s4571_s8 }
   0x4   :  { %4588 = sst [smem:[#allocation23_spill]] %s4573_s10 }
   0x5   :  { %4589 = sst [smem:[#allocation24_spill]] %s4574_s11 }
   0x6   :  { %16 = vsyncpa [#allocation3], 0 }
   0x7   :  { %18 = vsyncpa [#allocation3 + $0x1], 0 }
   0x8   :  { %19 = vsyncpa [#allocation6], 0 }
   0x9   :  { %20 = vsyncpa [#allocation9], 0 }
   0xa   :  { %21 = vsyncpa [#allocation12], 0 }
   0xb   :  { %22 = vsyncpa [#allocation4], 0 }
   0xc   :  { %24 = vsyncpa [#allocation4 + $0x1], 0  ;;  %s3638_s17 = smov 0   ;;  %s3640_s18 = smov 0  }
   0xd   :  { %s3642_s19 = smov 0   ;;  %s3644_s20 = smov 0  }
   0xe LB: > { %s3561_s21 = smov [#allocation5]   ;;  %s3659_s23 = sadd.s32 4294967295, %s3559_s20   ;;  %s3559_s20 = sphi %s3644_s20, %s4621_s20   ;;  %s3555_s19 = sphi %s3642_s19, %s4620_s19   ;;  %s3551_s18 = sphi %s3640_s18, %s4619_s18   ;;  %s3547_s17 = sphi %s3638_s17, %s4618_s17  }
   0xf   : > { %s309_s22 = sshll.u32 %s3561_s21, 4  ;;  %p2322_p0 = scmp.ge.s32.totalorder %s3559_s20, 1  ;;  %s3664_s22 = int_to_ptr.vmem [resolvable:$true] %s309_s22 }
  0x10   : > { %p4576_p1 = scmp.eq.s32.totalorder %s3659_s23, 0  ;;  %p297_p2 = scmp.lt.s32.totalorder %s3559_s20, 3 }
  0x11   : > { %s3562_s25 = smov [#allocation8]   ;;  %s3563_s28 = smov [#allocation11]  }
  0x12   : > { %p3666_p3 = pnand %p2322_p0, %p297_p2  ;;  %s338_s26 = sshll.u32 %s3562_s25, 4  ;;  %s3679_s26 = int_to_ptr.vmem [resolvable:$true] %s338_s26 }
  0x13   : > { %s3681_s29 = sshll.u32 %s3563_s28, 4  ;;  %s4592_s1 = sld [smem:[#allocation20_spill]]  ;;  %s368_s29 = int_to_ptr.vmem [resolvable:$true] %s3681_s29 }
  0x14   : > { %s4590_s24 = scalar_select %p3666_p3, 1, 0 }
  0x15   : > { %p3115_p5 = pneg %p3666_p3 }
  0x17   : > { %p3675_p6 = pnand %p3115_p5, %p4576_p1 }
  0x19   : > { %s3283_s13 = scalar_lea.hbm %s4592_s1, 2048  ;;  %p3691_p8 = pneg %p3675_p6 }
  0x1a   : > { %p3284_p7 = scmp.ne.s32.totalorder %s4592_s1, %s3283_s13  ;;  %p3290_p11 = scmp.lt.u32.totalorder %s3283_s13, %s4592_s1 }
  0x1c   : > { %p3286_p9 = pnand %p3691_p8, %p3284_p7 }
  0x1e   : > { %p3287_p10 = pneg %p3286_p9 }
  0x20   : > { %p3292_p12 = pnand %p3290_p11, %p3287_p10 }
  0x22   : > { %3295 = shalt.err (!%p3292_p12)
}
  0x23   : > { %s3296_s28 = scalar_lea.vmem %s3664_s22, 2048  ;;  %p3304_p5 = scmp.lt.s32.totalorder %s3664_s22, %s3664_s22 }
  0x24   : > { %p3297_p13 = scmp.ne.s32.totalorder %s3664_s22, %s3296_s28  ;;  %p3305_p4 = scmp.lt.s32.totalorder %s3296_s28, %s3296_s28 }
  0x26   : > { %p3299_p0 = pnand %p3297_p13, %p3691_p8  ;;  %p3306_p7 = por %p3305_p4, %p3304_p5 }
  0x28   : > { %p3300_p2 = pneg %p3299_p0 }
  0x2a   : > { %p3307_p9 = pnand %p3306_p7, %p3300_p2 }
  0x2c   : > { %3310 = shalt.err (!%p3307_p9)
}
  0x2d   : > { %s4578_s30 = smov 128   ;;  %s4580_s12 = smov 8  }
  0x2e   : > { %3118 = dma.hbm_to_vmem [thread:$0]  (!%p3675_p6), %s4592_s1, 2048, %s3664_s22, [#allocation6], %s4578_s30, %s4578_s30, %s4580_s12  }
  0x2f   : > { %s3311_s25 = scalar_lea.hbm %s4567_s4, 2048 }
  0x30   : > { %p3312_p4 = scmp.ne.s32.totalorder %s4567_s4, %s3311_s25  ;;  %p3318_p12 = scmp.lt.u32.totalorder %s3311_s25, %s4567_s4 }
  0x32   : > { %p3314_p10 = pnand %p3312_p4, %p3691_p8 }
  0x34   : > { %p3315_p11 = pneg %p3314_p10 }
  0x36   : > { %p3320_p13 = pnand %p3318_p12, %p3315_p11 }
  0x38   : > { %3323 = shalt.err (!%p3320_p13)
}
  0x39   : > { %s3324_s22 = scalar_lea.vmem %s3679_s26, 2048  ;;  %p3332_p7 = scmp.lt.s32.totalorder %s3679_s26, %s3679_s26 }
  0x3a   : > { %p3325_p0 = scmp.ne.s32.totalorder %s3679_s26, %s3324_s22  ;;  %p3333_p9 = scmp.lt.s32.totalorder %s3324_s22, %s3324_s22 }
  0x3c   : > { %p3327_p2 = pnand %p3325_p0, %p3691_p8  ;;  %p3334_p4 = por %p3333_p9, %p3332_p7 }
  0x3e   : > { %p3328_p5 = pneg %p3327_p2 }
  0x40   : > { %p3335_p10 = pnand %p3334_p4, %p3328_p5 }
  0x42   : > { %3338 = shalt.err (!%p3335_p10)
}
  0x43   : > { %3124 = dma.hbm_to_vmem [thread:$0]  (!%p3675_p6), %s4567_s4, 2048, %s3679_s26, [#allocation9], %s4578_s30, %s4578_s30, %s4580_s12  }
  0x44   : > { %s3339_s14 = scalar_lea.hbm %s4570_s7, 4096 }
  0x45   : > { %p3340_p11 = scmp.ne.s32.totalorder %s4570_s7, %s3339_s14  ;;  %p3346_p0 = scmp.lt.u32.totalorder %s3339_s14, %s4570_s7 }
  0x47   : > { %p3342_p12 = pnand %p3340_p11, %p3691_p8 }
  0x49   : > { %p3343_p13 = pneg %p3342_p12 }
  0x4b   : > { %p3348_p2 = pnand %p3346_p0, %p3343_p13 }
  0x4d   : > { %3351 = shalt.err (!%p3348_p2)
}
  0x4e   : > { %s3352_s22 = scalar_lea.vmem %s368_s29, 4096  ;;  %p3360_p4 = scmp.lt.s32.totalorder %s368_s29, %s368_s29 }
  0x4f   : > { %p3353_p5 = scmp.ne.s32.totalorder %s368_s29, %s3352_s22  ;;  %p3361_p10 = scmp.lt.s32.totalorder %s3352_s22, %s3352_s22 }
  0x51   : > { %p3355_p7 = pnand %p3353_p5, %p3691_p8  ;;  %p3362_p1 = por %p3361_p10, %p3360_p4 }
  0x53   : > { %p3356_p9 = pneg %p3355_p7 }
  0x55   : > { %p3363_p3 = pnand %p3362_p1, %p3356_p9 }
  0x57   : > { %3366 = shalt.err (!%p3363_p3)
}
  0x58   : > { %s4582_s26 = smov 256   ;;  %s4583_s8 = smov 16  }
  0x59   : > { %3130 = dma.hbm_to_vmem [thread:$0]  (!%p3675_p6), %s4570_s7, 4096, %s368_s29, [#allocation12], %s4582_s26, %s4582_s26, %s4583_s8  }
  0x5a   : > { %s3568_s13 = smov [#allocation7]   ;;  %s4594_s2 = sld [smem:[#allocation21_spill]] }
  0x5b   : > { %s322_s14 = sshll.u32 %s3568_s13, 4  ;;  %s323_s14 = int_to_ptr.vmem [resolvable:$true] %s322_s14 }
  0x60   : > { %s3367_s25 = scalar_lea.hbm %s4594_s2, 6144 }
  0x61   : > { %p3368_p1 = scmp.ne.s32.totalorder %s4594_s2, %s3367_s25  ;;  %p3374_p12 = scmp.lt.u32.totalorder %s3367_s25, %s4594_s2 }
  0x63   : > { %p3370_p3 = pnand %p3368_p1, %p3691_p8 }
  0x65   : > { %p3371_p11 = pneg %p3370_p3 }
  0x67   : > { %p3376_p13 = pnand %p3374_p12, %p3371_p11 }
  0x69   : > { %3379 = shalt.err (!%p3376_p13)
}
  0x6a   : > { %s3380_s29 = scalar_lea.vmem %s323_s14, 6144  ;;  %p3388_p7 = scmp.lt.s32.totalorder %s323_s14, %s323_s14 }
  0x6b   : > { %p3381_p0 = scmp.ne.s32.totalorder %s323_s14, %s3380_s29  ;;  %p3389_p9 = scmp.lt.s32.totalorder %s3380_s29, %s3380_s29 }
  0x6d   : > { %p3383_p2 = pnand %p3381_p0, %p3691_p8  ;;  %p3390_p4 = por %p3389_p9, %p3388_p7 }
  0x6f   : > { %p3384_p5 = pneg %p3383_p2 }
  0x71   : > { %p3391_p10 = pnand %p3390_p4, %p3384_p5 }
  0x73   : > { %3394 = shalt.err (!%p3391_p10)
}
  0x74   : > { %s3569_s10 = smov 384   ;;  %s3570_s11 = smov 24  }
  0x75   : > { %3121 = dma.hbm_to_vmem [thread:$0]  (!%p3675_p6), %s4594_s2, 6144, %s323_s14, [#allocation6], %s3569_s10, %s3569_s10, %s3570_s11  }
  0x76   : > { %s3571_s13 = smov [#allocation10]   ;;  %s3572_s21 = smov [#allocation13]  }
  0x77   : > { %s354_s15 = sshll.u32 %s3571_s13, 4  ;;  %s383_s25 = sshll.u32 %s3572_s21, 4  ;;  %s355_s15 = int_to_ptr.vmem [resolvable:$true] %s354_s15  ;;  %s3781_s25 = int_to_ptr.vmem [resolvable:$true] %s383_s25 }
  0x78   : > { %s3395_s29 = scalar_lea.hbm %s4569_s6, 4096 }
  0x79   : > { %p3396_p1 = scmp.ne.s32.totalorder %s4569_s6, %s3395_s29  ;;  %p3402_p12 = scmp.lt.u32.totalorder %s3395_s29, %s4569_s6 }
  0x7b   : > { %p3398_p3 = pnand %p3396_p1, %p3691_p8 }
  0x7d   : > { %p3399_p11 = pneg %p3398_p3 }
  0x7f   : > { %p3404_p13 = pnand %p3402_p12, %p3399_p11 }
  0x81   : > { %3407 = shalt.err (!%p3404_p13)
}
  0x82   : > { %s3408_s10 = scalar_lea.vmem %s355_s15, 4096  ;;  %p3416_p7 = scmp.lt.s32.totalorder %s355_s15, %s355_s15 }
  0x83   : > { %p3409_p0 = scmp.ne.s32.totalorder %s355_s15, %s3408_s10  ;;  %p3417_p9 = scmp.lt.s32.totalorder %s3408_s10, %s3408_s10 }
  0x85   : > { %p3411_p2 = pnand %p3409_p0, %p3691_p8  ;;  %p3418_p4 = por %p3417_p9, %p3416_p7 }
  0x87   : > { %p3412_p5 = pneg %p3411_p2 }
  0x89   : > { %p3419_p10 = pnand %p3418_p4, %p3412_p5 }
  0x8b   : > { %3422 = shalt.err (!%p3419_p10)
}
  0x8c   : > { %s4595_s26 = smov 16   ;;  %s4596_s8 = smov 256  }
  0x8d   : > { %3127 = dma.hbm_to_vmem [thread:$0]  (!%p3675_p6), %s4569_s6, 4096, %s355_s15, [#allocation9], %s4596_s8, %s4596_s8, %s4595_s26  }
  0x8e   : > { %s3423_s28 = scalar_lea.hbm %s4572_s9, 4096 }
  0x8f   : > { %p3424_p1 = scmp.ne.s32.totalorder %s4572_s9, %s3423_s28  ;;  %p3430_p12 = scmp.lt.u32.totalorder %s3423_s28, %s4572_s9 }
  0x91   : > { %p3426_p3 = pnand %p3424_p1, %p3691_p8 }
  0x93   : > { %p3427_p11 = pneg %p3426_p3 }
  0x95   : > { %p3432_p13 = pnand %p3430_p12, %p3427_p11 }
  0x97   : > { %3435 = shalt.err (!%p3432_p13)
}
  0x98   : > { %s3436_s15 = scalar_lea.vmem %s3781_s25, 4096  ;;  %p3444_p7 = scmp.lt.s32.totalorder %s3781_s25, %s3781_s25 }
  0x99   : > { %p3437_p0 = scmp.ne.s32.totalorder %s3781_s25, %s3436_s15  ;;  %p3445_p9 = scmp.lt.s32.totalorder %s3436_s15, %s3436_s15 }
  0x9b   : > { %p3439_p2 = pnand %p3437_p0, %p3691_p8  ;;  %p3446_p4 = por %p3445_p9, %p3444_p7 }
  0x9d   : > { %p3440_p5 = pneg %p3439_p2 }
  0x9f   : > { %p3447_p10 = pnand %p3446_p4, %p3440_p5 }
  0xa1   : > { %3450 = shalt.err (!%p3447_p10)
}
  0xa2   : > { %s4597_s10 = smov 8   ;;  %s4598_s26 = smov 128  }
  0xa3   : > { %3133 = dma.hbm_to_vmem [thread:$0]  (!%p3675_p6), %s4572_s9, 4096, %s3781_s25, [#allocation12], %s4598_s26, %s4598_s26, %s4597_s10  }
  0xa4   : > { %s2321_s27 = sadd.s32 4294967294, %s3559_s20   ;;  %s3832_s16 = sadd.s32 1, %s3559_s20  }
  0xa5   : > { %s34_s12 = ssub.s32 %s3559_s20, %s3832_s16  ;;  %s37_s13 = sadd.s32 1, %s3555_s19 }
  0xa6   : > { %p35_p8 = scmp.eq.s32.totalorder %s34_s12, 0  ;;  %p44_p1 = scmp.ne.s32.totalorder %s3555_s19, %s3551_s18 }
  0xa7   : > { %p45_p3 = scmp.eq.s32.totalorder %s3559_s20, 0  ;;  %p50_p11 = scmp.ne.s32.totalorder %s3551_s18, %s3547_s17 }
  0xa8   : > { %s3843_s21 = scalar_select %p35_p8, %s3555_s19, %s37_s13  }
  0xa9   : > { %p3845_p12 = por %p45_p3, %p44_p1  ;;  %p4600_p13 = scmp.eq.s32.totalorder %s3659_s23, 0 }
  0xaa   : > { %p284_p0 = scmp.eq.s32.totalorder %s3659_s23, 1  ;;  %p290_p2 = scmp.eq.s32.totalorder %s2321_s27, 1 }
  0xab   : > { %p3851_p6 = por %p4600_p13, %p50_p11  ;;  %p3148_p5 = scmp.lt.s32.totalorder %s3559_s20, 2 }
  0xac   : > { %s400_s22 = sand.u32 1, %s3555_s19   ;;  %p3858_p7 = por %p284_p0, %p44_p1 }
  0xad   : > { %p3862_p9 = por %p290_p2, %p50_p11  ;;  %s2330_s14 = sshll.u32 %s400_s22, 7 }
  0xae   : > { %s4602_s29 = scalar_select %p3858_p7, 1, 0 }
  0xaf   : > { %s4603_s30 = scalar_select %p3862_p9, 1, 0 }
  0xb0   : > { %s2349_s15 = sshll.u32 %s3559_s20, 11  ;;  %s404_s27 = scalar_lea.vmem [#allocation2], %s2330_s14 }
  0xb1   : > { %s3870_s12 = scalar_lea.hbm %s4563_s0, %s2349_s15  ;;  %s411_s13 = sshll.u32 %s404_s27, 4  ;;  %s3872_s13 = int_to_ptr.vmem [resolvable:$true] %s411_s13 }
  0xb2   : > { %p3876_p4 = pnand %p3148_p5, %p3845_p12  ;;  %s3880_s2 = scalar_lea.sflag [#allocation3], %s400_s22 }
  0xb3   : > { %s3451_s8 = scalar_lea.hbm %s3870_s12, 2048  ;;  %s3456_s28 = scalar_lea.hbm %s4563_s0, 4096 }
  0xb4   : > { %p3452_p10 = scmp.ne.s32.totalorder %s3870_s12, %s3451_s8  ;;  %p3453_p8 = pneg %p3876_p4 }
  0xb5   : > { %p3457_p11 = scmp.lt.u32.totalorder %s3870_s12, %s4563_s0  ;;  %p3458_p12 = scmp.lt.u32.totalorder %s3456_s28, %s3451_s8 }
  0xb6   : > { %p3454_p1 = pnand %p3453_p8, %p3452_p10  ;;  %p3460_p0 = scmp.lt.u32.totalorder %s3451_s8, %s3870_s12 }
  0xb7   : > { %p3459_p13 = por %p3458_p12, %p3457_p11 }
  0xb8   : > { %p3455_p3 = pneg %p3454_p1 }
  0xb9   : > { %p3461_p2 = por %p3460_p0, %p3459_p13 }
  0xbb   : > { %p3462_p5 = pnand %p3461_p2, %p3455_p3 }
  0xbd   : > { %3465 = shalt.err (!%p3462_p5)
}
  0xbe   : > { %s3466_s22 = scalar_lea.vmem %s3872_s13, 2048  ;;  %s3573_s14 = smov [#allocation2]  }
  0xbf   : > { %p3467_p10 = scmp.ne.s32.totalorder %s3872_s13, %s3466_s22  ;;  %s3471_s15 = sshll.u32 %s3573_s14, 4  ;;  %s3472_s15 = int_to_ptr.vmem [resolvable:$false] %s3471_s15 }
  0xc0   : > { %s3473_s11 = scalar_lea.vmem %s3472_s15, 4096  ;;  %p3474_p7 = scmp.lt.s32.totalorder %s3872_s13, %s3472_s15 }
  0xc1   : > { %p3469_p1 = pnand %p3467_p10, %p3453_p8  ;;  %p3475_p11 = scmp.lt.s32.totalorder %s3473_s11, %s3466_s22 }
  0xc3   : > { %p3470_p9 = pneg %p3469_p1  ;;  %p3476_p12 = por %p3475_p11, %p3474_p7 }
  0xc5   : > { %p3477_p13 = pnand %p3476_p12, %p3470_p9 }
  0xc7   : > { %3480 = shalt.err (!%p3477_p13)
}
  0xc8   : > { %3137 = dma.hbm_to_vmem [thread:$0]  (!%p3876_p4), %s3870_s12, 2048, %s3872_s13, %s3880_s2, %s4598_s26, %s4598_s26, %s4597_s10  }
  0xc9   : > { %p4605_p8 = scmp.ne.s32.totalorder %s4590_s24, 0 }
  0xca   : > { %s3914_s8 = sand.u32 (!%p4605_p8), 1, %s3551_s18  }
  0xcb   : > { %423 = sbr.rel (%p4605_p8) target bundleno = 2047 (0x7ff), region = 64  ;;  %s2334_s28 = sshll.u32 (!%p4605_p8), %s3914_s8, 7 }
  0xcc   : > { %s426_s27 = scalar_lea.sflag (!%p4605_p8), [#allocation3], %s3914_s8  ;;  %s3920_s1 = scalar_lea.vmem (!%p4605_p8), [#allocation2], %s2334_s28 }
  0xd2   : > { %3526 = dma.done.wait (%p3851_p6), %s426_s27, 2048  }
  0xd3   : > { %3528 = vsyncadd (%p3851_p6), %s426_s27, 4294965248  ;;  %p4606_p7 = scmp.eq.s32.totalorder %s3659_s23, 0 }
  0xd5   : > { %3530 = dma.done.wait (%p4606_p7), [#allocation6], 8192   ;;  %p4607_p9 = pmov %p4606_p7 }
  0xd6   : > { %p4608_p4 = pmov %p4606_p7 }
  0xd7   : > { %3532 = vsyncadd (%p4607_p9), [#allocation6], 4294959104 }
  0xd8   : > { %3534 = dma.done.wait (%p4608_p4), [#allocation9], 6144   ;;  %p4609_p3 = pmov %p4608_p4 }
  0xda   : > { %3536 = vsyncadd (%p4609_p3), [#allocation9], 4294961152  ;;  %p4610_p0 = pmov %p4609_p3 }
  0xdc   : > { %3538 = dma.done.wait (%p4610_p0), [#allocation12], 8192   ;;  %p4611_p2 = pmov %p4610_p0 }
  0xdd   : > { %v3574_v0 = vmov 0.0   ;;  %v511_v1 = vld [vmem:[#allocation7 + $0x8] sm:$0xff]  ;;  %v514_v2 = vld [vmem:[#allocation7 + $0x20] sm:$0xff]  ;;  %v513_v5 = vld [vmem:[#allocation7 + $0x18] sm:$0xff]  ;;  %s4612_s13 = sld [smem:[#allocation22_spill]]  ;;  %s4613_s15 = sld [smem:[#allocation23_spill]] }
  0xde   : > { %3540 = vsyncadd (%p4611_p2), [#allocation12], 4294959104  ;;  %639 = vmatprep.mubr.f32.mxu0 %v3574_v0  ;;  %v510_v3 = vld [vmem:[#allocation7] sm:$0xff]  ;;  %v2783_v4 = vpack.c.bf16 %v514_v2, %v511_v1  ;;  %v517_v6 = vld [vmem:[#allocation7 + $0x38] sm:$0xff]  ;;  %v560_v2 = vlaneseq  ;;  %s4464_s11 = scalar_lea.vmem [#allocation14], %s2334_s28  ;;  %s2350_s28 = sshll.u32 %s3659_s23, 11 }
  0xdf   : > { %v520_v7 = vld [vmem:[#allocation7 + $0x50] sm:$0xff]  ;;  %v2785_v8 = vpack.c.bf16 %v513_v5, %v510_v3  ;;  %v519_v11 = vld [vmem:[#allocation7 + $0x48] sm:$0xff]  ;;  %v526_v13 = vld [vmem:[#allocation7 + $0x80] sm:$0xff]  ;;  %s2191_s27 = sshll.u32 %s4464_s11, 4  ;;  %s4614_s24 = sld [smem:[#allocation24_spill]]  ;;  %s4517_s27 = int_to_ptr.vmem [resolvable:$true] %s2191_s27 }
  0xe0   : > { %v2787_v9 = vpack.c.bf16 %v520_v7, %v517_v6  ;;  %v516_v10 = vld [vmem:[#allocation7 + $0x30] sm:$0xff]  ;;  %v523_v12 = vld [vmem:[#allocation7 + $0x68] sm:$0xff]  ;;  %2784 = vmatprep.subr.bf16.mxu0 %v2783_v4  ;;  %v522_v16 = vld [vmem:[#allocation7 + $0x60] sm:$0xff]  ;;  %v4015_v3 = vshrl.u32 %v560_v2, 7  ;;  %s2178_s26 = scalar_lea.sflag [#allocation4], %s3914_s8  ;;  %s3481_s25 = scalar_lea.vmem %s4517_s27, 2048 }
  0xe1   : > { %2786 = vmatpush1.bf16.msra.mxu0 %v2785_v8  ;;  %v2789_v14 = vpack.c.bf16 %v519_v11, %v516_v10  ;;  %v2791_v15 = vpack.c.bf16 %v526_v13, %v523_v12  ;;  %v525_v17 = vld [vmem:[#allocation7 + $0x78] sm:$0xff]  ;;  %v532_v19 = vld [vmem:[#allocation7 + $0xb0] sm:$0xff]  ;;  %v531_v23 = vld [vmem:[#allocation7 + $0xa8] sm:$0xff]  ;;  %p3482_p6 = scmp.ne.s32.totalorder %s4517_s27, %s3481_s25  ;;  %p4615_p5 = scmp.ne.s32.totalorder %s4602_s29, 0 }
  0xe2   : > { %2788 = vmatprep.subr.bf16.mxu0 %v2787_v9  ;;  %v529_v18 = vld [vmem:[#allocation7 + $0x98] sm:$0xff]  ;;  %v2793_v20 = vpack.c.bf16 %v525_v17, %v522_v16  ;;  %v528_v22 = vld [vmem:[#allocation7 + $0x90] sm:$0xff]  ;;  %v535_v24 = vld [vmem:[#allocation7 + $0xc8] sm:$0xff]  ;;  %v562_v4 = vsub.s32 0, %v4015_v3  ;;  %v566_v7 = vsub.s32 1, %v4015_v3  ;;  %s3575_s23 = smov [#allocation14]  }
  0xe3   : > { %v2795_v21 = vpack.c.bf16 %v532_v19, %v529_v18  ;;  %v538_v25 = vld [vmem:[#allocation7 + $0xe0] sm:$0xff]  ;;  %v2797_v27 = vpack.c.bf16 %v531_v23, %v528_v22  ;;  %v537_v30 = vld [vmem:[#allocation7 + $0xd8] sm:$0xff]  ;;  %v544_v32 = vld [vmem:[#allocation7 + $0x110] sm:$0xff]  ;;  %p3483_p10 = pnand %p3482_p6, %p4615_p5  ;;  %s3485_s12 = sshll.u32 %s3575_s23, 4  ;;  %s3486_s12 = int_to_ptr.vmem [resolvable:$false] %s3485_s12 }
  0xe4   : > { %v494_v26 = vld [vmem:[%s3920_s1] sm:$0xff]  ;;  %v2799_v28 = vpack.c.bf16 %v538_v25, %v535_v24  ;;  %v541_v31 = vld [vmem:[#allocation7 + $0xf8] sm:$0xff]  ;;  %v540_v35 = vld [vmem:[#allocation7 + $0xf0] sm:$0xff]  ;;  %p3488_p11 = scmp.lt.s32.totalorder %s4517_s27, %s3486_s12 }
  0xe5   : > { %2790 = vmatpush1.bf16.msra.mxu0 %v2789_v14  ;;  %2591 = vmatprep.mubr.f32.mxu1 %v494_v26  ;;  %v534_v29 = vld [vmem:[#allocation7 + $0xc0] sm:$0xff]  ;;  %v2803_v34 = vpack.c.bf16 %v544_v32, %v541_v31  ;;  %v543_v36 = vld [vmem:[#allocation7 + $0x108] sm:$0xff]  ;;  %v549_v42 = vld [vmem:[#allocation7 + $0x138] sm:$0xff]  ;;  %s4515_s10 = scalar_lea.hbm %s4614_s24, %s2350_s28  ;;  %p3484_p1 = pneg %p3483_p10 }
  0xe6   : > { %2792 = vmatprep.subr.bf16.mxu0 %v2791_v15  ;;  %v2801_v33 = vpack.c.bf16 %v537_v30, %v534_v29  ;;  %v547_v37 = vld [vmem:[#allocation7 + $0x128] sm:$0xff]  ;;  %v550_v38 = vld [vmem:[#allocation7 + $0x140] sm:$0xff]  ;;  %v2805_v39 = vpack.c.bf16 %v543_v36, %v540_v35  ;;  %v553_v43 = vld [vmem:[#allocation7 + $0x158] sm:$0xff] }
  0xe7   : > { %v2807_v40 = vpack.c.bf16 %v550_v38, %v547_v37  ;;  %v546_v41 = vld [vmem:[#allocation7 + $0x120] sm:$0xff]  ;;  %v556_v44 = vld [vmem:[#allocation7 + $0x170] sm:$0xff]  ;;  %v555_v48 = vld [vmem:[#allocation7 + $0x168] sm:$0xff] }
  0xe8   : > { %v2809_v45 = vpack.c.bf16 %v549_v42, %v546_v41  ;;  %v2811_v46 = vpack.c.bf16 %v556_v44, %v553_v43  ;;  %v552_v47 = vld [vmem:[#allocation7 + $0x150] sm:$0xff]  ;;  %v3942_v50 = vld [vmem:[%s3920_s1 + $0x8] sm:$0xff]  ;;  %v3952_v52 = vld [vmem:[%s3920_s1 + $0x18] sm:$0xff] }
  0xe9   : > { %2794 = vmatpush1.bf16.msra.mxu0 %v2793_v20  ;;  %v2813_v49 = vpack.c.bf16 %v555_v48, %v552_v47  ;;  %v3947_v51 = vld [vmem:[%s3920_s1 + $0x10] sm:$0xff]  ;;  %v3957_v53 = vld [vmem:[%s3920_s1 + $0x20] sm:$0xff]  ;;  %v3962_v54 = vld [vmem:[%s3920_s1 + $0x28] sm:$0xff] }
  0xea   : > { %2796 = vmatprep.subr.bf16.mxu0 %v2795_v21  ;;  %v3967_v55 = vld [vmem:[%s3920_s1 + $0x30] sm:$0xff]  ;;  %v3972_v56 = vld [vmem:[%s3920_s1 + $0x38] sm:$0xff]  ;;  %v3977_v57 = vld [vmem:[%s3920_s1 + $0x40] sm:$0xff] }
  0xeb   : > { %v3982_v58 = vld [vmem:[%s3920_s1 + $0x48] sm:$0xff]  ;;  %v3987_v59 = vld [vmem:[%s3920_s1 + $0x50] sm:$0xff]  ;;  %v3992_v60 = vld [vmem:[%s3920_s1 + $0x58] sm:$0xff] }
  0xec   : > { %v3997_v61 = vld [vmem:[%s3920_s1 + $0x60] sm:$0xff]  ;;  %v4002_v62 = vld [vmem:[%s3920_s1 + $0x68] sm:$0xff]  ;;  %v4007_v63 = vld [vmem:[%s3920_s1 + $0x70] sm:$0xff] }
  0xed   : > { %2798 = vmatpush1.bf16.msra.mxu0 %v2797_v27  ;;  %v4012_v1 = vld [vmem:[%s3920_s1 + $0x78] sm:$0xff]  ;;  %v4021_v5 = vld [vmem:[%s4566_s3] sm:$0x7] }
  0xee   : > { %2800 = vmatprep.subr.bf16.mxu0 %v2799_v28  ;;  %v4026_v6 = vrot.slane %v4021_v5, %v562_v4  ;;  %v4033_v11 = vrot.slane %v4021_v5, %v566_v7 }
  0xf1   : > { %2802 = vmatpush1.bf16.msra.mxu0 %v2801_v33 }
  0xf2   : > { %2804 = vmatprep.subr.bf16.mxu0 %v2803_v34 }
  0xf5   : > { %2806 = vmatpush1.bf16.msra.mxu0 %v2805_v39 }
  0xf6   : > { %2808 = vmatprep.subr.bf16.mxu0 %v2807_v40 }
  0xf9   : > { %2810 = vmatpush1.bf16.msra.mxu0 %v2809_v45 }
  0xfa   : > { %2812 = vmatprep.subr.bf16.mxu0 %v2811_v46 }
  0xfd   : > { %2814 = vmatpush1.bf16.msra.mxu0 %v2813_v49 }
 0x100   : > { %640 = vmatmul.mubr.f32.vlgmr.msra.gmra.mrb[0].mxu0 %v494_v26 }
 0x101   : > { %645 = vmatprep.mubr.f32.mxu0 %v3574_v0 }
 0x104   : > { %646 = vmatmul.mubr.f32.gmra.mrb[2].mxu0 %v3942_v50 }
 0x105   : > { %651 = vmatprep.mubr.f32.mxu0 %v3574_v0 }
 0x108   : > { %652 = vmatmul.mubr.f32.gmra.mrb[4].mxu0 %v3947_v51 }
 0x109   : > { %657 = vmatprep.mubr.f32.mxu0 %v3574_v0 }
 0x10c   : > { %658 = vmatmul.mubr.f32.gmra.mrb[6].mxu0 %v3952_v52 }
 0x10d   : > { %663 = vmatprep.mubr.f32.mxu0 %v3574_v0 }
 0x110   : > { %664 = vmatmul.mubr.f32.gmra.mrb[8].mxu0 %v3957_v53 }
 0x111   : > { %669 = vmatprep.mubr.f32.mxu0 %v3574_v0 }
 0x114   : > { %670 = vmatmul.mubr.f32.gmra.mrb[10].mxu0 %v3962_v54 }
 0x115   : > { %675 = vmatprep.mubr.f32.mxu0 %v3574_v0 }
 0x118   : > { %676 = vmatmul.mubr.f32.gmra.mrb[12].mxu0 %v3967_v55 }
 0x119   : > { %681 = vmatprep.mubr.f32.mxu0 %v3574_v0 }
 0x11c   : > { %682 = vmatmul.mubr.f32.gmra.mrb[14].mxu0 %v3972_v56 }
 0x11d   : > { %687 = vmatprep.mubr.f32.mxu0 %v3574_v0 }
 0x120   : > { %688 = vmatmul.mubr.f32.gmra.mrb[16].mxu0 %v3977_v57 }
 0x121   : > { %693 = vmatprep.mubr.f32.mxu0 %v3574_v0 }
 0x124   : > { %694 = vmatmul.mubr.f32.gmra.mrb[18].mxu0 %v3982_v58 }
 0x125   : > { %699 = vmatprep.mubr.f32.mxu0 %v3574_v0 }
 0x128   : > { %700 = vmatmul.mubr.f32.gmra.mrb[20].mxu0 %v3987_v59 }
 0x129   : > { %705 = vmatprep.mubr.f32.mxu0 %v3574_v0 }
 0x12c   : > { %706 = vmatmul.mubr.f32.gmra.mrb[22].mxu0 %v3992_v60 }
 0x12d   : > { %711 = vmatprep.mubr.f32.mxu0 %v3574_v0 }
 0x130   : > { %712 = vmatmul.mubr.f32.gmra.mrb[24].mxu0 %v3997_v61 }
 0x131   : > { %717 = vmatprep.mubr.f32.mxu0 %v3574_v0 }
 0x134   : > { %718 = vmatmul.mubr.f32.gmra.mrb[26].mxu0 %v4002_v62 }
 0x135   : > { %723 = vmatprep.mubr.f32.mxu0 %v3574_v0 }
 0x138   : > { %724 = vmatmul.mubr.f32.gmra.mrb[28].mxu0 %v4007_v63 }
 0x139   : > { %729 = vmatprep.mubr.f32.mxu0 %v3574_v0 }
 0x13c   : > { %730 = vmatmul.mubr.f32.gmra.mrb[30].mxu0 %v4012_v1 }
 0x1d3   : > { %v641_v8 = vpop.f32.mrb[0].mxu0 }
 0x1d4   : > { %v642_v9 = vadd.f32 %v641_v8, %v4026_v6  ;;  %v643_v10 = vpop.f32.mrb[1].mxu0 }
 0x1d5   : > { %v644_v15 = vadd.f32 %v643_v10, %v4033_v11 }
 0x1d6   : > { %2647 = vmatprep.mubr.f32.mxu0 %v642_v9 }
 0x1d7   : > { %v647_v12 = vpop.f32.mrb[2].mxu0 }
 0x1d8   : > { %v4036_v13 = vadd.f32 %v647_v12, %v4026_v6  ;;  %v649_v14 = vpop.f32.mrb[3].mxu0 }
 0x1d9   : > { %v650_v16 = vadd.f32 %v649_v14, %v4033_v11 }
 0x1db   : > { %v2847_v17 = vpack.c.bf16 %v650_v16, %v644_v15  ;;  %v653_v18 = vpop.f32.mrb[4].mxu0 }
 0x1dc   : > { %v4041_v19 = vadd.f32 %v653_v18, %v4026_v6  ;;  %v655_v20 = vpop.f32.mrb[5].mxu0 }
 0x1dd   : > { %2848 = vmatprep.subr.bf16.mxu0 %v2847_v17  ;;  %v656_v24 = vadd.f32 %v655_v20, %v4033_v11 }
 0x1de   : > { %2850 = vmatpush3.bf16.xpose.msra.mxu0 %v2847_v17 }
 0x1df   : > { %v659_v21 = vpop.f32.mrb[6].mxu0 }
 0x1e0   : > { %v4044_v22 = vadd.f32 %v659_v21, %v4026_v6  ;;  %v661_v23 = vpop.f32.mrb[7].mxu0 }
 0x1e1   : > { %v662_v25 = vadd.f32 %v661_v23, %v4033_v11 }
 0x1e3   : > { %v2851_v26 = vpack.c.bf16 %v662_v25, %v656_v24  ;;  %v665_v27 = vpop.f32.mrb[8].mxu0 }
 0x1e4   : > { %v4049_v28 = vadd.f32 %v665_v27, %v4026_v6  ;;  %v667_v29 = vpop.f32.mrb[9].mxu0 }
 0x1e5   : > { %2852 = vmatprep.subr.bf16.mxu0 %v2851_v26  ;;  %v668_v33 = vadd.f32 %v667_v29, %v4033_v11 }
 0x1e6   : > { %2854 = vmatpush3.bf16.xpose.msra.mxu0 %v2851_v26 }
 0x1e7   : > { %v671_v30 = vpop.f32.mrb[10].mxu0 }
 0x1e8   : > { %v4052_v31 = vadd.f32 %v671_v30, %v4026_v6  ;;  %v673_v32 = vpop.f32.mrb[11].mxu0 }
 0x1e9   : > { %v674_v34 = vadd.f32 %v673_v32, %v4033_v11 }
 0x1eb   : > { %v2855_v35 = vpack.c.bf16 %v674_v34, %v668_v33  ;;  %v677_v36 = vpop.f32.mrb[12].mxu0 }
 0x1ec   : > { %v678_v37 = vadd.f32 %v677_v36, %v4026_v6  ;;  %v679_v38 = vpop.f32.mrb[13].mxu0 }
 0x1ed   : > { %2856 = vmatprep.subr.bf16.mxu0 %v2855_v35  ;;  %v680_v42 = vadd.f32 %v679_v38, %v4033_v11 }
 0x1ee   : > { %2858 = vmatpush3.bf16.xpose.msra.mxu0 %v2855_v35 }
 0x1ef   : > { %v683_v39 = vpop.f32.mrb[14].mxu0 }
 0x1f0   : > { %v684_v40 = vadd.f32 %v683_v39, %v4026_v6  ;;  %v685_v41 = vpop.f32.mrb[15].mxu0 }
 0x1f1   : > { %v686_v43 = vadd.f32 %v685_v41, %v4033_v11 }
 0x1f3   : > { %v2859_v44 = vpack.c.bf16 %v686_v43, %v680_v42  ;;  %v689_v45 = vpop.f32.mrb[16].mxu0 }
 0x1f4   : > { %v690_v46 = vadd.f32 %v689_v45, %v4026_v6  ;;  %v691_v47 = vpop.f32.mrb[17].mxu0 }
 0x1f5   : > { %2860 = vmatprep.subr.bf16.mxu0 %v2859_v44  ;;  %v692_v8 = vadd.f32 %v691_v47, %v4033_v11  ;;  %v533_v47 = vld [vmem:[#allocation7 + $0xb8] sm:$0xff] }
 0x1f6   : > { %2862 = vmatpush3.bf16.xpose.msra.mxu0 %v2859_v44 }
 0x1f7   : > { %v695_v48 = vpop.f32.mrb[18].mxu0 }
 0x1f8   : > { %v696_v49 = vadd.f32 %v695_v48, %v4026_v6  ;;  %v697_v2 = vpop.f32.mrb[19].mxu0 }
 0x1f9   : > { %v698_v9 = vadd.f32 %v697_v2, %v4033_v11  ;;  %v539_v2 = vld [vmem:[#allocation7 + $0xe8] sm:$0xff] }
 0x1fb   : > { %v2863_v10 = vpack.c.bf16 %v698_v9, %v692_v8  ;;  %v701_v12 = vpop.f32.mrb[20].mxu0  ;;  %v542_v9 = vld [vmem:[#allocation7 + $0x100] sm:$0xff] }
 0x1fc   : > { %v702_v14 = vadd.f32 %v701_v12, %v4026_v6  ;;  %v703_v15 = vpop.f32.mrb[21].mxu0 }
 0x1fd   : > { %2864 = vmatprep.subr.bf16.mxu0 %v2863_v10  ;;  %v704_v20 = vadd.f32 %v703_v15, %v4033_v11  ;;  %v551_v15 = vld [vmem:[#allocation7 + $0x148] sm:$0xff] }
 0x1fe   : > { %2866 = vmatpush3.bf16.xpose.msra.mxu0 %v2863_v10  ;;  %v545_v10 = vld [vmem:[#allocation7 + $0x118] sm:$0xff] }
 0x1ff   : > { %v707_v16 = vpop.f32.mrb[22].mxu0  ;;  %v2835_v12 = vpack.c.bf16 %v545_v10, %v542_v9 }
 0x200   : > { %v708_v17 = vadd.f32 %v707_v16, %v4026_v6  ;;  %v709_v18 = vpop.f32.mrb[23].mxu0 }
 0x201   : > { %v710_v21 = vadd.f32 %v709_v18, %v4033_v11  ;;  %v557_v18 = vld [vmem:[#allocation7 + $0x178] sm:$0xff] }
 0x203   : > { %v2867_v23 = vpack.c.bf16 %v710_v21, %v704_v20  ;;  %v713_v24 = vpop.f32.mrb[24].mxu0 }
 0x204   : > { %v714_v25 = vadd.f32 %v713_v24, %v4026_v6  ;;  %v715_v26 = vpop.f32.mrb[25].mxu0  ;;  %v887_v24 = vld [vmem:[#allocation5 + $0x30] sm:$0xff] }
 0x205   : > { %2868 = vmatprep.subr.bf16.mxu0 %v2867_v23  ;;  %v716_v32 = vadd.f32 %v715_v26, %v4033_v11 }
 0x206   : > { %2870 = vmatpush3.bf16.xpose.msra.mxu0 %v2867_v23  ;;  %v886_v23 = vld [vmem:[#allocation5 + $0x28] sm:$0xff] }
 0x207   : > { %v719_v27 = vpop.f32.mrb[26].mxu0 }
 0x208   : > { %v720_v29 = vadd.f32 %v719_v27, %v4026_v6  ;;  %v721_v30 = vpop.f32.mrb[27].mxu0 }
 0x209   : > { %v722_v33 = vadd.f32 %v721_v30, %v4033_v11  ;;  %v888_v30 = vld [vmem:[#allocation5 + $0x38] sm:$0xff] }
 0x20b   : > { %v2871_v34 = vpack.c.bf16 %v722_v33, %v716_v32  ;;  %v725_v35 = vpop.f32.mrb[28].mxu0  ;;  %v889_v32 = vld [vmem:[#allocation5 + $0x40] sm:$0xff] }
 0x20c   : > { %v726_v36 = vadd.f32 %v725_v35, %v4026_v6  ;;  %v727_v38 = vpop.f32.mrb[29].mxu0 }
 0x20d   : > { %2872 = vmatprep.subr.bf16.mxu0 %v2871_v34  ;;  %v728_v43 = vadd.f32 %v727_v38, %v4033_v11  ;;  %v890_v38 = vld [vmem:[#allocation5 + $0x48] sm:$0xff] }
 0x20e   : > { %2874 = vmatpush3.bf16.xpose.msra.mxu0 %v2871_v34 }
 0x20f   : > { %v731_v39 = vpop.f32.mrb[30].mxu0 }
 0x210   : > { %v732_v41 = vadd.f32 %v731_v39, %v4026_v6  ;;  %v733_v42 = vpop.f32.mrb[31].mxu0  ;;  %v512_v6 = vld [vmem:[#allocation7 + $0x10] sm:$0xff] }
 0x211   : > { %v734_v44 = vadd.f32 %v733_v42, %v4033_v11  ;;  %v515_v11 = vld [vmem:[#allocation7 + $0x28] sm:$0xff]  ;;  %v891_v39 = vld [vmem:[#allocation5 + $0x50] sm:$0xff] }
 0x213   : > { %v2875_v45 = vpack.c.bf16 %v734_v44, %v728_v43 }
 0x215   : > { %2876 = vmatprep.subr.bf16.mxu0 %v2875_v45 }
 0x216   : > { %2878 = vmatpush3.bf16.xpose.msra.mxu0 %v2875_v45  ;;  %v892_v45 = vld [vmem:[#allocation5 + $0x58] sm:$0xff] }
 0x21d   : > { %2648 = vmatmul.mubr.f32.vlgmr.msra.gmra.mrb[32].mxu0 %v4036_v13  ;;  %v2815_v13 = vpack.c.bf16 %v515_v11, %v512_v6  ;;  %v893_v6 = vld [vmem:[#allocation5 + $0x60] sm:$0xff] }
 0x21e   : > { %2650 = vmatprep.mubr.f32.mxu0 %v4041_v19  ;;  %v518_v19 = vld [vmem:[#allocation7 + $0x40] sm:$0xff] }
 0x21f   : > { %2816 = vmatprep.subr.bf16.mxu1 %v2815_v13 }
 0x220   : > { %2818 = vmatpush3.bf16.msra.mxu1 %v2815_v13 }
 0x221   : > { %2651 = vmatmul.mubr.f32.gmra.mrb[34].mxu0 %v4044_v22  ;;  %v521_v22 = vld [vmem:[#allocation7 + $0x58] sm:$0xff] }
 0x222   : > { %2653 = vmatprep.mubr.f32.mxu0 %v4049_v28  ;;  %v2819_v28 = vpack.c.bf16 %v521_v22, %v518_v19 }
 0x224   : > { %2820 = vmatprep.subr.bf16.mxu1 %v2819_v28 }
 0x225   : > { %2654 = vmatmul.mubr.f32.gmra.mrb[36].mxu0 %v4052_v31  ;;  %v524_v31 = vld [vmem:[#allocation7 + $0x70] sm:$0xff]  ;;  %2822 = vmatpush3.bf16.msra.mxu1 %v2819_v28  ;;  %v894_v28 = vld [vmem:[#allocation5 + $0x68] sm:$0xff] }
 0x226   : > { %2656 = vmatprep.mubr.f32.mxu0 %v678_v37  ;;  %v527_v37 = vld [vmem:[#allocation7 + $0x88] sm:$0xff] }
 0x229   : > { %2657 = vmatmul.mubr.f32.gmra.mrb[38].mxu0 %v684_v40  ;;  %v530_v40 = vld [vmem:[#allocation7 + $0xa0] sm:$0xff] }
 0x22a   : > { %2659 = vmatprep.mubr.f32.mxu0 %v690_v46  ;;  %v2823_v46 = vpack.c.bf16 %v527_v37, %v524_v31  ;;  %v2827_v48 = vpack.c.bf16 %v533_v47, %v530_v40 }
 0x22c   : > { %2824 = vmatprep.subr.bf16.mxu1 %v2823_v46 }
 0x22d   : > { %2660 = vmatmul.mubr.f32.gmra.mrb[40].mxu0 %v696_v49  ;;  %v536_v49 = vld [vmem:[#allocation7 + $0xd0] sm:$0xff]  ;;  %2826 = vmatpush3.bf16.msra.mxu1 %v2823_v46 }
 0x22e   : > { %2662 = vmatprep.mubr.f32.mxu0 %v702_v14  ;;  %2828 = vmatprep.subr.bf16.mxu1 %v2827_v48  ;;  %v2831_v8 = vpack.c.bf16 %v539_v2, %v536_v49  ;;  %v548_v14 = vld [vmem:[#allocation7 + $0x130] sm:$0xff] }
 0x22f   : > { %v2839_v16 = vpack.c.bf16 %v551_v15, %v548_v14  ;;  %v895_v46 = vld [vmem:[#allocation5 + $0x70] sm:$0xff] }
 0x231   : > { %2663 = vmatmul.mubr.f32.gmra.mrb[42].mxu0 %v708_v17  ;;  %2830 = vmatpush3.bf16.msra.mxu1 %v2827_v48  ;;  %v554_v17 = vld [vmem:[#allocation7 + $0x160] sm:$0xff]  ;;  %v896_v48 = vld [vmem:[#allocation5 + $0x78] sm:$0xff] }
 0x232   : > { %2665 = vmatprep.mubr.f32.mxu0 %v714_v25  ;;  %2832 = vmatprep.subr.bf16.mxu1 %v2831_v8  ;;  %v2843_v20 = vpack.c.bf16 %v557_v18, %v554_v17 }
 0x235   : > { %2666 = vmatmul.mubr.f32.gmra.mrb[44].mxu0 %v720_v29  ;;  %2834 = vmatpush3.bf16.msra.mxu1 %v2831_v8  ;;  %v570_v8 = vsub.s32 2, %v4015_v3 }
 0x236   : > { %2668 = vmatprep.mubr.f32.mxu0 %v726_v36  ;;  %2836 = vmatprep.subr.bf16.mxu1 %v2835_v12 }
 0x237   : > { %v4148_v15 = vrot.slane %v4021_v5, %v570_v8 }
 0x239   : > { %2669 = vmatmul.mubr.f32.gmra.mrb[46].mxu0 %v732_v41  ;;  %2838 = vmatpush3.bf16.msra.mxu1 %v2835_v12 }
 0x23a   : > { %1627 = vmatprep.mubr.f32.mxu0 %v3574_v0  ;;  %2840 = vmatprep.subr.bf16.mxu1 %v2839_v16 }
 0x23d   : > { %2842 = vmatpush3.bf16.msra.mxu1 %v2839_v16 }
 0x23e   : > { %2844 = vmatprep.subr.bf16.mxu1 %v2843_v20 }
 0x241   : > { %2846 = vmatpush3.bf16.msra.mxu1 %v2843_v20 }
 0x244   : > { %2592 = vmatmul.mubr.f32.vlgmr.msra.gmra.mrb[0].mxu1 %v3942_v50  ;;  %v881_v50 = vld [vmem:[#allocation5] sm:$0xff] }
 0x245   : > { %2594 = vmatprep.mubr.f32.mxu1 %v3947_v51 }
 0x248   : > { %2595 = vmatmul.mubr.f32.gmra.mrb[2].mxu1 %v3952_v52 }
 0x249   : > { %2597 = vmatprep.mubr.f32.mxu1 %v3957_v53 }
 0x24c   : > { %2598 = vmatmul.mubr.f32.gmra.mrb[4].mxu1 %v3962_v54  ;;  %v882_v54 = vld [vmem:[#allocation5 + $0x8] sm:$0xff] }
 0x24d   : > { %2600 = vmatprep.mubr.f32.mxu1 %v3967_v55  ;;  %v883_v55 = vld [vmem:[#allocation5 + $0x10] sm:$0xff] }
 0x250   : > { %2601 = vmatmul.mubr.f32.gmra.mrb[6].mxu1 %v3972_v56 }
 0x251   : > { %2603 = vmatprep.mubr.f32.mxu1 %v3977_v57 }
 0x254   : > { %2604 = vmatmul.mubr.f32.gmra.mrb[8].mxu1 %v3982_v58 }
 0x255   : > { %2606 = vmatprep.mubr.f32.mxu1 %v3987_v59 }
 0x258   : > { %2607 = vmatmul.mubr.f32.gmra.mrb[10].mxu1 %v3992_v60  ;;  %v884_v60 = vld [vmem:[#allocation5 + $0x18] sm:$0xff] }
 0x259   : > { %2609 = vmatprep.mubr.f32.mxu1 %v3997_v61  ;;  %v885_v61 = vld [vmem:[#allocation5 + $0x20] sm:$0xff] }
 0x25c   : > { %2610 = vmatmul.mubr.f32.gmra.mrb[12].mxu1 %v4002_v62 }
 0x25d   : > { %2612 = vmatprep.mubr.f32.mxu1 %v4007_v63 }
 0x260   : > { %2613 = vmatmul.mubr.f32.gmra.mrb[14].mxu1 %v4012_v1 }
 0x2f0   : > { %v2649_v51 = vpop.f32.mrb[32].mxu0 }
 0x2f1   : > { %v963_v52 = vpop.f32.mrb[33].mxu0  ;;  %v4100_v58 = vadd.f32 %v2649_v51, %v882_v54 }
 0x2f2   : > { %v4097_v53 = vadd.f32 %v963_v52, %v881_v50 }
 0x2f4   : > { %v2652_v56 = vpop.f32.mrb[34].mxu0  ;;  %1042 = vmax.xlane.f32.xlu0 %v4097_v53 }
 0x2f5   : > { %v973_v57 = vpop.f32.mrb[35].mxu0  ;;  %v4106_v1 = vadd.f32 %v2652_v56, %v884_v60 }
 0x2f6   : > { %v4102_v59 = vadd.f32 %v973_v57, %v883_v55 }
 0x2f8   : > { %v2655_v62 = vpop.f32.mrb[36].mxu0  ;;  %1046 = vmax.xlane.f32.xlu1 %v4102_v59  ;;  %1044 = vmax.xlane.f32.xlu0 %v4100_v58 }
 0x2f9   : > { %v983_v63 = vpop.f32.mrb[37].mxu0  ;;  %v4112_v27 = vadd.f32 %v2655_v62, %v886_v23 }
 0x2fa   : > { %v4108_v21 = vadd.f32 %v983_v63, %v885_v61 }
 0x2fc   : > { %v2658_v25 = vpop.f32.mrb[38].mxu0  ;;  %1048 = vmax.xlane.f32.xlu1 %v4106_v1  ;;  %1050 = vmax.xlane.f32.xlu0 %v4108_v21 }
 0x2fd   : > { %v993_v26 = vpop.f32.mrb[39].mxu0  ;;  %v4118_v35 = vadd.f32 %v2658_v25, %v888_v30 }
 0x2fe   : > { %v4114_v29 = vadd.f32 %v993_v26, %v887_v24 }
 0x300   : > { %v2661_v33 = vpop.f32.mrb[40].mxu0  ;;  %1052 = vmax.xlane.f32.xlu1 %v4112_v27  ;;  %1054 = vmax.xlane.f32.xlu0 %v4114_v29 }
 0x301   : > { %v1003_v34 = vpop.f32.mrb[41].mxu0  ;;  %v4124_v43 = vadd.f32 %v2661_v33, %v890_v38 }
 0x302   : > { %v4120_v36 = vadd.f32 %v1003_v34, %v889_v32 }
 0x304   : > { %v2664_v41 = vpop.f32.mrb[42].mxu0  ;;  %1056 = vmax.xlane.f32.xlu1 %v4118_v35  ;;  %1058 = vmax.xlane.f32.xlu0 %v4120_v36 }
 0x305   : > { %v1013_v42 = vpop.f32.mrb[43].mxu0  ;;  %v4130_v19 = vadd.f32 %v2664_v41, %v892_v45 }
 0x306   : > { %v4126_v44 = vadd.f32 %v1013_v42, %v891_v39 }
 0x308   : > { %v2667_v11 = vpop.f32.mrb[44].mxu0  ;;  %1060 = vmax.xlane.f32.xlu1 %v4124_v43  ;;  %1062 = vmax.xlane.f32.xlu0 %v4126_v44 }
 0x309   : > { %v1023_v13 = vpop.f32.mrb[45].mxu0  ;;  %v4136_v40 = vadd.f32 %v2667_v11, %v894_v28 }
 0x30a   : > { %v4132_v22 = vadd.f32 %v1023_v13, %v893_v6 }
 0x30c   : > { %v2670_v31 = vpop.f32.mrb[46].mxu0  ;;  %1064 = vmax.xlane.f32.xlu1 %v4130_v19  ;;  %1066 = vmax.xlane.f32.xlu0 %v4132_v22 }
 0x30d   : > { %v1033_v37 = vpop.f32.mrb[47].mxu0  ;;  %v4142_v49 = vadd.f32 %v2670_v31, %v896_v48 }
 0x30e   : > { %v4139_v47 = vadd.f32 %v1033_v37, %v895_v46 }
 0x310   : > { %1068 = vmax.xlane.f32.xlu1 %v4136_v40 }
 0x314   : > { %1070 = vmax.xlane.f32.xlu1 %v4139_v47 }
 0x317   : > { %v2593_v20 = vpop.f32.mrb[0].mxu1 }
 0x318   : > { %1072 = vmax.xlane.f32.xlu1 %v4142_v49  ;;  %v808_v52 = vadd.f32 %v2593_v20, %v4148_v15 }
 0x381   : > { %v1043_v2 = vpop.xlane.xlu0 %1042 }
 0x382   : > { %v1074_v9 = vsub.f32 %v4097_v53, %v1043_v2  ;;  %v802_v53 = vpop.f32.mrb[1].mxu1 }
 0x383   : > { %v803_v5 = vadd.f32 %v802_v53, %v4148_v15  ;;  %v2596_v60 = vpop.f32.mrb[2].mxu1 }
 0x384   : > { %v1090_v10 = vmul.f32 1.442695, %v1074_v9  ;;  %v818_v62 = vadd.f32 %v2596_v60, %v4148_v15  ;;  %v812_v23 = vpop.f32.mrb[3].mxu1 }
 0x385   : > { %v1047_v12 = vpop.xlane.xlu1 %1046  ;;  %v1045_v14 = vpop.xlane.xlu0 %1044  ;;  %v813_v25 = vadd.f32 %v812_v23, %v4148_v15 }
 0x386   : > { %3203 = vpow2.f32 %v1090_v10  ;;  %v1075_v16 = vsub.f32 %v4100_v58, %v1045_v14  ;;  %v1076_v17 = vsub.f32 %v4102_v59, %v1047_v12  ;;  %v2879_v59 = vpack.c.bf16 %v808_v52, %v803_v5  ;;  %v2599_v30 = vpop.f32.mrb[4].mxu1 }
 0x387   : > { %v2883_v34 = vpack.c.bf16 %v818_v62, %v813_v25  ;;  %v822_v39 = vpop.f32.mrb[5].mxu1 }
 0x388   : > { %v1092_v18 = vmul.f32 1.442695, %v1075_v16  ;;  %v1094_v55 = vmul.f32 1.442695, %v1076_v17  ;;  %2880 = vmatprep.subr.bf16.mxu1 %v2879_v59  ;;  %v823_v42 = vadd.f32 %v822_v39, %v4148_v15  ;;  %v2602_v6 = vpop.f32.mrb[6].mxu1 }
 0x389   : > { %v1049_v50 = vpop.xlane.xlu1 %1048  ;;  %v1051_v51 = vpop.xlane.xlu0 %1050  ;;  %2882 = vmatpush3.bf16.msra.mxu1 %v2879_v59  ;;  %v838_v37 = vadd.f32 %v2602_v6, %v4148_v15 }
 0x38a   : > { %v1077_v54 = vsub.f32 %v4106_v1, %v1049_v50  ;;  %3205 = vpow2.f32 %v1092_v18  ;;  %v1078_v56 = vsub.f32 %v4108_v21, %v1051_v51  ;;  %2884 = vmatprep.subr.bf16.mxu1 %v2883_v34  ;;  %v832_v46 = vpop.f32.mrb[7].mxu1 }
 0x38b   : > { %v833_v2 = vadd.f32 %v832_v46, %v4148_v15  ;;  %v2605_v10 = vpop.f32.mrb[8].mxu1 }
 0x38c   : > { %v1096_v57 = vmul.f32 1.442695, %v1077_v54  ;;  %v1098_v1 = vmul.f32 1.442695, %v1078_v56  ;;  %v848_v17 = vadd.f32 %v2605_v10, %v4148_v15  ;;  %v842_v18 = vpop.f32.mrb[9].mxu1 }
 0x38d   : > { %v1053_v58 = vpop.xlane.xlu1 %1052  ;;  %v1055_v61 = vpop.xlane.xlu0 %1054  ;;  %2886 = vmatpush3.bf16.msra.mxu1 %v2883_v34  ;;  %v2891_v16 = vpack.c.bf16 %v838_v37, %v833_v2  ;;  %v843_v51 = vadd.f32 %v842_v18, %v4148_v15  ;;  %v1331_v37 = vld [vmem:[#allocation8] sm:$0xff] }
 0x38e   : > { %3207 = vpow2.f32 %v1096_v57  ;;  %v1079_v63 = vsub.f32 %v4112_v27, %v1053_v58  ;;  %v1080_v24 = vsub.f32 %v4114_v29, %v1055_v61  ;;  %v828_v27 = vadd.f32 %v2599_v30, %v4148_v15  ;;  %v2608_v53 = vpop.f32.mrb[10].mxu1 }
 0x38f   : > { %3209 = vpow2.f32 %v1094_v55  ;;  %v2895_v56 = vpack.c.bf16 %v848_v17, %v843_v51  ;;  %v858_v5 = vadd.f32 %v2608_v53, %v4148_v15  ;;  %v852_v57 = vpop.f32.mrb[11].mxu1  ;;  %v1333_v17 = vld [vmem:[#allocation8 + $0x10] sm:$0xff] }
 0x390   : > { %v4160_v21 = vpop.eup %3203  ;;  %v1100_v26 = vmul.f32 1.442695, %v1079_v63  ;;  %v1102_v29 = vmul.f32 1.442695, %v1080_v24  ;;  %v2887_v31 = vpack.c.bf16 %v828_v27, %v823_v42  ;;  %v853_v60 = vadd.f32 %v852_v57, %v4148_v15  ;;  %v2611_v63 = vpop.f32.mrb[12].mxu1 }
 0x391   : > { %v1057_v32 = vpop.xlane.xlu1 %1056  ;;  %1122 = vadd.xlane.f32.xlu0 %v4160_v21  ;;  %v1059_v33 = vpop.xlane.xlu0 %1058 }
 0x392   : > { %3211 = vpow2.f32 %v1100_v26  ;;  %v1081_v38 = vsub.f32 %v4118_v35, %v1057_v32  ;;  %v1082_v41 = vsub.f32 %v4120_v36, %v1059_v33  ;;  %2888 = vmatprep.subr.bf16.mxu1 %v2887_v31  ;;  %v2899_v62 = vpack.c.bf16 %v858_v5, %v853_v60  ;;  %v862_v24 = vpop.f32.mrb[13].mxu1 }
 0x393   : > { %3213 = vpow2.f32 %v1098_v1  ;;  %2890 = vmatpush3.bf16.msra.mxu1 %v2887_v31  ;;  %v863_v26 = vadd.f32 %v862_v24, %v4148_v15 }
 0x394   : > { %v1104_v45 = vmul.f32 1.442695, %v1081_v38  ;;  %v4167_v11 = vpop.eup %3205  ;;  %v1106_v36 = vmul.f32 1.442695, %v1082_v41  ;;  %2892 = vmatprep.subr.bf16.mxu1 %v2891_v16  ;;  %v2614_v38 = vpop.f32.mrb[14].mxu1 }
 0x395   : > { %v1061_v13 = vpop.xlane.xlu1 %1060  ;;  %v1063_v28 = vpop.xlane.xlu0 %1062  ;;  %1124 = vadd.xlane.f32.xlu0 %v4167_v11 }
 0x396   : > { %3215 = vpow2.f32 %v1104_v45  ;;  %v1083_v35 = vsub.f32 %v4124_v43, %v1061_v13  ;;  %v1084_v48 = vsub.f32 %v4126_v44, %v1063_v28  ;;  %v872_v39 = vpop.f32.mrb[15].mxu1 }
 0x397   : > { %3217 = vpow2.f32 %v1102_v29  ;;  %2894 = vmatpush3.bf16.msra.mxu1 %v2891_v16  ;;  %v878_v29 = vadd.f32 %v2614_v38, %v4148_v15  ;;  %v873_v41 = vadd.f32 %v872_v39, %v4148_v15 }
 0x398   : > { %v4174_v8 = vpop.eup %3207  ;;  %v1108_v9 = vmul.f32 1.442695, %v1083_v35  ;;  %v1110_v20 = vmul.f32 1.442695, %v1084_v48  ;;  %2896 = vmatprep.subr.bf16.mxu1 %v2895_v56  ;;  %v1332_v35 = vld [vmem:[#allocation8 + $0x8] sm:$0xff] }
 0x399   : > { %v4176_v12 = vpop.eup %3209  ;;  %1128 = vadd.xlane.f32.xlu1 %v4174_v8  ;;  %v1065_v43 = vpop.xlane.xlu1 %1064  ;;  %v2907_v13 = vpack.c.bf16 %v878_v29, %v873_v41  ;;  %v2911_v46 = vpack.c.bf16 %v1332_v35, %v1331_v37  ;;  %v1341_v29 = vld [vmem:[#allocation8 + $0x50] sm:$0xff]  ;;  %v1342_v41 = vld [vmem:[#allocation8 + $0x58] sm:$0xff] }
 0x39a   : > { %v1067_v14 = vpop.xlane.xlu0 %1066  ;;  %3219 = vpow2.f32 %v1108_v9  ;;  %v1085_v44 = vsub.f32 %v4130_v19, %v1065_v43  ;;  %1126 = vadd.xlane.f32.xlu0 %v4176_v12 }
 0x39b   : > { %3221 = vpow2.f32 %v1106_v36  ;;  %v1086_v50 = vsub.f32 %v4132_v22, %v1067_v14  ;;  %2898 = vmatpush3.bf16.msra.mxu1 %v2895_v56  ;;  %v1336_v56 = vld [vmem:[#allocation8 + $0x28] sm:$0xff] }
 0x39c   : > { %v4184_v52 = vpop.eup %3211  ;;  %v1112_v54 = vmul.f32 1.442695, %v1085_v44  ;;  %2900 = vmatprep.subr.bf16.mxu1 %v2899_v62  ;;  %v1334_v44 = vld [vmem:[#allocation8 + $0x18] sm:$0xff] }
 0x39d   : > { %v4186_v55 = vpop.eup %3213  ;;  %1132 = vadd.xlane.f32.xlu1 %v4184_v52  ;;  %v1069_v19 = vpop.xlane.xlu1 %1068  ;;  %v1114_v58 = vmul.f32 1.442695, %v1086_v50 }
 0x39e   : > { %3223 = vpow2.f32 %v1112_v54  ;;  %v1087_v22 = vsub.f32 %v4136_v40, %v1069_v19  ;;  %1130 = vadd.xlane.f32.xlu0 %v4186_v55  ;;  %v868_v40 = vadd.f32 %v2611_v63, %v4148_v15  ;;  %v2915_v54 = vpack.c.bf16 %v1334_v44, %v1333_v17  ;;  %v1335_v19 = vld [vmem:[#allocation8 + $0x20] sm:$0xff] }
 0x39f   : > { %3225 = vpow2.f32 %v1110_v20  ;;  %2902 = vmatpush3.bf16.msra.mxu1 %v2899_v62  ;;  %v1338_v62 = vld [vmem:[#allocation8 + $0x38] sm:$0xff] }
 0x3a0   : > { %v4193_v61 = vpop.eup %3215  ;;  %v1116_v59 = vmul.f32 1.442695, %v1087_v22  ;;  %v2903_v33 = vpack.c.bf16 %v868_v40, %v863_v26  ;;  %v1339_v26 = vld [vmem:[#allocation8 + $0x40] sm:$0xff] }
 0x3a1   : > { %v4195_v23 = vpop.eup %3217  ;;  %1136 = vadd.xlane.f32.xlu1 %v4193_v61  ;;  %v1071_v1 = vpop.xlane.xlu1 %1070 }
 0x3a2   : > { %3227 = vpow2.f32 %v1116_v59  ;;  %v1088_v25 = vsub.f32 %v4139_v47, %v1071_v1  ;;  %1134 = vadd.xlane.f32.xlu0 %v4195_v23  ;;  %2904 = vmatprep.subr.bf16.mxu1 %v2903_v33  ;;  %v1337_v59 = vld [vmem:[#allocation8 + $0x30] sm:$0xff] }
 0x3a3   : > { %3229 = vpow2.f32 %v1114_v58  ;;  %2906 = vmatpush3.bf16.msra.mxu1 %v2903_v33 }
 0x3a4   : > { %v4202_v30 = vpop.eup %3219  ;;  %v1118_v32 = vmul.f32 1.442695, %v1088_v25  ;;  %2908 = vmatprep.subr.bf16.mxu1 %v2907_v13 }
 0x3a5   : > { %v4204_v34 = vpop.eup %3221  ;;  %1140 = vadd.xlane.f32.xlu1 %v4202_v30  ;;  %v1073_v27 = vpop.xlane.xlu1 %1072 }
 0x3a6   : > { %3231 = vpow2.f32 %v1118_v32  ;;  %v1089_v47 = vsub.f32 %v4142_v49, %v1073_v27  ;;  %1138 = vadd.xlane.f32.xlu0 %v4204_v34  ;;  %v1340_v32 = vld [vmem:[#allocation8 + $0x48] sm:$0xff] }
 0x3a7   : > { %2910 = vmatpush3.bf16.msra.mxu1 %v2907_v13 }
 0x3a8   : > { %v4211_v42 = vpop.eup %3223  ;;  %v1120_v45 = vmul.f32 1.442695, %v1089_v47  ;;  %2912 = vmatprep.subr.bf16.mxu1 %v2911_v46 }
 0x3a9   : > { %v4213_v6 = vpop.eup %3225  ;;  %1144 = vadd.xlane.f32.xlu1 %v4211_v42 }
 0x3aa   : > { %3233 = vpow2.f32 %v1120_v45  ;;  %1142 = vadd.xlane.f32.xlu0 %v4213_v6 }
 0x3ac   : > { %v4217_v49 = vpop.eup %3227 }
 0x3ad   : > { %v4219_v28 = vpop.eup %3229  ;;  %1148 = vadd.xlane.f32.xlu1 %v4217_v49 }
 0x3ae   : > { %1146 = vadd.xlane.f32.xlu0 %v4219_v28 }
 0x3b0   : > { %v4223_v15 = vpop.eup %3231 }
 0x3b2   : > { %1150 = vadd.xlane.f32.xlu0 %v4223_v15 }
 0x3b4   : > { %v4226_v31 = vpop.eup %3233 }
 0x3b5   : > { %1152 = vadd.xlane.f32.xlu1 %v4226_v31 }
 0x41e   : > { %v1123_v36 = vpop.xlane.xlu0 %1122 }
 0x41f   : > { %3235 = vrcp.f32 %v1123_v36  ;;  %v1344_v36 = vld [vmem:[#allocation8 + $0x68] sm:$0xff] }
 0x422   : > { %v1125_v48 = vpop.xlane.xlu0 %1124 }
 0x423   : > { %3237 = vrcp.f32 %v1125_v48 }
 0x426   : > { %v1129_v2 = vpop.xlane.xlu1 %1128 }
 0x427   : > { %3239 = vrcp.f32 %v1129_v2  ;;  %v1127_v9 = vpop.xlane.xlu0 %1126 }
 0x428   : > { %3241 = vrcp.f32 %v1127_v9 }
 0x429   : > { %v3236_v10 = vpop.eup %3235 }
 0x42a   : > { %v1133_v43 = vpop.xlane.xlu1 %1132  ;;  %v1155_v14 = vmul.f32 %v3236_v10, %v4160_v21 }
 0x42b   : > { %3243 = vrcp.f32 %v1133_v43  ;;  %v1131_v16 = vpop.xlane.xlu0 %1130  ;;  %v1345_v43 = vld [vmem:[#allocation8 + $0x70] sm:$0xff] }
 0x42c   : > { %3245 = vrcp.f32 %v1131_v16  ;;  %2703 = vmatprep.mubr.f32.mxu1 %v1155_v14  ;;  %v1346_v14 = vld [vmem:[#allocation8 + $0x78] sm:$0xff] }
 0x42d   : > { %v3238_v18 = vpop.eup %3237 }
 0x42e   : > { %v1137_v20 = vpop.xlane.xlu1 %1136  ;;  %v1157_v50 = vmul.f32 %v3238_v18, %v4167_v11  ;;  %v2919_v11 = vpack.c.bf16 %v1336_v56, %v1335_v19  ;;  %v2939_v18 = vpack.c.bf16 %v1346_v14, %v1345_v43  ;;  %v1536_v19 = vld [vmem:[#allocation11 + $0x28] sm:$0xff]  ;;  %v1538_v56 = vld [vmem:[#allocation11 + $0x38] sm:$0xff] }
 0x42f   : > { %3247 = vrcp.f32 %v1137_v20  ;;  %v1135_v51 = vpop.xlane.xlu0 %1134 }
 0x430   : > { %3249 = vrcp.f32 %v1135_v51  ;;  %2704 = vmatmul.mubr.f32.vlgmr.msra.gmra.mrb[16].mxu1 %v1157_v50  ;;  %v1532_v51 = vld [vmem:[#allocation11 + $0x8] sm:$0xff] }
 0x431   : > { %v3240_v53 = vpop.eup %3239  ;;  %2914 = vmatpush3.bf16.msra.mxu1 %v2911_v46  ;;  %v1343_v46 = vld [vmem:[#allocation8 + $0x60] sm:$0xff] }
 0x432   : > { %v3242_v5 = vpop.eup %3241  ;;  %v1141_v21 = vpop.xlane.xlu1 %1140  ;;  %v1161_v57 = vmul.f32 %v3240_v53, %v4174_v8  ;;  %2916 = vmatprep.subr.bf16.mxu1 %v2915_v54  ;;  %v1533_v53 = vld [vmem:[#allocation11 + $0x10] sm:$0xff] }
 0x433   : > { %3251 = vrcp.f32 %v1141_v21  ;;  %v1139_v22 = vpop.xlane.xlu0 %1138  ;;  %v1159_v60 = vmul.f32 %v3242_v5, %v4176_v12  ;;  %v2923_v12 = vpack.c.bf16 %v1338_v62, %v1337_v59  ;;  %v2947_v21 = vpack.c.bf16 %v1538_v56, %v1536_v19  ;;  %v1541_v59 = vld [vmem:[#allocation11 + $0x50] sm:$0xff]  ;;  %v1544_v62 = vld [vmem:[#allocation11 + $0x68] sm:$0xff]  ;;  %v1502_v19 = vld [vmem:[#allocation10 + $0x18] sm:$0xff] }
 0x434   : > { %3253 = vrcp.f32 %v1139_v22  ;;  %v1537_v22 = vld [vmem:[#allocation11 + $0x30] sm:$0xff] }
 0x435   : > { %v3244_v58 = vpop.eup %3243  ;;  %2706 = vmatprep.mubr.f32.mxu1 %v1159_v60  ;;  %2918 = vmatpush3.bf16.msra.mxu1 %v2915_v54  ;;  %v1531_v54 = vld [vmem:[#allocation11] sm:$0xff]  ;;  %v1542_v60 = vld [vmem:[#allocation11 + $0x58] sm:$0xff] }
 0x436   : > { %v3246_v63 = vpop.eup %3245  ;;  %2707 = vmatmul.mubr.f32.gmra.mrb[18].mxu1 %v1161_v57  ;;  %v1145_v1 = vpop.xlane.xlu1 %1144  ;;  %v1165_v40 = vmul.f32 %v3244_v58, %v4184_v52  ;;  %2920 = vmatprep.subr.bf16.mxu1 %v2919_v11  ;;  %v2945_v5 = vpack.c.bf16 %v1533_v53, %v1531_v54  ;;  %v1535_v57 = vld [vmem:[#allocation11 + $0x20] sm:$0xff]  ;;  %v1561_v54 = vld [vmem:[#allocation11 + $0xf0] sm:$0xff]  ;;  %v1500_v53 = vld [vmem:[#allocation10 + $0x8] sm:$0xff] }
 0x437   : > { %3255 = vrcp.f32 %v1145_v1  ;;  %v1143_v24 = vpop.xlane.xlu0 %1142  ;;  %v1163_v8 = vmul.f32 %v3246_v63, %v4186_v55  ;;  %v2927_v55 = vpack.c.bf16 %v1340_v32, %v1339_v26  ;;  %v1539_v58 = vld [vmem:[#allocation11 + $0x40] sm:$0xff]  ;;  %v1546_v63 = vld [vmem:[#allocation11 + $0x78] sm:$0xff]  ;;  %v2975_v56 = vpack.c.bf16 %v1502_v19, %v1500_v53 }
 0x438   : > { %3257 = vrcp.f32 %v1143_v24  ;;  %v2953_v1 = vpack.c.bf16 %v1541_v59, %v1539_v58  ;;  %v1543_v24 = vld [vmem:[#allocation11 + $0x60] sm:$0xff]  ;;  %v1526_v19 = vld [vmem:[#allocation10 + $0xd8] sm:$0xff] }
 0x439   : > { %v3248_v25 = vpop.eup %3247  ;;  %2709 = vmatprep.mubr.f32.mxu1 %v1163_v8  ;;  %2922 = vmatpush3.bf16.msra.mxu1 %v2919_v11  ;;  %v2949_v11 = vpack.c.bf16 %v1537_v22, %v1535_v57  ;;  %v1545_v8 = vld [vmem:[#allocation11 + $0x70] sm:$0xff]  ;;  %v1499_v22 = vld [vmem:[#allocation10] sm:$0xff] }
 0x43a   : > { %v3250_v33 = vpop.eup %3249  ;;  %2710 = vmatmul.mubr.f32.gmra.mrb[20].mxu1 %v1165_v40  ;;  %v1149_v27 = vpop.xlane.xlu1 %1148  ;;  %v1169_v38 = vmul.f32 %v3248_v25, %v4193_v61  ;;  %2924 = vmatprep.subr.bf16.mxu1 %v2923_v12  ;;  %v2931_v61 = vpack.c.bf16 %v1342_v41, %v1341_v29  ;;  %v2955_v40 = vpack.c.bf16 %v1546_v63, %v1544_v62  ;;  %v1550_v25 = vld [vmem:[#allocation11 + $0x98] sm:$0xff]  ;;  %v1553_v29 = vld [vmem:[#allocation11 + $0xb0] sm:$0xff]  ;;  %v1556_v41 = vld [vmem:[#allocation11 + $0xc8] sm:$0xff] }
 0x43b   : > { %3259 = vrcp.f32 %v1149_v27  ;;  %v1147_v47 = vpop.xlane.xlu0 %1146  ;;  %v1167_v52 = vmul.f32 %v3250_v33, %v4195_v23  ;;  %v2957_v26 = vpack.c.bf16 %v1545_v8, %v1543_v24  ;;  %v1547_v33 = vld [vmem:[#allocation11 + $0x80] sm:$0xff]  ;;  %v1549_v27 = vld [vmem:[#allocation11 + $0x90] sm:$0xff]  ;;  %v1508_v8 = vld [vmem:[#allocation10 + $0x48] sm:$0xff] }
 0x43c   : > { %3261 = vrcp.f32 %v1147_v47  ;;  %v1554_v47 = vld [vmem:[#allocation11 + $0xb8] sm:$0xff]  ;;  %v1505_v24 = vld [vmem:[#allocation10 + $0x30] sm:$0xff] }
 0x43d   : > { %v3252_v39 = vpop.eup %3251  ;;  %2712 = vmatprep.mubr.f32.mxu1 %v1167_v52  ;;  %2926 = vmatpush3.bf16.msra.mxu1 %v2923_v12  ;;  %v1548_v12 = vld [vmem:[#allocation11 + $0x88] sm:$0xff]  ;;  %v2961_v52 = vpack.c.bf16 %v1549_v27, %v1547_v33 }
 0x43e   : > { %v3254_v45 = vpop.eup %3253  ;;  %2713 = vmatmul.mubr.f32.gmra.mrb[22].mxu1 %v1169_v38  ;;  %v1173_v13 = vmul.f32 %v3252_v39, %v4202_v30  ;;  %2928 = vmatprep.subr.bf16.mxu1 %v2927_v55  ;;  %v2935_v30 = vpack.c.bf16 %v1344_v36, %v1343_v46  ;;  %v2959_v32 = vpack.c.bf16 %v1550_v25, %v1548_v12  ;;  %v1552_v38 = vld [vmem:[#allocation11 + $0xa8] sm:$0xff]  ;;  %v1551_v39 = vld [vmem:[#allocation11 + $0xa0] sm:$0xff]  ;;  %v1510_v12 = vld [vmem:[#allocation10 + $0x58] sm:$0xff] }
 0x43f   : > { %v1151_v37 = vpop.xlane.xlu0 %1150  ;;  %v1171_v35 = vmul.f32 %v3254_v45, %v4204_v34  ;;  %v1558_v45 = vld [vmem:[#allocation11 + $0xd8] sm:$0xff]  ;;  %v2983_v27 = vpack.c.bf16 %v1510_v12, %v1508_v8 }
 0x440   : > { %3263 = vrcp.f32 %v1151_v37  ;;  %v2967_v37 = vpack.c.bf16 %v1558_v45, %v1556_v41  ;;  %v1530_v8 = vld [vmem:[#allocation10 + $0xf8] sm:$0xff] }
 0x441   : > { %v3256_v23 = vpop.eup %3255  ;;  %2715 = vmatprep.mubr.f32.mxu1 %v1171_v35  ;;  %2930 = vmatpush3.bf16.msra.mxu1 %v2927_v55  ;;  %v2963_v55 = vpack.c.bf16 %v1554_v47, %v1552_v38  ;;  %v1555_v35 = vld [vmem:[#allocation11 + $0xc0] sm:$0xff]  ;;  %v1509_v47 = vld [vmem:[#allocation10 + $0x50] sm:$0xff] }
 0x442   : > { %v3258_v48 = vpop.eup %3257  ;;  %2716 = vmatmul.mubr.f32.gmra.mrb[24].mxu1 %v1173_v13  ;;  %v1153_v2 = vpop.xlane.xlu1 %1152  ;;  %v1177_v9 = vmul.f32 %v3256_v23, %v4211_v42  ;;  %2932 = vmatprep.subr.bf16.mxu1 %v2931_v61  ;;  %v2965_v13 = vpack.c.bf16 %v1553_v29, %v1551_v39  ;;  %v1507_v38 = vld [vmem:[#allocation10 + $0x40] sm:$0xff] }
 0x443   : > { %3265 = vrcp.f32 %v1153_v2  ;;  %v1175_v10 = vmul.f32 %v3258_v48, %v4213_v6  ;;  %v2985_v29 = vpack.c.bf16 %v1509_v47, %v1507_v38  ;;  %v1527_v47 = vld [vmem:[#allocation10 + $0xe0] sm:$0xff] }
 0x445   : > { %v3260_v34 = vpop.eup %3259  ;;  %2718 = vmatprep.mubr.f32.mxu1 %v1175_v10  ;;  %2934 = vmatpush3.bf16.msra.mxu1 %v2931_v61  ;;  %v1557_v61 = vld [vmem:[#allocation11 + $0xd0] sm:$0xff] }
 0x446   : > { %v3262_v16 = vpop.eup %3261  ;;  %2719 = vmatmul.mubr.f32.gmra.mrb[26].mxu1 %v1177_v9  ;;  %v1181_v17 = vmul.f32 %v3260_v34, %v4217_v49  ;;  %2936 = vmatprep.subr.bf16.mxu1 %v2935_v30  ;;  %v1534_v49 = vld [vmem:[#allocation11 + $0x18] sm:$0xff]  ;;  %v2969_v23 = vpack.c.bf16 %v1557_v61, %v1555_v35  ;;  %v1513_v35 = vld [vmem:[#allocation10 + $0x70] sm:$0xff]  ;;  %v1516_v61 = vld [vmem:[#allocation10 + $0x88] sm:$0xff] }
 0x447   : > { %v1179_v44 = vmul.f32 %v3262_v16, %v4219_v28  ;;  %v2943_v28 = vpack.c.bf16 %v1534_v49, %v1532_v51  ;;  %v1559_v49 = vld [vmem:[#allocation11 + $0xe0] sm:$0xff] }
 0x449   : > { %2721 = vmatprep.mubr.f32.mxu1 %v1179_v44  ;;  %2938 = vmatpush3.bf16.msra.mxu1 %v2935_v30 }
 0x44a   : > { %v3264_v42 = vpop.eup %3263  ;;  %2722 = vmatmul.mubr.f32.gmra.mrb[28].mxu1 %v1181_v17  ;;  %2940 = vmatprep.subr.bf16.mxu1 %v2939_v18 }
 0x44b   : > { %v1183_v6 = vmul.f32 %v3264_v42, %v4223_v15  ;;  %v1540_v15 = vld [vmem:[#allocation11 + $0x48] sm:$0xff]  ;;  %2944 = vmatprep.subr.bf16.mxu0 %v2943_v28 }
 0x44c   : > { %2946 = vmatpush1.bf16.msra.mxu0 %v2945_v5 }
 0x44d   : > { %v3266_v20 = vpop.eup %3265  ;;  %2724 = vmatprep.mubr.f32.mxu1 %v1183_v6  ;;  %2942 = vmatpush3.bf16.msra.mxu1 %v2939_v18 }
 0x44e   : > { %v1185_v50 = vmul.f32 %v3266_v20, %v4226_v31  ;;  %3039 = vmatprep.subr.bf16.mxu1 %v2943_v28  ;;  %2948 = vmatprep.subr.bf16.mxu0 %v2947_v21  ;;  %v2951_v31 = vpack.c.bf16 %v1542_v60, %v1540_v15  ;;  %v1560_v20 = vld [vmem:[#allocation11 + $0xe8] sm:$0xff]  ;;  %v2973_v28 = vpack.c.bf16 %v1561_v54, %v1559_v49  ;;  %v1501_v15 = vld [vmem:[#allocation10 + $0x10] sm:$0xff]  ;;  %v4249_v60 = vld [vmem:[%s4568_s5] ss:$0 sm:$0xff] }
 0x44f   : > { %v2977_v62 = vpack.c.bf16 %v1501_v15, %v1499_v22  ;;  %v1981_v15 = vld [vmem:[#allocation13 + $0xa0] sm:$0xff] }
 0x450   : > { %2725 = vmatmul.mubr.f32.gmra.mrb[30].mxu1 %v1185_v50  ;;  %2950 = vmatpush1.bf16.msra.mxu0 %v2949_v11  ;;  %v1562_v50 = vld [vmem:[#allocation11 + $0xf8] sm:$0xff] }
 0x451   : > { %2952 = vmatprep.subr.bf16.mxu0 %v2951_v31  ;;  %v2971_v51 = vpack.c.bf16 %v1562_v50, %v1560_v20  ;;  %v1519_v50 = vld [vmem:[#allocation10 + $0xa0] sm:$0xff] }
 0x454   : > { %2954 = vmatpush1.bf16.msra.mxu0 %v2953_v1 }
 0x455   : > { %2956 = vmatprep.subr.bf16.mxu0 %v2955_v40 }
 0x458   : > { %2958 = vmatpush1.bf16.msra.mxu0 %v2957_v26 }
 0x459   : > { %2960 = vmatprep.subr.bf16.mxu0 %v2959_v32 }
 0x45c   : > { %2962 = vmatpush1.bf16.msra.mxu0 %v2961_v52 }
 0x45d   : > { %2964 = vmatprep.subr.bf16.mxu0 %v2963_v55 }
 0x460   : > { %2966 = vmatpush1.bf16.msra.mxu0 %v2965_v13 }
 0x461   : > { %2968 = vmatprep.subr.bf16.mxu0 %v2967_v37 }
 0x464   : > { %2970 = vmatpush1.bf16.msra.mxu0 %v2969_v23 }
 0x465   : > { %2972 = vmatprep.subr.bf16.mxu0 %v2971_v51 }
 0x468   : > { %2974 = vmatpush1.bf16.msra.mxu0 %v2973_v28 }
 0x469   : > { %2976 = vmatprep.subr.bf16.mxu0 %v2975_v56 }
 0x503   : > { %v2705_v46 = vpop.f32.mrb[16].mxu1 }
 0x504   : > { %v1252_v36 = vpop.f32.mrb[17].mxu1 }
 0x505   : > { %2759 = vmatprep.mubr.f32.mxu1 %v1252_v36 }
 0x506   : > { %2760 = vmatmul.mubr.f32.vlgmr.msra.gmra.mrb[32].mxu1 %v2705_v46 }
 0x507   : > { %3047 = vmatpush1.bf16.msra.mxu1 %v2945_v5  ;;  %v1977_v5 = vld [vmem:[#allocation13 + $0x80] sm:$0xff] }
 0x508   : > { %3040 = vmatprep.subr.bf16.mxu1 %v2947_v21  ;;  %v1978_v21 = vld [vmem:[#allocation13 + $0x88] sm:$0xff] }
 0x509   : > { %v2708_v48 = vpop.f32.mrb[18].mxu1  ;;  %v3007_v57 = vpack.c.bf16 %v1978_v21, %v1977_v5  ;;  %v1963_v5 = vld [vmem:[#allocation13 + $0x10] sm:$0xff]  ;;  %v1964_v21 = vld [vmem:[#allocation13 + $0x18] sm:$0xff] }
 0x50a   : > { %v1262_v2 = vpop.f32.mrb[19].mxu1 }
 0x50b   : > { %2762 = vmatprep.mubr.f32.mxu1 %v1262_v2  ;;  %3048 = vmatpush1.bf16.msra.mxu1 %v2949_v11  ;;  %v1504_v11 = vld [vmem:[#allocation10 + $0x28] sm:$0xff] }
 0x50c   : > { %2763 = vmatmul.mubr.f32.gmra.mrb[34].mxu1 %v2708_v48  ;;  %3041 = vmatprep.subr.bf16.mxu1 %v2951_v31  ;;  %v1506_v31 = vld [vmem:[#allocation10 + $0x38] sm:$0xff] }
 0x50d   : > { %v2711_v9 = vpop.f32.mrb[20].mxu1 }
 0x50e   : > { %v1272_v10 = vpop.f32.mrb[21].mxu1 }
 0x50f   : > { %2765 = vmatprep.mubr.f32.mxu1 %v1272_v10  ;;  %3049 = vmatpush1.bf16.msra.mxu1 %v2953_v1  ;;  %v2979_v1 = vpack.c.bf16 %v1506_v31, %v1504_v11  ;;  %v1515_v10 = vld [vmem:[#allocation10 + $0x80] sm:$0xff]  ;;  %v1982_v11 = vld [vmem:[#allocation13 + $0xa8] sm:$0xff] }
 0x510   : > { %2766 = vmatmul.mubr.f32.gmra.mrb[36].mxu1 %v2711_v9  ;;  %3042 = vmatprep.subr.bf16.mxu1 %v2955_v40  ;;  %v1503_v40 = vld [vmem:[#allocation10 + $0x20] sm:$0xff]  ;;  %v3015_v12 = vpack.c.bf16 %v1982_v11, %v1981_v15  ;;  %v1988_v15 = vld [vmem:[#allocation13 + $0xd8] sm:$0xff] }
 0x511   : > { %v2714_v30 = vpop.f32.mrb[22].mxu1 }
 0x512   : > { %v1282_v34 = vpop.f32.mrb[23].mxu1 }
 0x513   : > { %2768 = vmatprep.mubr.f32.mxu1 %v1282_v34  ;;  %3050 = vmatpush1.bf16.msra.mxu1 %v2957_v26  ;;  %v2981_v26 = vpack.c.bf16 %v1505_v24, %v1503_v40  ;;  %v1520_v34 = vld [vmem:[#allocation10 + $0xa8] sm:$0xff]  ;;  %v3013_v24 = vpack.c.bf16 %v1964_v21, %v1963_v5  ;;  %v1969_v21 = vld [vmem:[#allocation13 + $0x40] sm:$0xff] }
 0x514   : > { %2769 = vmatmul.mubr.f32.gmra.mrb[38].mxu1 %v2714_v30  ;;  %3043 = vmatprep.subr.bf16.mxu1 %v2959_v32  ;;  %v1517_v30 = vld [vmem:[#allocation10 + $0x90] sm:$0xff]  ;;  %v1528_v40 = vld [vmem:[#allocation10 + $0xe8] sm:$0xff] }
 0x515   : > { %v2717_v43 = vpop.f32.mrb[24].mxu1 }
 0x516   : > { %v1292_v14 = vpop.f32.mrb[25].mxu1 }
 0x517   : > { %2771 = vmatprep.mubr.f32.mxu1 %v1292_v14  ;;  %3051 = vmatpush1.bf16.msra.mxu1 %v2961_v52  ;;  %v1512_v52 = vld [vmem:[#allocation10 + $0x68] sm:$0xff]  ;;  %v1961_v14 = vld [vmem:[#allocation13] sm:$0xff] }
 0x518   : > { %2772 = vmatmul.mubr.f32.gmra.mrb[40].mxu1 %v2717_v43  ;;  %3044 = vmatprep.subr.bf16.mxu1 %v2963_v55  ;;  %v1514_v55 = vld [vmem:[#allocation10 + $0x78] sm:$0xff] }
 0x519   : > { %v2720_v16 = vpop.f32.mrb[26].mxu1  ;;  %v1522_v43 = vld [vmem:[#allocation10 + $0xb8] sm:$0xff] }
 0x51a   : > { %v1302_v17 = vpop.f32.mrb[27].mxu1  ;;  %v2995_v54 = vpack.c.bf16 %v1522_v43, %v1520_v34  ;;  %v4311_v34 = vld [vmem:[%s3920_s1 + $0x28] sm:$0xff]  ;;  %v4321_v43 = vld [vmem:[%s3920_s1 + $0x38] sm:$0xff] }
 0x51b   : > { %2774 = vmatprep.mubr.f32.mxu1 %v1302_v17  ;;  %3052 = vmatpush1.bf16.msra.mxu1 %v2965_v13  ;;  %v2987_v13 = vpack.c.bf16 %v1514_v55, %v1512_v52  ;;  %v1529_v52 = vld [vmem:[#allocation10 + $0xf0] sm:$0xff] }
 0x51c   : > { %2775 = vmatmul.mubr.f32.gmra.mrb[42].mxu1 %v2720_v16  ;;  %3045 = vmatprep.subr.bf16.mxu1 %v2967_v37  ;;  %v1511_v37 = vld [vmem:[#allocation10 + $0x60] sm:$0xff]  ;;  %v1962_v16 = vld [vmem:[#allocation13 + $0x8] sm:$0xff] }
 0x51d   : > { %v2723_v44 = vpop.f32.mrb[28].mxu1  ;;  %v2989_v36 = vpack.c.bf16 %v1513_v35, %v1511_v37  ;;  %v3009_v53 = vpack.c.bf16 %v1962_v16, %v1961_v14  ;;  %v4326_v14 = vld [vmem:[%s3920_s1 + $0x40] sm:$0xff]  ;;  %v4331_v16 = vld [vmem:[%s3920_s1 + $0x48] sm:$0xff] }
 0x51e   : > { %v1312_v18 = vpop.f32.mrb[29].mxu1 }
 0x51f   : > { %2777 = vmatprep.mubr.f32.mxu1 %v1312_v18  ;;  %3053 = vmatpush1.bf16.msra.mxu1 %v2969_v23  ;;  %v1518_v23 = vld [vmem:[#allocation10 + $0x98] sm:$0xff]  ;;  %v1979_v18 = vld [vmem:[#allocation13 + $0x90] sm:$0xff] }
 0x520   : > { %2778 = vmatmul.mubr.f32.gmra.mrb[44].mxu1 %v2723_v44  ;;  %3046 = vmatprep.subr.bf16.mxu1 %v2971_v51  ;;  %v2991_v9 = vpack.c.bf16 %v1518_v23, %v1516_v61  ;;  %v2993_v44 = vpack.c.bf16 %v1517_v30, %v1515_v10  ;;  %v1521_v51 = vld [vmem:[#allocation10 + $0xb0] sm:$0xff]  ;;  %v4280_v23 = vld [vmem:[%s3920_s1] sm:$0xff]  ;;  %v4301_v10 = vld [vmem:[%s3920_s1 + $0x18] sm:$0xff] }
 0x521   : > { %v2997_v22 = vpack.c.bf16 %v1521_v51, %v1519_v50  ;;  %v4306_v30 = vld [vmem:[%s3920_s1 + $0x20] sm:$0xff]  ;;  %v1983_v50 = vld [vmem:[#allocation13 + $0xb0] sm:$0xff]  ;;  %v1984_v51 = vld [vmem:[#allocation13 + $0xb8] sm:$0xff] }
 0x523   : > { %v2726_v42 = vpop.f32.mrb[30].mxu1  ;;  %3054 = vmatpush1.bf16.msra.mxu1 %v2973_v28  ;;  %v1524_v28 = vld [vmem:[#allocation10 + $0xc8] sm:$0xff] }
 0x524   : > { %v1322_v6 = vpop.f32.mrb[31].mxu1  ;;  %3008 = vmatprep.subr.bf16.mxu1 %v3007_v57 }
 0x525   : > { %2780 = vmatprep.mubr.f32.mxu1 %v1322_v6 }
 0x526   : > { %2781 = vmatmul.mubr.f32.gmra.mrb[46].mxu1 %v2726_v42  ;;  %v1980_v42 = vld [vmem:[#allocation13 + $0x98] sm:$0xff] }
 0x527   : > { %1675 = vmatprep.mubr.f32.mxu1 %v3574_v0  ;;  %v3011_v56 = vpack.c.bf16 %v1980_v42, %v1979_v18  ;;  %v4346_v18 = vld [vmem:[%s3920_s1 + $0x60] sm:$0xff]  ;;  %v4351_v42 = vld [vmem:[%s3920_s1 + $0x68] sm:$0xff] }
 0x5d9   : > { %v2761_v58 = vpop.f32.mrb[32].mxu1 }
 0x5da   : > { %v1420_v59 = vpop.f32.mrb[33].mxu1  ;;  %v1426_v32 = vadd.f32 %v2761_v58, %v4249_v60 }
 0x5db   : > { %v1421_v63 = vadd.f32 %v4249_v60, %v1420_v59  ;;  %v1523_v59 = vld [vmem:[#allocation10 + $0xc0] sm:$0xff] }
 0x5dd   : > { %1628 = vmatmul.mubr.f32.vlgmr.msra.gmra.mrb[48].mxu0 %v1421_v63 }
 0x5de   : > { %2978 = vmatpush1.bf16.msra.mxu0 %v2977_v62  ;;  %1633 = vmatprep.mubr.f32.mxu0 %v3574_v0  ;;  %v1525_v62 = vld [vmem:[#allocation10 + $0xd0] sm:$0xff] }
 0x5df   : > { %v2764_v25 = vpop.f32.mrb[34].mxu1  ;;  %2980 = vmatprep.subr.bf16.mxu0 %v2979_v1  ;;  %v2999_v1 = vpack.c.bf16 %v1526_v19, %v1524_v28  ;;  %v1968_v28 = vld [vmem:[#allocation13 + $0x38] sm:$0xff]  ;;  %v1985_v19 = vld [vmem:[#allocation13 + $0xc0] sm:$0xff] }
 0x5e0   : > { %v1430_v33 = vpop.f32.mrb[35].mxu1  ;;  %v1436_v48 = vadd.f32 %v2764_v25, %v4249_v60  ;;  %v1965_v25 = vld [vmem:[#allocation13 + $0x20] sm:$0xff] }
 0x5e1   : > { %1634 = vmatmul.mubr.f32.gmra.mrb[50].mxu0 %v1426_v32  ;;  %v1431_v41 = vadd.f32 %v4249_v60, %v1430_v33  ;;  %v3001_v33 = vpack.c.bf16 %v1525_v62, %v1523_v59  ;;  %v1989_v62 = vld [vmem:[#allocation13 + $0xe0] sm:$0xff] }
 0x5e2   : > { %2982 = vmatpush1.bf16.msra.mxu0 %v2981_v26  ;;  %1639 = vmatprep.mubr.f32.mxu0 %v3574_v0  ;;  %v1966_v26 = vld [vmem:[#allocation13 + $0x28] sm:$0xff] }
 0x5e3   : > { %v2767_v39 = vpop.f32.mrb[36].mxu1  ;;  %2984 = vmatprep.subr.bf16.mxu0 %v2983_v27 }
 0x5e4   : > { %v1440_v45 = vpop.f32.mrb[37].mxu1  ;;  %v1446_v31 = vadd.f32 %v2767_v39, %v4249_v60  ;;  %v3003_v39 = vpack.c.bf16 %v1530_v8, %v1528_v40  ;;  %v1973_v40 = vld [vmem:[#allocation13 + $0x60] sm:$0xff] }
 0x5e5   : > { %1640 = vmatmul.mubr.f32.gmra.mrb[52].mxu0 %v1431_v41  ;;  %v1441_v6 = vadd.f32 %v4249_v60, %v1440_v45  ;;  %v3005_v41 = vpack.c.bf16 %v1529_v52, %v1527_v47 }
 0x5e6   : > { %2986 = vmatpush1.bf16.msra.mxu0 %v2985_v29  ;;  %1645 = vmatprep.mubr.f32.mxu0 %v3574_v0  ;;  %v3017_v29 = vpack.c.bf16 %v1966_v26, %v1965_v25  ;;  %v1992_v25 = vld [vmem:[#allocation13 + $0xf8] sm:$0xff] }
 0x5e7   : > { %v4256_v46 = vpop.f32.mrb[38].mxu1  ;;  %2988 = vmatprep.subr.bf16.mxu0 %v2987_v13 }
 0x5e8   : > { %v1450_v2 = vpop.f32.mrb[39].mxu1  ;;  %v1456_v45 = vadd.f32 %v4256_v46, %v4249_v60 }
 0x5e9   : > { %1646 = vmatmul.mubr.f32.gmra.mrb[54].mxu0 %v1436_v48  ;;  %v1451_v27 = vadd.f32 %v4249_v60, %v1450_v2  ;;  %v4294_v2 = vld [vmem:[%s3920_s1 + $0x10] sm:$0xff] }
 0x5ea   : > { %2990 = vmatpush1.bf16.msra.mxu0 %v2989_v36  ;;  %1651 = vmatprep.mubr.f32.mxu0 %v3574_v0  ;;  %v4287_v36 = vld [vmem:[%s3920_s1 + $0x8] sm:$0xff] }
 0x5eb   : > { %v2773_v17 = vpop.f32.mrb[40].mxu1  ;;  %2992 = vmatprep.subr.bf16.mxu0 %v2991_v9 }
 0x5ec   : > { %v1460_v20 = vpop.f32.mrb[41].mxu1  ;;  %v1466_v63 = vadd.f32 %v2773_v17, %v4249_v60  ;;  %v4336_v17 = vld [vmem:[%s3920_s1 + $0x50] sm:$0xff] }
 0x5ed   : > { %v1461_v49 = vadd.f32 %v4249_v60, %v1460_v20  ;;  %1652 = vmatmul.mubr.f32.gmra.mrb[56].mxu0 %v1441_v6  ;;  %v4356_v6 = vld [vmem:[%s3920_s1 + $0x70] sm:$0xff]  ;;  %v4361_v20 = vld [vmem:[%s3920_s1 + $0x78] sm:$0xff] }
 0x5ee   : > { %2994 = vmatpush1.bf16.msra.mxu0 %v2993_v44  ;;  %1657 = vmatprep.mubr.f32.mxu0 %v3574_v0  ;;  %v4341_v44 = vld [vmem:[%s3920_s1 + $0x58] sm:$0xff] }
 0x5ef   : > { %v2776_v57 = vpop.f32.mrb[42].mxu1  ;;  %1676 = vmatmul.mubr.f32.vlgmr.msra.gmra.mrb[48].mxu1 %v1461_v49  ;;  %2996 = vmatprep.subr.bf16.mxu0 %v2995_v54  ;;  %v3019_v49 = vpack.c.bf16 %v1984_v51, %v1983_v50  ;;  %v1967_v54 = vld [vmem:[#allocation13 + $0x30] sm:$0xff] }
 0x5f0   : > { %v1470_v58 = vpop.f32.mrb[43].mxu1  ;;  %1681 = vmatprep.mubr.f32.mxu1 %v3574_v0  ;;  %3010 = vmatpush3.bf16.msra.mxu1 %v3009_v53  ;;  %v1476_v13 = vadd.f32 %v2776_v57, %v4249_v60  ;;  %v3021_v53 = vpack.c.bf16 %v1968_v28, %v1967_v54  ;;  %v1970_v57 = vld [vmem:[#allocation13 + $0x48] sm:$0xff] }
 0x5f1   : > { %1658 = vmatmul.mubr.f32.gmra.mrb[58].mxu0 %v1446_v31  ;;  %3012 = vmatprep.subr.bf16.mxu1 %v3011_v56  ;;  %v1471_v55 = vadd.f32 %v4249_v60, %v1470_v58  ;;  %v1986_v56 = vld [vmem:[#allocation13 + $0xc8] sm:$0xff]  ;;  %v1971_v31 = vld [vmem:[#allocation13 + $0x50] sm:$0xff]  ;;  %v1972_v58 = vld [vmem:[#allocation13 + $0x58] sm:$0xff] }
 0x5f2   : > { %2998 = vmatpush1.bf16.msra.mxu0 %v2997_v22  ;;  %1663 = vmatprep.mubr.f32.mxu0 %v3574_v0  ;;  %v3023_v5 = vpack.c.bf16 %v1986_v56, %v1985_v19  ;;  %v3025_v22 = vpack.c.bf16 %v1970_v57, %v1969_v21  ;;  %v3029_v59 = vpack.c.bf16 %v1972_v58, %v1971_v31 }
 0x5f3   : > { %v2779_v32 = vpop.f32.mrb[44].mxu1  ;;  %1682 = vmatmul.mubr.f32.gmra.mrb[50].mxu1 %v1466_v63  ;;  %3000 = vmatprep.subr.bf16.mxu0 %v2999_v1  ;;  %v1990_v63 = vld [vmem:[#allocation13 + $0xe8] sm:$0xff] }
 0x5f4   : > { %v1480_v38 = vpop.f32.mrb[45].mxu1  ;;  %1687 = vmatprep.mubr.f32.mxu1 %v3574_v0  ;;  %3014 = vmatpush3.bf16.msra.mxu1 %v3013_v24  ;;  %v1486_v46 = vadd.f32 %v2779_v32, %v4249_v60  ;;  %v3031_v1 = vpack.c.bf16 %v1990_v63, %v1989_v62  ;;  %v1974_v24 = vld [vmem:[#allocation13 + $0x68] sm:$0xff]  ;;  %v1975_v32 = vld [vmem:[#allocation13 + $0x70] sm:$0xff] }
 0x5f5   : > { %1664 = vmatmul.mubr.f32.gmra.mrb[60].mxu0 %v1451_v27  ;;  %3016 = vmatprep.subr.bf16.mxu1 %v3015_v12  ;;  %v1481_v61 = vadd.f32 %v4249_v60, %v1480_v38  ;;  %v3033_v8 = vpack.c.bf16 %v1974_v24, %v1973_v40  ;;  %v1991_v12 = vld [vmem:[#allocation13 + $0xf0] sm:$0xff] }
 0x5f6   : > { %3002 = vmatpush1.bf16.msra.mxu0 %v3001_v33  ;;  %1669 = vmatprep.mubr.f32.mxu0 %v3574_v0  ;;  %v3035_v26 = vpack.c.bf16 %v1992_v25, %v1991_v12  ;;  %v1976_v33 = vld [vmem:[#allocation13 + $0x78] sm:$0xff] }
 0x5f7   : > { %1688 = vmatmul.mubr.f32.gmra.mrb[52].mxu1 %v1471_v55  ;;  %3004 = vmatprep.subr.bf16.mxu0 %v3003_v39  ;;  %v3037_v27 = vpack.c.bf16 %v1976_v33, %v1975_v32 }
 0x5f8   : > { %1693 = vmatprep.mubr.f32.mxu1 %v3574_v0  ;;  %3018 = vmatpush3.bf16.msra.mxu1 %v3017_v29 }
 0x5f9   : > { %v2782_v37 = vpop.f32.mrb[46].mxu1  ;;  %1670 = vmatmul.mubr.f32.gmra.mrb[62].mxu0 %v1456_v45  ;;  %3020 = vmatprep.subr.bf16.mxu1 %v3019_v49 }
 0x5fa   : > { %v1490_v35 = vpop.f32.mrb[47].mxu1  ;;  %3006 = vmatpush1.bf16.msra.mxu0 %v3005_v41  ;;  %1788 = vmatprep.mubr.f32.mxu0 %v3574_v0  ;;  %v1496_v9 = vadd.f32 %v2782_v37, %v4249_v60  ;;  %v1885_v41 = vld [vmem:[%s4612_s13] sm:$0x3]  ;;  %s3487_s13 = scalar_lea.vmem %s3486_s12, 4096 }
 0x5fb   : > { %1694 = vmatmul.mubr.f32.gmra.mrb[54].mxu1 %v1476_v13  ;;  %v1491_v48 = vadd.f32 %v4249_v60, %v1490_v35  ;;  %v4316_v60 = vld [vmem:[%s3920_s1 + $0x30] sm:$0xff]  ;;  %v4383_v13 = vrot.slane %v1885_v41, %v562_v4  ;;  %v4389_v35 = vrot.slane %v1885_v41, %v566_v7  ;;  %p3489_p12 = scmp.lt.s32.totalorder %s3487_s13, %s3481_s25 }
 0x5fc   : > { %1699 = vmatprep.mubr.f32.mxu1 %v3574_v0  ;;  %3022 = vmatpush3.bf16.msra.mxu1 %v3021_v53 }
 0x5fd   : > { %1789 = vmatmul.mubr.f32.vlgmr.msra.gmra.mrb[48].mxu0 %v4280_v23  ;;  %3024 = vmatprep.subr.bf16.mxu1 %v3023_v5  ;;  %p3490_p13 = por %p3489_p12, %p3488_p11 }
 0x5fe   : > { %1794 = vmatprep.mubr.f32.mxu0 %v3574_v0 }
 0x5ff   : > { %1700 = vmatmul.mubr.f32.gmra.mrb[56].mxu1 %v1481_v61  ;;  %p3491_p8 = pnand %p3490_p13, %p3484_p1 }
 0x600   : > { %1705 = vmatprep.mubr.f32.mxu1 %v3574_v0  ;;  %3026 = vmatpush3.bf16.msra.mxu1 %v3025_v22 }
 0x601   : > { %1795 = vmatmul.mubr.f32.gmra.mrb[50].mxu0 %v4287_v36 }
 0x602   : > { %1800 = vmatprep.mubr.f32.mxu0 %v3574_v0 }
 0x603   : > { %1706 = vmatmul.mubr.f32.gmra.mrb[58].mxu1 %v1486_v46 }
 0x604   : > { %1711 = vmatprep.mubr.f32.mxu1 %v3574_v0 }
 0x605   : > { %1801 = vmatmul.mubr.f32.gmra.mrb[52].mxu0 %v4294_v2 }
 0x606   : > { %1806 = vmatprep.mubr.f32.mxu0 %v3574_v0 }
 0x607   : > { %1712 = vmatmul.mubr.f32.gmra.mrb[60].mxu1 %v1491_v48 }
 0x608   : > { %1717 = vmatprep.mubr.f32.mxu1 %v3574_v0 }
 0x609   : > { %1807 = vmatmul.mubr.f32.gmra.mrb[54].mxu0 %v4301_v10 }
 0x60a   : > { %1812 = vmatprep.mubr.f32.mxu0 %v3574_v0 }
 0x60b   : > { %1718 = vmatmul.mubr.f32.gmra.mrb[62].mxu1 %v1496_v9 }
 0x60d   : > { %1813 = vmatmul.mubr.f32.gmra.mrb[56].mxu0 %v4306_v30 }
 0x60e   : > { %1818 = vmatprep.mubr.f32.mxu0 %v3574_v0 }
 0x611   : > { %1819 = vmatmul.mubr.f32.gmra.mrb[58].mxu0 %v4311_v34 }
 0x612   : > { %1824 = vmatprep.mubr.f32.mxu0 %v3574_v0 }
 0x615   : > { %1825 = vmatmul.mubr.f32.gmra.mrb[60].mxu0 %v4316_v60 }
 0x616   : > { %1830 = vmatprep.mubr.f32.mxu0 %v3574_v0 }
 0x619   : > { %1831 = vmatmul.mubr.f32.gmra.mrb[62].mxu0 %v4321_v43 }
 0x61a   : > { %1836 = vmatprep.mubr.f32.mxu0 %v3574_v0 }
 0x61d   : > { %1837 = vmatmul.mubr.f32.gmra.mrb[64].mxu0 %v4326_v14 }
 0x61e   : > { %1842 = vmatprep.mubr.f32.mxu0 %v3574_v0 }
 0x621   : > { %1843 = vmatmul.mubr.f32.gmra.mrb[66].mxu0 %v4331_v16 }
 0x622   : > { %1848 = vmatprep.mubr.f32.mxu0 %v3574_v0 }
 0x625   : > { %1849 = vmatmul.mubr.f32.gmra.mrb[68].mxu0 %v4336_v17 }
 0x626   : > { %1854 = vmatprep.mubr.f32.mxu0 %v3574_v0 }
 0x629   : > { %1855 = vmatmul.mubr.f32.gmra.mrb[70].mxu0 %v4341_v44 }
 0x62a   : > { %1860 = vmatprep.mubr.f32.mxu0 %v3574_v0 }
 0x62d   : > { %1861 = vmatmul.mubr.f32.gmra.mrb[72].mxu0 %v4346_v18 }
 0x62e   : > { %1866 = vmatprep.mubr.f32.mxu0 %v3574_v0 }
 0x631   : > { %1867 = vmatmul.mubr.f32.gmra.mrb[74].mxu0 %v4351_v42 }
 0x632   : > { %1872 = vmatprep.mubr.f32.mxu0 %v3574_v0 }
 0x635   : > { %1873 = vmatmul.mubr.f32.gmra.mrb[76].mxu0 %v4356_v6 }
 0x636   : > { %1878 = vmatprep.mubr.f32.mxu0 %v3574_v0  ;;  %v1987_v0 = vld [vmem:[#allocation13 + $0xd0] sm:$0xff] }
 0x637   : > { %v3027_v11 = vpack.c.bf16 %v1988_v15, %v1987_v0 }
 0x639   : > { %1879 = vmatmul.mubr.f32.gmra.mrb[78].mxu0 %v4361_v20  ;;  %3028 = vmatprep.subr.bf16.mxu1 %v3027_v11 }
 0x63a   : > { %3030 = vmatpush3.bf16.msra.mxu1 %v3029_v59 }
 0x63b   : > { %3032 = vmatprep.subr.bf16.mxu1 %v3031_v1 }
 0x63e   : > { %3034 = vmatpush3.bf16.msra.mxu1 %v3033_v8 }
 0x63f   : > { %3036 = vmatprep.subr.bf16.mxu1 %v3035_v26 }
 0x642   : > { %3038 = vmatpush3.bf16.msra.mxu1 %v3037_v27 }
 0x6c2   : > { %v4364_v38 = vpop.f32.mrb[48].mxu1 }
 0x6c3   : > { %v4366_v47 = vpop.f32.mrb[49].mxu1 }
 0x6c6   : > { %v4368_v52 = vpop.f32.mrb[50].mxu1 }
 0x6c7   : > { %v4370_v55 = vpop.f32.mrb[51].mxu1 }
 0x6ca   : > { %v4372_v39 = vpop.f32.mrb[52].mxu1 }
 0x6cb   : > { %v4374_v29 = vpop.f32.mrb[53].mxu1 }
 0x6ce   : > { %v4379_v45 = vpop.f32.mrb[54].mxu1 }
 0x6cf   : > { %v4385_v37 = vpop.f32.mrb[55].mxu1 }
 0x6d0   : > { %v1790_v61 = vpop.f32.mrb[48].mxu0 }
 0x6d1   : > { %v1897_v46 = vadd.f32 %v4383_v13, %v1790_v61  ;;  %v1792_v9 = vpop.f32.mrb[49].mxu0 }
 0x6d2   : > { %v4392_v48 = vpop.f32.mrb[56].mxu1  ;;  %v1898_v50 = vadd.f32 %v4389_v35, %v1792_v9 }
 0x6d3   : > { %v4395_v51 = vpop.f32.mrb[57].mxu1  ;;  %v1929_v4 = vmax.f32 %v1897_v46, 0.0 }
 0x6d4   : > { %v1930_v49 = vmax.f32 %v1898_v50, 0.0  ;;  %v1796_v54 = vpop.f32.mrb[50].mxu0 }
 0x6d5   : > { %v1899_v28 = vadd.f32 %v4383_v13, %v1796_v54  ;;  %v1798_v3 = vpop.f32.mrb[51].mxu0 }
 0x6d6   : > { %v4398_v53 = vpop.f32.mrb[58].mxu1  ;;  %v1900_v7 = vadd.f32 %v4389_v35, %v1798_v3  ;;  %2064 = vmatprep.mubr.f32.mxu1 %v1930_v49 }
 0x6d7   : > { %v4401_v19 = vpop.f32.mrb[59].mxu1  ;;  %2065 = vmatmul.mubr.f32.vlgmr.msra.gmra.mrb[64].mxu1 %v1929_v4  ;;  %v1931_v21 = vmax.f32 %v1899_v28, 0.0 }
 0x6d8   : > { %v1932_v56 = vmax.f32 %v1900_v7, 0.0  ;;  %v1802_v5 = vpop.f32.mrb[52].mxu0 }
 0x6d9   : > { %v1901_v57 = vadd.f32 %v4383_v13, %v1802_v5  ;;  %v1804_v0 = vpop.f32.mrb[53].mxu0 }
 0x6da   : > { %v4404_v22 = vpop.f32.mrb[60].mxu1  ;;  %v1902_v15 = vadd.f32 %v4389_v35, %v1804_v0  ;;  %2069 = vmatprep.mubr.f32.mxu1 %v1932_v56 }
 0x6db   : > { %v4407_v11 = vpop.f32.mrb[61].mxu1  ;;  %2070 = vmatmul.mubr.f32.gmra.mrb[66].mxu1 %v1931_v21  ;;  %v1933_v59 = vmax.f32 %v1901_v57, 0.0 }
 0x6dc   : > { %v1934_v31 = vmax.f32 %v1902_v15, 0.0  ;;  %v1808_v58 = vpop.f32.mrb[54].mxu0 }
 0x6dd   : > { %v1903_v62 = vadd.f32 %v4383_v13, %v1808_v58  ;;  %v1810_v1 = vpop.f32.mrb[55].mxu0 }
 0x6de   : > { %v4410_v63 = vpop.f32.mrb[62].mxu1  ;;  %v1904_v40 = vadd.f32 %v4389_v35, %v1810_v1  ;;  %2074 = vmatprep.mubr.f32.mxu1 %v1934_v31 }
 0x6df   : > { %v4413_v24 = vpop.f32.mrb[63].mxu1  ;;  %2075 = vmatmul.mubr.f32.gmra.mrb[68].mxu1 %v1933_v59  ;;  %v1935_v25 = vmax.f32 %v1903_v62, 0.0 }
 0x6e0   : > { %v1936_v8 = vmax.f32 %v1904_v40, 0.0  ;;  %v1814_v12 = vpop.f32.mrb[56].mxu0 }
 0x6e1   : > { %v1905_v26 = vadd.f32 %v4383_v13, %v1814_v12  ;;  %v1816_v32 = vpop.f32.mrb[57].mxu0 }
 0x6e2   : > { %v1906_v33 = vadd.f32 %v4389_v35, %v1816_v32  ;;  %2079 = vmatprep.mubr.f32.mxu1 %v1936_v8 }
 0x6e3   : > { %2080 = vmatmul.mubr.f32.gmra.mrb[70].mxu1 %v1935_v25  ;;  %v1937_v61 = vmax.f32 %v1905_v26, 0.0 }
 0x6e4   : > { %v1938_v27 = vmax.f32 %v1906_v33, 0.0  ;;  %v1820_v41 = vpop.f32.mrb[58].mxu0 }
 0x6e5   : > { %v1907_v46 = vadd.f32 %v4383_v13, %v1820_v41  ;;  %v1822_v9 = vpop.f32.mrb[59].mxu0 }
 0x6e6   : > { %v1908_v50 = vadd.f32 %v4389_v35, %v1822_v9  ;;  %2084 = vmatprep.mubr.f32.mxu1 %v1938_v27 }
 0x6e7   : > { %2085 = vmatmul.mubr.f32.gmra.mrb[72].mxu1 %v1937_v61  ;;  %v1939_v4 = vmax.f32 %v1907_v46, 0.0 }
 0x6e8   : > { %v1940_v49 = vmax.f32 %v1908_v50, 0.0  ;;  %v1826_v54 = vpop.f32.mrb[60].mxu0 }
 0x6e9   : > { %v1909_v28 = vadd.f32 %v4383_v13, %v1826_v54  ;;  %v1828_v3 = vpop.f32.mrb[61].mxu0 }
 0x6ea   : > { %v1910_v7 = vadd.f32 %v4389_v35, %v1828_v3  ;;  %2089 = vmatprep.mubr.f32.mxu1 %v1940_v49 }
 0x6eb   : > { %2090 = vmatmul.mubr.f32.gmra.mrb[74].mxu1 %v1939_v4  ;;  %v1941_v21 = vmax.f32 %v1909_v28, 0.0 }
 0x6ec   : > { %v1942_v56 = vmax.f32 %v1910_v7, 0.0  ;;  %v1832_v5 = vpop.f32.mrb[62].mxu0 }
 0x6ed   : > { %v1911_v57 = vadd.f32 %v4383_v13, %v1832_v5  ;;  %v1834_v0 = vpop.f32.mrb[63].mxu0 }
 0x6ee   : > { %v1912_v15 = vadd.f32 %v4389_v35, %v1834_v0  ;;  %2094 = vmatprep.mubr.f32.mxu1 %v1942_v56 }
 0x6ef   : > { %2095 = vmatmul.mubr.f32.gmra.mrb[76].mxu1 %v1941_v21  ;;  %v1943_v59 = vmax.f32 %v1911_v57, 0.0 }
 0x6f0   : > { %v1944_v31 = vmax.f32 %v1912_v15, 0.0  ;;  %v1838_v58 = vpop.f32.mrb[64].mxu0 }
 0x6f1   : > { %v1839_v62 = vadd.f32 %v1838_v58, %v4364_v38  ;;  %v1840_v1 = vpop.f32.mrb[65].mxu0 }
 0x6f2   : > { %v1841_v40 = vadd.f32 %v1840_v1, %v4366_v47  ;;  %2099 = vmatprep.mubr.f32.mxu1 %v1944_v31 }
 0x6f3   : > { %v1913_v8 = vadd.f32 %v4383_v13, %v1839_v62  ;;  %2100 = vmatmul.mubr.f32.gmra.mrb[78].mxu1 %v1943_v59 }
 0x6f4   : > { %v1914_v12 = vadd.f32 %v4389_v35, %v1841_v40  ;;  %v1844_v25 = vpop.f32.mrb[66].mxu0 }
 0x6f5   : > { %v1845_v26 = vadd.f32 %v1844_v25, %v4368_v52  ;;  %v1846_v32 = vpop.f32.mrb[67].mxu0  ;;  %v1945_v41 = vmax.f32 %v1913_v8, 0.0 }
 0x6f6   : > { %v1946_v33 = vmax.f32 %v1914_v12, 0.0  ;;  %v1847_v27 = vadd.f32 %v1846_v32, %v4370_v55 }
 0x6f7   : > { %v1915_v61 = vadd.f32 %v4383_v13, %v1845_v26 }
 0x6f8   : > { %v1916_v38 = vadd.f32 %v4389_v35, %v1847_v27  ;;  %v1850_v46 = vpop.f32.mrb[68].mxu0  ;;  %2104 = vmatprep.mubr.f32.mxu1 %v1946_v33 }
 0x6f9   : > { %v1851_v47 = vadd.f32 %v1850_v46, %v4372_v39  ;;  %v1852_v9 = vpop.f32.mrb[69].mxu0  ;;  %2105 = vmatmul.mubr.f32.gmra.mrb[80].mxu1 %v1945_v41  ;;  %v1947_v54 = vmax.f32 %v1915_v61, 0.0 }
 0x6fa   : > { %v1948_v50 = vmax.f32 %v1916_v38, 0.0  ;;  %v1853_v49 = vadd.f32 %v1852_v9, %v4374_v29 }
 0x6fb   : > { %v1917_v52 = vadd.f32 %v4383_v13, %v1851_v47 }
 0x6fc   : > { %v1918_v4 = vadd.f32 %v4389_v35, %v1853_v49  ;;  %v1856_v55 = vpop.f32.mrb[70].mxu0  ;;  %2109 = vmatprep.mubr.f32.mxu1 %v1948_v50 }
 0x6fd   : > { %v1857_v28 = vadd.f32 %v1856_v55, %v4379_v45  ;;  %v1858_v3 = vpop.f32.mrb[71].mxu0  ;;  %2110 = vmatmul.mubr.f32.gmra.mrb[82].mxu1 %v1947_v54  ;;  %v1949_v39 = vmax.f32 %v1917_v52, 0.0 }
 0x6fe   : > { %v1950_v7 = vmax.f32 %v1918_v4, 0.0  ;;  %v1859_v56 = vadd.f32 %v1858_v3, %v4385_v37 }
 0x6ff   : > { %v1919_v5 = vadd.f32 %v4383_v13, %v1857_v28 }
 0x700   : > { %v1920_v21 = vadd.f32 %v4389_v35, %v1859_v56  ;;  %v1862_v29 = vpop.f32.mrb[72].mxu0  ;;  %2114 = vmatprep.mubr.f32.mxu1 %v1950_v7 }
 0x701   : > { %v1863_v57 = vadd.f32 %v1862_v29, %v4392_v48  ;;  %v1864_v0 = vpop.f32.mrb[73].mxu0  ;;  %2115 = vmatmul.mubr.f32.gmra.mrb[84].mxu1 %v1949_v39  ;;  %v1951_v45 = vmax.f32 %v1919_v5, 0.0 }
 0x702   : > { %v1952_v15 = vmax.f32 %v1920_v21, 0.0  ;;  %v1865_v31 = vadd.f32 %v1864_v0, %v4395_v51 }
 0x703   : > { %v1921_v58 = vadd.f32 %v4383_v13, %v1863_v57 }
 0x704   : > { %v1922_v59 = vadd.f32 %v4389_v35, %v1865_v31  ;;  %v1868_v37 = vpop.f32.mrb[74].mxu0  ;;  %2119 = vmatprep.mubr.f32.mxu1 %v1952_v15 }
 0x705   : > { %v1869_v62 = vadd.f32 %v1868_v37, %v4398_v53  ;;  %v1870_v1 = vpop.f32.mrb[75].mxu0  ;;  %2120 = vmatmul.mubr.f32.gmra.mrb[86].mxu1 %v1951_v45  ;;  %v1953_v48 = vmax.f32 %v1921_v58, 0.0 }
 0x706   : > { %v1954_v40 = vmax.f32 %v1922_v59, 0.0  ;;  %v1871_v8 = vadd.f32 %v1870_v1, %v4401_v19 }
 0x707   : > { %v1923_v12 = vadd.f32 %v4383_v13, %v1869_v62 }
 0x708   : > { %v1924_v25 = vadd.f32 %v4389_v35, %v1871_v8  ;;  %v1874_v51 = vpop.f32.mrb[76].mxu0  ;;  %2124 = vmatprep.mubr.f32.mxu1 %v1954_v40 }
 0x709   : > { %v1875_v26 = vadd.f32 %v1874_v51, %v4404_v22  ;;  %v1876_v32 = vpop.f32.mrb[77].mxu0  ;;  %2125 = vmatmul.mubr.f32.gmra.mrb[88].mxu1 %v1953_v48  ;;  %v1955_v53 = vmax.f32 %v1923_v12, 0.0 }
 0x70a   : > { %v1956_v33 = vmax.f32 %v1924_v25, 0.0  ;;  %v1877_v27 = vadd.f32 %v1876_v32, %v4407_v11 }
 0x70b   : > { %v1925_v41 = vadd.f32 %v4383_v13, %v1875_v26 }
 0x70c   : > { %v1926_v61 = vadd.f32 %v4389_v35, %v1877_v27  ;;  %v1880_v19 = vpop.f32.mrb[78].mxu0  ;;  %2129 = vmatprep.mubr.f32.mxu1 %v1956_v33 }
 0x70d   : > { %v1881_v38 = vadd.f32 %v1880_v19, %v4410_v63  ;;  %v1882_v46 = vpop.f32.mrb[79].mxu0  ;;  %2130 = vmatmul.mubr.f32.gmra.mrb[90].mxu1 %v1955_v53  ;;  %v1957_v22 = vmax.f32 %v1925_v41, 0.0  ;;  %v4458_v63 = vld [vmem:[%s4613_s15] ss:$0 sm:$0xff] }
 0x70e   : > { %v1958_v47 = vmax.f32 %v1926_v61, 0.0  ;;  %v1883_v9 = vadd.f32 %v1882_v46, %v4413_v24 }
 0x70f   : > { %v1927_v50 = vadd.f32 %v4383_v13, %v1881_v38 }
 0x710   : > { %v1928_v49 = vadd.f32 %v4389_v35, %v1883_v9  ;;  %2134 = vmatprep.mubr.f32.mxu1 %v1958_v47 }
 0x711   : > { %2135 = vmatmul.mubr.f32.gmra.mrb[92].mxu1 %v1957_v22  ;;  %v1959_v54 = vmax.f32 %v1927_v50, 0.0 }
 0x712   : > { %v1960_v11 = vmax.f32 %v1928_v49, 0.0 }
 0x714   : > { %2139 = vmatprep.mubr.f32.mxu1 %v1960_v11 }
 0x715   : > { %2140 = vmatmul.mubr.f32.gmra.mrb[94].mxu1 %v1959_v54 }
 0x7aa   : > { %v2511_v52 = vpop.f32.mrb[64].mxu1 }
 0x7ab   : > { %v2512_v4 = vpop.f32.mrb[65].mxu1 }
 0x7ac   : > { %v2513_v24 = vadd.f32 %v2512_v4, %v2511_v52 }
 0x7ae   : > { %v2067_v55 = vadd.f32 %v2513_v24, %v4458_v63  ;;  %v2514_v13 = vpop.f32.mrb[66].mxu1 }
 0x7af   : > { %v2515_v28 = vpop.f32.mrb[67].mxu1 }
 0x7b0   : > { %v2145_v35 = vadd.f32 %v4280_v23, %v2067_v55  ;;  %v2516_v3 = vadd.f32 %v2515_v28, %v2514_v13 }
 0x7b2   : > { %2161 = vst [vmem:[%s4464_s11] sm:$0xff] %v2145_v35  ;;  %v2072_v7 = vadd.f32 %v2516_v3, %v4458_v63  ;;  %v2517_v56 = vpop.f32.mrb[68].mxu1 }
 0x7b3   : > { %v2518_v39 = vpop.f32.mrb[69].mxu1 }
 0x7b4   : > { %v2146_v5 = vadd.f32 %v4287_v36, %v2072_v7  ;;  %v2519_v21 = vadd.f32 %v2518_v39, %v2517_v56 }
 0x7b6   : > { %2162 = vst [vmem:[%s4464_s11 + $0x8] sm:$0xff] %v2146_v5  ;;  %v2077_v29 = vadd.f32 %v2519_v21, %v4458_v63  ;;  %v2520_v23 = vpop.f32.mrb[70].mxu1 }
 0x7b7   : > { %v2521_v57 = vpop.f32.mrb[71].mxu1 }
 0x7b8   : > { %v2147_v0 = vadd.f32 %v4294_v2, %v2077_v29  ;;  %v2522_v15 = vadd.f32 %v2521_v57, %v2520_v23 }
 0x7ba   : > { %2163 = vst [vmem:[%s4464_s11 + $0x10] sm:$0xff] %v2147_v0  ;;  %v2082_v31 = vadd.f32 %v2522_v15, %v4458_v63  ;;  %v2523_v45 = vpop.f32.mrb[72].mxu1 }
 0x7bb   : > { %v2524_v58 = vpop.f32.mrb[73].mxu1 }
 0x7bc   : > { %v2148_v59 = vadd.f32 %v4301_v10, %v2082_v31  ;;  %v2525_v37 = vadd.f32 %v2524_v58, %v2523_v45 }
 0x7be   : > { %2164 = vst [vmem:[%s4464_s11 + $0x18] sm:$0xff] %v2148_v59  ;;  %v2087_v36 = vadd.f32 %v2525_v37, %v4458_v63  ;;  %v2526_v62 = vpop.f32.mrb[74].mxu1 }
 0x7bf   : > { %v2527_v1 = vpop.f32.mrb[75].mxu1 }
 0x7c0   : > { %v2149_v40 = vadd.f32 %v4306_v30, %v2087_v36  ;;  %v2528_v8 = vadd.f32 %v2527_v1, %v2526_v62 }
 0x7c2   : > { %2165 = vst [vmem:[%s4464_s11 + $0x20] sm:$0xff] %v2149_v40  ;;  %v2092_v2 = vadd.f32 %v2528_v8, %v4458_v63  ;;  %v2529_v48 = vpop.f32.mrb[76].mxu1 }
 0x7c3   : > { %v2530_v12 = vpop.f32.mrb[77].mxu1 }
 0x7c4   : > { %v2150_v25 = vadd.f32 %v4311_v34, %v2092_v2  ;;  %v2531_v51 = vadd.f32 %v2530_v12, %v2529_v48 }
 0x7c6   : > { %2166 = vst [vmem:[%s4464_s11 + $0x28] sm:$0xff] %v2150_v25  ;;  %v2097_v10 = vadd.f32 %v2531_v51, %v4458_v63  ;;  %v2532_v26 = vpop.f32.mrb[78].mxu1 }
 0x7c7   : > { %v2533_v32 = vpop.f32.mrb[79].mxu1 }
 0x7c8   : > { %v2151_v33 = vadd.f32 %v4316_v60, %v2097_v10  ;;  %v2534_v27 = vadd.f32 %v2533_v32, %v2532_v26 }
 0x7ca   : > { %2167 = vst [vmem:[%s4464_s11 + $0x30] sm:$0xff] %v2151_v33  ;;  %v2102_v30 = vadd.f32 %v2534_v27, %v4458_v63 }
 0x7cc   : > { %v2152_v53 = vadd.f32 %v4321_v43, %v2102_v30  ;;  %v2535_v41 = vpop.f32.mrb[80].mxu1 }
 0x7cd   : > { %v2536_v61 = vpop.f32.mrb[81].mxu1 }
 0x7ce   : > { %2168 = vst [vmem:[%s4464_s11 + $0x38] sm:$0xff] %v2152_v53  ;;  %v2537_v34 = vadd.f32 %v2536_v61, %v2535_v41 }
 0x7d0   : > { %v2107_v19 = vadd.f32 %v2537_v34, %v4458_v63  ;;  %v2538_v38 = vpop.f32.mrb[82].mxu1 }
 0x7d1   : > { %v2539_v46 = vpop.f32.mrb[83].mxu1 }
 0x7d2   : > { %v2153_v47 = vadd.f32 %v4326_v14, %v2107_v19  ;;  %v2540_v9 = vadd.f32 %v2539_v46, %v2538_v38 }
 0x7d4   : > { %2169 = vst [vmem:[%s4464_s11 + $0x40] sm:$0xff] %v2153_v47  ;;  %v2112_v60 = vadd.f32 %v2540_v9, %v4458_v63  ;;  %v2541_v22 = vpop.f32.mrb[84].mxu1 }
 0x7d5   : > { %v2542_v50 = vpop.f32.mrb[85].mxu1 }
 0x7d6   : > { %v2154_v43 = vadd.f32 %v4331_v16, %v2112_v60  ;;  %v2543_v49 = vadd.f32 %v2542_v50, %v2541_v22 }
 0x7d8   : > { %2170 = vst [vmem:[%s4464_s11 + $0x48] sm:$0xff] %v2154_v43  ;;  %v2117_v11 = vadd.f32 %v2543_v49, %v4458_v63  ;;  %v2544_v54 = vpop.f32.mrb[86].mxu1 }
 0x7d9   : > { %v2545_v52 = vpop.f32.mrb[87].mxu1 }
 0x7da   : > { %v2155_v4 = vadd.f32 %v4336_v17, %v2117_v11  ;;  %v2546_v24 = vadd.f32 %v2545_v52, %v2544_v54 }
 0x7dc   : > { %2171 = vst [vmem:[%s4464_s11 + $0x50] sm:$0xff] %v2155_v4  ;;  %v2122_v14 = vadd.f32 %v2546_v24, %v4458_v63  ;;  %v2547_v55 = vpop.f32.mrb[88].mxu1 }
 0x7dd   : > { %v2548_v13 = vpop.f32.mrb[89].mxu1 }
 0x7de   : > { %v2156_v28 = vadd.f32 %v4341_v44, %v2122_v14  ;;  %v2549_v35 = vadd.f32 %v2548_v13, %v2547_v55 }
 0x7e0   : > { %2172 = vst [vmem:[%s4464_s11 + $0x58] sm:$0xff] %v2156_v28  ;;  %v2127_v16 = vadd.f32 %v2549_v35, %v4458_v63  ;;  %v2550_v3 = vpop.f32.mrb[90].mxu1 }
 0x7e1   : > { %v2551_v7 = vpop.f32.mrb[91].mxu1 }
 0x7e2   : > { %v2157_v56 = vadd.f32 %v4346_v18, %v2127_v16  ;;  %v2552_v17 = vadd.f32 %v2551_v7, %v2550_v3 }
 0x7e4   : > { %2173 = vst [vmem:[%s4464_s11 + $0x60] sm:$0xff] %v2157_v56  ;;  %v2132_v39 = vadd.f32 %v2552_v17, %v4458_v63  ;;  %v2553_v5 = vpop.f32.mrb[92].mxu1 }
 0x7e5   : > { %v2554_v21 = vpop.f32.mrb[93].mxu1 }
 0x7e6   : > { %v2158_v44 = vadd.f32 %v4351_v42, %v2132_v39  ;;  %v2555_v29 = vadd.f32 %v2554_v21, %v2553_v5 }
 0x7e8   : > { %2174 = vst [vmem:[%s4464_s11 + $0x68] sm:$0xff] %v2158_v44  ;;  %v2137_v23 = vadd.f32 %v2555_v29, %v4458_v63  ;;  %v2556_v57 = vpop.f32.mrb[94].mxu1 }
 0x7e9   : > { %v2557_v0 = vpop.f32.mrb[95].mxu1 }
 0x7ea   : > { %v2159_v18 = vadd.f32 %v4356_v6, %v2137_v23  ;;  %v2558_v15 = vadd.f32 %v2557_v0, %v2556_v57 }
 0x7ec   : > { %2175 = vst [vmem:[%s4464_s11 + $0x70] sm:$0xff] %v2159_v18  ;;  %v2142_v31 = vadd.f32 %v2558_v15, %v4458_v63 }
 0x7ee   : > { %v2160_v42 = vadd.f32 %v4361_v20, %v2142_v31 }
 0x7f0   : > { %2176 = vst [vmem:[%s4464_s11 + $0x78] sm:$0xff] %v2160_v42 }
 0x7f1   : > { %3494 = shalt.err (!%p3491_p8)
}
 0x7f2   : > { %s3495_s22 = scalar_lea.hbm %s4515_s10, 2048  ;;  %s3499_s11 = scalar_lea.hbm %s4614_s24, 4096 }
 0x7f3   : > { %p3496_p7 = scmp.ne.s32.totalorder %s4515_s10, %s3495_s22  ;;  %p3500_p3 = scmp.lt.u32.totalorder %s4515_s10, %s4614_s24 }
 0x7f4   : > { %p3501_p0 = scmp.lt.u32.totalorder %s3499_s11, %s3495_s22  ;;  %p3503_p6 = scmp.lt.u32.totalorder %s3495_s22, %s4515_s10 }
 0x7f5   : > { %p3497_p9 = pnand %p3496_p7, %p4615_p5 }
 0x7f6   : > { %p3502_p2 = por %p3501_p0, %p3500_p3 }
 0x7f7   : > { %p3498_p4 = pneg %p3497_p9 }
 0x7f8   : > { %p3504_p10 = por %p3503_p6, %p3502_p2 }
 0x7fa   : > { %p3505_p1 = pnand %p3504_p10, %p3498_p4 }
 0x7fc   : > { %3508 = shalt.err (!%p3505_p1)
}
 0x7fd   : > { %s3576_s2 = smov 128   ;;  %s3577_s25 = smov 8  }
 0x7fe   : > { %3113 = dma.vmem_to_hbm [thread:$0]  (%p4615_p5), %s4517_s27, 2048, %s4515_s10, %s2178_s26, %s3576_s2, %s3576_s2, %s3577_s25  }
 0x7ff PF: > { %s2206_s23 = sand.u32 1, %s3547_s17   ;;  %p4616_p11 = scmp.ne.s32.totalorder %s4603_s30, 0 }
 0x800   : > { %p4617_p12 = scmp.ge.s32.totalorder %s3559_s20, 2  ;;  %s2207_s12 = scalar_lea.sflag [#allocation4], %s2206_s23 }
 0x802   : > { %p3139_p13 = pnand %p4617_p12, %p4616_p11 }
 0x804   : > { %3542 = dma.done.wait (!%p3139_p13), %s2207_s12, 2048  }
 0x805   : > { %3544 = vsyncadd (!%p3139_p13), %s2207_s12, 4294965248  ;;  %p27_p8 = scmp.ge.s32.totalorder %s3832_s16, 4   ;;  %s4618_s17 = smov %s3551_s18 }
 0x806   : > { %s4619_s18 = smov %s3555_s19  ;;  %s4620_s19 = smov %s3843_s21 }
 0x807   : > { %s4621_s20 = smov %s3832_s16  ;;  %29 = sbr.rel (!%p27_p8) target bundleno = 14 (0xe), region = 133 }
 0x80e   :  { %2212 = vsyncpa [#allocation3], 1 }
 0x80f   :  { %2214 = vsyncpa [#allocation3 + $0x1], 1 }
 0x810   :  { %2215 = vsyncpa [#allocation6], 1 }
 0x811   :  { %2216 = vsyncpa [#allocation9], 1 }
 0x812   :  { %2217 = vsyncpa [#allocation12], 1 }
 0x813   :  { %2218 = vsyncpa [#allocation4], 1 }
 0x814   :  { %2220 = vsyncpa [#allocation4 + $0x1], 1 }

</bundles_post_ra>
